<compile_context>
chip_gen: v5e
topology: v5e:2x2
jax: 0.10.0
libtpu: 0.0.40
codegen_flags: <defaults>
</compile_context>

<pallas_src>
import functools

import jax
import jax.numpy as jnp
from jax.experimental import pallas as pl
from jax.experimental.pallas import tpu as pltpu


# ---------------------------------------------------------------------------
# Fused RDB kernel builder
# ---------------------------------------------------------------------------
def _make_rdb_kernel(num_layers, in_channels, growth_rate, H, W,
                     abandon_lff_and_residual, compute_dtype):
    """Builds the fused RDB kernel for static (num_layers, shapes, flag, dtype)."""
    Wp = W + 2                      # padded row width (left + right halo column)
    N = H * Wp                      # flat extent of the conv-output slab
    S = Wp + 1                      # slab start: padded row 1, column 1
    TOT = (H + 2) * Wp + 2          # feat width: full haloed image + 2 tap-overrun elems
    HW = H * W
    c_total = in_channels + num_layers * growth_rate

    def kernel(*refs):
        x_ref = refs[0]                                   # (1, Cin, HW) f32
        layer_refs = refs[1:1 + 2 * num_layers]           # (w_i, b_i) pairs
        pos = 1 + 2 * num_layers
        if abandon_lff_and_residual:
            lff_w_ref = lff_b_ref = None
            out_ref, feat_ref = refs[pos], refs[pos + 1]
        else:
            lff_w_ref, lff_b_ref = refs[pos], refs[pos + 1]
            out_ref, feat_ref = refs[pos + 2], refs[pos + 3]

        fdt = compute_dtype

        # ---- zero every halo position the 3x3 taps can read --------------------
        # head: top halo row + left halo of padded row 1
        feat_ref[:, 0:S] = jnp.zeros((c_total, S), fdt)
        # tail: bottom halo row + 2 tap-overrun elements
        feat_ref[:, S + N - 1:TOT] = jnp.zeros((c_total, TOT - (S + N - 1)), fdt)
        # input-channel slab: zero so the interleaved halo columns are zero, then
        # write the interior image rows (one lane-offset store per image row).
        feat_ref[0:in_channels, S:S + N] = jnp.zeros((in_channels, N), fdt)
        for y in range(H):
            dst = S + y * Wp                              # == (y+1)*Wp + 1
            feat_ref[0:in_channels, dst:dst + W] = (
                x_ref[0, :, y * W:(y + 1) * W].astype(fdt))

        # ---- column-validity mask for layer-output writeback -------------------
        # slab index j maps to padded column (j+1) % Wp; valid image columns are 1..W.
        col = (jax.lax.broadcasted_iota(jnp.int32, (1, N), 1) + 1) % Wp
        valid = jnp.logical_and(col >= 1, col <= W)
        mask = jnp.broadcast_to(valid, (growth_rate, N))   # hoisted out of the loop

        # ---- dense layers: 9 copy-free tap matmuls + bias + Mish ---------------
        cin = in_channels
        for i in range(num_layers):
            w_ref = layer_refs[2 * i]        # (9, growth, cin)  compute_dtype
            b_ref = layer_refs[2 * i + 1]    # (growth, 1)       f32

            acc = None
            tap = 0
            for oy in (-1, 0, 1):
                for ox in (-1, 0, 1):
                    off = oy * Wp + ox
                    inp = feat_ref[0:cin, S + off:S + off + N]   # contiguous view
                    d = jnp.dot(w_ref[tap], inp,
                                preferred_element_type=jnp.float32)  # (growth, N)
                    acc = d if acc is None else acc + d
                    tap += 1
            acc = acc + b_ref[...]

            # Mish: x * tanh(softplus(x)) == x * u / (u + 2), u = e^x (e^x + 2)
            t = jnp.exp(jnp.minimum(acc, 20.0))
            u = t * (t + 2.0)
            mish = acc * (u / (u + 2.0))

            row0 = in_channels + i * growth_rate
            feat_ref[row0:row0 + growth_rate, S:S + N] = (
                jnp.where(mask, mish, 0.0).astype(fdt))   # keep halo columns zero
            cin += growth_rate

        # ---- output ------------------------------------------------------------
        if abandon_lff_and_residual:
            all_feat = feat_ref[0:c_total, S:S + N].astype(jnp.float32)
            all_img = all_feat.reshape(c_total, H, Wp)[:, :, 0:W].reshape(c_total, HW)
            out_ref[0] = all_img.astype(out_ref.dtype)
            # first Cin channels are the block input: keep the exact f32 copy
            out_ref[0, 0:in_channels, :] = x_ref[0]
        else:
            feat_all = feat_ref[0:c_total, S:S + N]        # (c_total, N) compute_dtype
            fused = jnp.dot(lff_w_ref[...], feat_all,
                            preferred_element_type=jnp.float32)   # (Cin, N)
            fused = fused + lff_b_ref[...]
            fused_flat = fused.reshape(in_channels, H, Wp)[:, :, 0:W].reshape(
                in_channels, HW)
            out_ref[0] = (x_ref[0] + 0.2 * fused_flat).astype(out_ref.dtype)

    return kernel


def _vmem_limit_bytes():
    """Per-generation VMEM budget: ~75% of physical capacity (fallback 48 MiB)."""
    try:
        cap = int(pltpu.get_tpu_info().vmem_capacity_bytes)
    except Exception:
        cap = 64 * 1024 * 1024
    return max(32 * 1024 * 1024, int(cap * 3 // 4))


# ---------------------------------------------------------------------------
# Wrapper (NCHW interface like the PyTorch module)
# ---------------------------------------------------------------------------
@functools.partial(jax.jit,
                   static_argnames=("abandon_lff_and_residual", "compute_dtype"))
def rdb_forward(x_nchw, params, lff_params, abandon_lff_and_residual=False,
                compute_dtype=jnp.float32):
    """ResidualDenseBlock forward. x_nchw: (N, Cin, H, W)."""
    N, in_channels, H, W = x_nchw.shape
    HW = H * W
    Wp = W + 2
    num_layers = len(params)
    growth = params[0][1].shape[0]
    c_total = in_channels + num_layers * growth

    # NCHW with H*W flattened == channels on sublanes, spatial on lanes (lane-dense I/O).
    x = x_nchw.reshape(N, in_channels, HW).astype(jnp.float32)

    inputs = [x]
    in_specs = [pl.BlockSpec((1, in_channels, HW), lambda n: (n, 0, 0))]
    cin = in_channels
    for (w_hwio, b) in params:
        # (3,3,cin,growth) HWIO -> (9, growth, cin); tap index = ky*3 + kx.
        w_taps = jnp.transpose(w_hwio, (0, 1, 3, 2)).reshape(9, growth, cin)
        inputs.append(w_taps.astype(compute_dtype))
        in_specs.append(pl.BlockSpec((9, growth, cin), lambda n: (0, 0, 0)))
        inputs.append(b.reshape(growth, 1).astype(jnp.float32))
        in_specs.append(pl.BlockSpec((growth, 1), lambda n: (0, 0)))
        cin += growth

    if abandon_lff_and_residual:
        out_c = c_total
    else:
        lff_w, lff_b = lff_params
        inputs.append(jnp.transpose(lff_w).astype(compute_dtype))     # (Cin, c_total)
        in_specs.append(pl.BlockSpec((in_channels, c_total), lambda n: (0, 0)))
        inputs.append(lff_b.reshape(in_channels, 1).astype(jnp.float32))
        in_specs.append(pl.BlockSpec((in_channels, 1), lambda n: (0, 0)))
        out_c = in_channels

    kernel = _make_rdb_kernel(num_layers, in_channels, growth, H, W,
                              abandon_lff_and_residual, compute_dtype)

    TOT = (H + 2) * Wp + 2
    out = pl.pallas_call(
        kernel,
        out_shape=jax.ShapeDtypeStruct((N, out_c, HW), jnp.float32),
        grid=(N,),
        in_specs=in_specs,
        out_specs=pl.BlockSpec((1, out_c, HW), lambda n: (n, 0, 0)),
        scratch_shapes=[
            # fully zero-haloed dense feature map, in compute_dtype
            pltpu.VMEM((c_total, TOT), compute_dtype),
        ],
        compiler_params=pltpu.CompilerParams(
            dimension_semantics=("parallel",),
            vmem_limit_bytes=_vmem_limit_bytes()),
    )(*inputs)
    return out.reshape(N, out_c, H, W)


# ---------------------------------------------------------------------------
# Parameter init (PyTorch Conv2d-style uniform bound) and pure-JAX reference
# ---------------------------------------------------------------------------
def rdb_init_params(key, in_channels, growth_rate, num_layers):
    params = []
    c = in_channels
    for _ in range(num_layers):
        key, kw, kb = jax.random.split(key, 3)
        fan_in = c * 3 * 3
        bound = 1.0 / jnp.sqrt(fan_in)
        w = jax.random.uniform(kw, (3, 3, c, growth_rate), jnp.float32, -bound, bound)
        b = jax.random.uniform(kb, (growth_rate,), jnp.float32, -bound, bound)
        params.append((w, b))
        c += growth_rate
    key, kw, kb = jax.random.split(key, 3)
    bound = 1.0 / jnp.sqrt(c)
    lff_w = jax.random.uniform(kw, (c, in_channels), jnp.float32, -bound, bound)
    lff_b = jax.random.uniform(kb, (in_channels,), jnp.float32, -bound, bound)
    return params, (lff_w, lff_b)


def _mish(x):
    return x * jnp.tanh(jax.nn.softplus(x))


def rdb_reference(x_nchw, params, lff_params, abandon_lff_and_residual=False):
    feat = x_nchw
    for (w_hwio, b) in params:
        w_oihw = jnp.transpose(w_hwio, (3, 2, 0, 1))
        y = jax.lax.conv_general_dilated(
            feat, w_oihw, window_strides=(1, 1), padding="SAME",
            dimension_numbers=("NCHW", "OIHW", "NCHW"))
        y = _mish(y + b[None, :, None, None])
        feat = jnp.concatenate([feat, y], axis=1)
    if abandon_lff_and_residual:
        return feat
    lff_w, lff_b = lff_params
    w_oihw = jnp.transpose(lff_w.reshape(1, 1, *lff_w.shape), (3, 2, 0, 1))
    fused = jax.lax.conv_general_dilated(
        feat, w_oihw, window_strides=(1, 1), padding="VALID",
        dimension_numbers=("NCHW", "OIHW", "NCHW"))
    fused = fused + lff_b[None, :, None, None]
    return x_nchw + 0.2 * fused


# ---------------------------------------------------------------------------
if __name__ == "__main__":
    in_channels, growth_rate, num_layers = 4, 4, 3
    N, H, W = 2, 16, 16

    key = jax.random.PRNGKey(0)
    key, kx = jax.random.split(key)
    x = jax.random.normal(kx, (N, in_channels, H, W), jnp.float32)   # NCHW input
    params, lff_params = rdb_init_params(key, in_channels, growth_rate, num_layers)

    # f32 path: only differences vs reference are fp-associativity-level.
    out = jax.block_until_ready(rdb_forward(x, params, lff_params))
    ref = rdb_reference(x, params, lff_params)
    assert out.shape == ref.shape == (N, in_channels, H, W)
    assert jnp.allclose(out, ref, rtol=1e-2, atol=1e-2), "mismatch vs JAX reference"

    # abandon_lff_and_residual branch returns the raw dense concat.
    raw = jax.block_until_ready(
        rdb_forward(x, params, lff_params, abandon_lff_and_residual=True))
    raw_ref = rdb_reference(x, params, lff_params, abandon_lff_and_residual=True)
    assert raw.shape == (N, in_channels + growth_rate * num_layers, H, W)
    assert jnp.allclose(raw, raw_ref, rtol=1e-2, atol=1e-2), "mismatch (abandon branch)"

    # bf16 weights/features path (f32 accumulation): loose numerical check.
    out_bf16 = jax.block_until_ready(
        rdb_forward(x, params, lff_params, compute_dtype=jnp.bfloat16))
    assert out_bf16.shape == ref.shape
    assert jnp.allclose(out_bf16, ref, rtol=1e-1, atol=1e-1), "mismatch (bf16 path)"

    print("KERNEL_OK")
</pallas_src>

<mosaic_0001>
module attributes {stable_mosaic.version = 11 : i64} {
  func.func @kernel(%arg0: i32, %arg1: memref<1x4x256xf32, #tpu.memory_space<vmem>>, %arg2: memref<9x4x4xf32, #tpu.memory_space<vmem>>, %arg3: memref<4x1xf32, #tpu.memory_space<vmem>>, %arg4: memref<9x4x8xf32, #tpu.memory_space<vmem>>, %arg5: memref<4x1xf32, #tpu.memory_space<vmem>>, %arg6: memref<9x4x12xf32, #tpu.memory_space<vmem>>, %arg7: memref<4x1xf32, #tpu.memory_space<vmem>>, %arg8: memref<4x16xf32, #tpu.memory_space<vmem>>, %arg9: memref<4x1xf32, #tpu.memory_space<vmem>>, %arg10: memref<1x4x256xf32, #tpu.memory_space<vmem>>, %arg11: memref<16x326xf32, #tpu.memory_space<vmem>>) attributes {dimension_semantics = [#tpu.dimension_semantics<parallel>], iteration_bounds = array<i64: 2>, scalar_prefetch = 0 : i64, scratch_operands = 1 : i64, tpu.core_type = #tpu.core_type<tc>, window_params = [{transform_indices = @transform_0, window_bounds = array<i64: 1, 4, 256>}, {pipeline_mode = #tpu.pipeline_mode<synchronous>, transform_indices = @transform_1, window_bounds = array<i64: 9, 4, 4>}, {pipeline_mode = #tpu.pipeline_mode<synchronous>, transform_indices = @transform_2, window_bounds = array<i64: 4, 1>}, {pipeline_mode = #tpu.pipeline_mode<synchronous>, transform_indices = @transform_3, window_bounds = array<i64: 9, 4, 8>}, {pipeline_mode = #tpu.pipeline_mode<synchronous>, transform_indices = @transform_4, window_bounds = array<i64: 4, 1>}, {pipeline_mode = #tpu.pipeline_mode<synchronous>, transform_indices = @transform_5, window_bounds = array<i64: 9, 4, 12>}, {pipeline_mode = #tpu.pipeline_mode<synchronous>, transform_indices = @transform_6, window_bounds = array<i64: 4, 1>}, {pipeline_mode = #tpu.pipeline_mode<synchronous>, transform_indices = @transform_7, window_bounds = array<i64: 4, 16>}, {pipeline_mode = #tpu.pipeline_mode<synchronous>, transform_indices = @transform_8, window_bounds = array<i64: 4, 1>}, {transform_indices = @transform_9, window_bounds = array<i64: 1, 4, 256>}]} {
    %cst = arith.constant 0.000000e+00 : f32
    %0 = vector.broadcast %cst : f32 to vector<16x19xf32>
    %c0 = arith.constant 0 : index
    %c0_0 = arith.constant 0 : index
    %1 = vector.load %arg11[%c0, %c0_0] : memref<16x326xf32, #tpu.memory_space<vmem>>, vector<16x19xf32>
    tpu.vector_store %arg11[%c0, %c0_0], %0 {strides = array<i32>} : memref<16x326xf32, #tpu.memory_space<vmem>>, vector<16x19xf32>,
    %cst_1 = arith.constant 0.000000e+00 : f32
    %2 = vector.broadcast %cst_1 : f32 to vector<16x20xf32>
    %c0_2 = arith.constant 0 : index
    %c306 = arith.constant 306 : index
    %3 = vector.load %arg11[%c0_2, %c306] : memref<16x326xf32, #tpu.memory_space<vmem>>, vector<16x20xf32>
    tpu.vector_store %arg11[%c0_2, %c306], %2 {strides = array<i32>} : memref<16x326xf32, #tpu.memory_space<vmem>>, vector<16x20xf32>,
    %cst_3 = arith.constant 0.000000e+00 : f32
    %4 = vector.broadcast %cst_3 : f32 to vector<4x288xf32>
    %c0_4 = arith.constant 0 : index
    %c19 = arith.constant 19 : index
    %5 = vector.load %arg11[%c0_4, %c19] : memref<16x326xf32, #tpu.memory_space<vmem>>, vector<4x288xf32>
    tpu.vector_store %arg11[%c0_4, %c19], %4 {strides = array<i32>} : memref<16x326xf32, #tpu.memory_space<vmem>>, vector<4x288xf32>,
    %c0_5 = arith.constant 0 : index
    %c0_6 = arith.constant 0 : index
    %c0_7 = arith.constant 0 : index
    %6 = vector.load %arg1[%c0_5, %c0_6, %c0_7] : memref<1x4x256xf32, #tpu.memory_space<vmem>>, vector<1x4x16xf32>
    %7 = vector.shape_cast %6 : vector<1x4x16xf32> to vector<4x16xf32>
    %c0_8 = arith.constant 0 : index
    %c19_9 = arith.constant 19 : index
    %8 = vector.load %arg11[%c0_8, %c19_9] : memref<16x326xf32, #tpu.memory_space<vmem>>, vector<4x16xf32>
    tpu.vector_store %arg11[%c0_8, %c19_9], %7 {strides = array<i32>} : memref<16x326xf32, #tpu.memory_space<vmem>>, vector<4x16xf32>,
    %c0_10 = arith.constant 0 : index
    %c0_11 = arith.constant 0 : index
    %c16 = arith.constant 16 : index
    %9 = vector.load %arg1[%c0_10, %c0_11, %c16] : memref<1x4x256xf32, #tpu.memory_space<vmem>>, vector<1x4x16xf32>
    %10 = vector.shape_cast %9 : vector<1x4x16xf32> to vector<4x16xf32>
    %c0_12 = arith.constant 0 : index
    %c37 = arith.constant 37 : index
    %11 = vector.load %arg11[%c0_12, %c37] : memref<16x326xf32, #tpu.memory_space<vmem>>, vector<4x16xf32>
    tpu.vector_store %arg11[%c0_12, %c37], %10 {strides = array<i32>} : memref<16x326xf32, #tpu.memory_space<vmem>>, vector<4x16xf32>,
    %c0_13 = arith.constant 0 : index
    %c0_14 = arith.constant 0 : index
    %c32 = arith.constant 32 : index
    %12 = vector.load %arg1[%c0_13, %c0_14, %c32] : memref<1x4x256xf32, #tpu.memory_space<vmem>>, vector<1x4x16xf32>
    %13 = vector.shape_cast %12 : vector<1x4x16xf32> to vector<4x16xf32>
    %c0_15 = arith.constant 0 : index
    %c55 = arith.constant 55 : index
    %14 = vector.load %arg11[%c0_15, %c55] : memref<16x326xf32, #tpu.memory_space<vmem>>, vector<4x16xf32>
    tpu.vector_store %arg11[%c0_15, %c55], %13 {strides = array<i32>} : memref<16x326xf32, #tpu.memory_space<vmem>>, vector<4x16xf32>,
    %c0_16 = arith.constant 0 : index
    %c0_17 = arith.constant 0 : index
    %c48 = arith.constant 48 : index
    %15 = vector.load %arg1[%c0_16, %c0_17, %c48] : memref<1x4x256xf32, #tpu.memory_space<vmem>>, vector<1x4x16xf32>
    %16 = vector.shape_cast %15 : vector<1x4x16xf32> to vector<4x16xf32>
    %c0_18 = arith.constant 0 : index
    %c73 = arith.constant 73 : index
    %17 = vector.load %arg11[%c0_18, %c73] : memref<16x326xf32, #tpu.memory_space<vmem>>, vector<4x16xf32>
    tpu.vector_store %arg11[%c0_18, %c73], %16 {strides = array<i32>} : memref<16x326xf32, #tpu.memory_space<vmem>>, vector<4x16xf32>,
    %c0_19 = arith.constant 0 : index
    %c0_20 = arith.constant 0 : index
    %c64 = arith.constant 64 : index
    %18 = vector.load %arg1[%c0_19, %c0_20, %c64] : memref<1x4x256xf32, #tpu.memory_space<vmem>>, vector<1x4x16xf32>
    %19 = vector.shape_cast %18 : vector<1x4x16xf32> to vector<4x16xf32>
    %c0_21 = arith.constant 0 : index
    %c91 = arith.constant 91 : index
    %20 = vector.load %arg11[%c0_21, %c91] : memref<16x326xf32, #tpu.memory_space<vmem>>, vector<4x16xf32>
    tpu.vector_store %arg11[%c0_21, %c91], %19 {strides = array<i32>} : memref<16x326xf32, #tpu.memory_space<vmem>>, vector<4x16xf32>,
    %c0_22 = arith.constant 0 : index
    %c0_23 = arith.constant 0 : index
    %c80 = arith.constant 80 : index
    %21 = vector.load %arg1[%c0_22, %c0_23, %c80] : memref<1x4x256xf32, #tpu.memory_space<vmem>>, vector<1x4x16xf32>
    %22 = vector.shape_cast %21 : vector<1x4x16xf32> to vector<4x16xf32>
    %c0_24 = arith.constant 0 : index
    %c109 = arith.constant 109 : index
    %23 = vector.load %arg11[%c0_24, %c109] : memref<16x326xf32, #tpu.memory_space<vmem>>, vector<4x16xf32>
    tpu.vector_store %arg11[%c0_24, %c109], %22 {strides = array<i32>} : memref<16x326xf32, #tpu.memory_space<vmem>>, vector<4x16xf32>,
    %c0_25 = arith.constant 0 : index
    %c0_26 = arith.constant 0 : index
    %c96 = arith.constant 96 : index
    %24 = vector.load %arg1[%c0_25, %c0_26, %c96] : memref<1x4x256xf32, #tpu.memory_space<vmem>>, vector<1x4x16xf32>
    %25 = vector.shape_cast %24 : vector<1x4x16xf32> to vector<4x16xf32>
    %c0_27 = arith.constant 0 : index
    %c127 = arith.constant 127 : index
    %26 = vector.load %arg11[%c0_27, %c127] : memref<16x326xf32, #tpu.memory_space<vmem>>, vector<4x16xf32>
    tpu.vector_store %arg11[%c0_27, %c127], %25 {strides = array<i32>} : memref<16x326xf32, #tpu.memory_space<vmem>>, vector<4x16xf32>,
    %c0_28 = arith.constant 0 : index
    %c0_29 = arith.constant 0 : index
    %c112 = arith.constant 112 : index
    %27 = vector.load %arg1[%c0_28, %c0_29, %c112] : memref<1x4x256xf32, #tpu.memory_space<vmem>>, vector<1x4x16xf32>
    %28 = vector.shape_cast %27 : vector<1x4x16xf32> to vector<4x16xf32>
    %c0_30 = arith.constant 0 : index
    %c145 = arith.constant 145 : index
    %29 = vector.load %arg11[%c0_30, %c145] : memref<16x326xf32, #tpu.memory_space<vmem>>, vector<4x16xf32>
    tpu.vector_store %arg11[%c0_30, %c145], %28 {strides = array<i32>} : memref<16x326xf32, #tpu.memory_space<vmem>>, vector<4x16xf32>,
    %c0_31 = arith.constant 0 : index
    %c0_32 = arith.constant 0 : index
    %c128 = arith.constant 128 : index
    %30 = vector.load %arg1[%c0_31, %c0_32, %c128] : memref<1x4x256xf32, #tpu.memory_space<vmem>>, vector<1x4x16xf32>
    %31 = vector.shape_cast %30 : vector<1x4x16xf32> to vector<4x16xf32>
    %c0_33 = arith.constant 0 : index
    %c163 = arith.constant 163 : index
    %32 = vector.load %arg11[%c0_33, %c163] : memref<16x326xf32, #tpu.memory_space<vmem>>, vector<4x16xf32>
    tpu.vector_store %arg11[%c0_33, %c163], %31 {strides = array<i32>} : memref<16x326xf32, #tpu.memory_space<vmem>>, vector<4x16xf32>,
    %c0_34 = arith.constant 0 : index
    %c0_35 = arith.constant 0 : index
    %c144 = arith.constant 144 : index
    %33 = vector.load %arg1[%c0_34, %c0_35, %c144] : memref<1x4x256xf32, #tpu.memory_space<vmem>>, vector<1x4x16xf32>
    %34 = vector.shape_cast %33 : vector<1x4x16xf32> to vector<4x16xf32>
    %c0_36 = arith.constant 0 : index
    %c181 = arith.constant 181 : index
    %35 = vector.load %arg11[%c0_36, %c181] : memref<16x326xf32, #tpu.memory_space<vmem>>, vector<4x16xf32>
    tpu.vector_store %arg11[%c0_36, %c181], %34 {strides = array<i32>} : memref<16x326xf32, #tpu.memory_space<vmem>>, vector<4x16xf32>,
    %c0_37 = arith.constant 0 : index
    %c0_38 = arith.constant 0 : index
    %c160 = arith.constant 160 : index
    %36 = vector.load %arg1[%c0_37, %c0_38, %c160] : memref<1x4x256xf32, #tpu.memory_space<vmem>>, vector<1x4x16xf32>
    %37 = vector.shape_cast %36 : vector<1x4x16xf32> to vector<4x16xf32>
    %c0_39 = arith.constant 0 : index
    %c199 = arith.constant 199 : index
    %38 = vector.load %arg11[%c0_39, %c199] : memref<16x326xf32, #tpu.memory_space<vmem>>, vector<4x16xf32>
    tpu.vector_store %arg11[%c0_39, %c199], %37 {strides = array<i32>} : memref<16x326xf32, #tpu.memory_space<vmem>>, vector<4x16xf32>,
    %c0_40 = arith.constant 0 : index
    %c0_41 = arith.constant 0 : index
    %c176 = arith.constant 176 : index
    %39 = vector.load %arg1[%c0_40, %c0_41, %c176] : memref<1x4x256xf32, #tpu.memory_space<vmem>>, vector<1x4x16xf32>
    %40 = vector.shape_cast %39 : vector<1x4x16xf32> to vector<4x16xf32>
    %c0_42 = arith.constant 0 : index
    %c217 = arith.constant 217 : index
    %41 = vector.load %arg11[%c0_42, %c217] : memref<16x326xf32, #tpu.memory_space<vmem>>, vector<4x16xf32>
    tpu.vector_store %arg11[%c0_42, %c217], %40 {strides = array<i32>} : memref<16x326xf32, #tpu.memory_space<vmem>>, vector<4x16xf32>,
    %c0_43 = arith.constant 0 : index
    %c0_44 = arith.constant 0 : index
    %c192 = arith.constant 192 : index
    %42 = vector.load %arg1[%c0_43, %c0_44, %c192] : memref<1x4x256xf32, #tpu.memory_space<vmem>>, vector<1x4x16xf32>
    %43 = vector.shape_cast %42 : vector<1x4x16xf32> to vector<4x16xf32>
    %c0_45 = arith.constant 0 : index
    %c235 = arith.constant 235 : index
    %44 = vector.load %arg11[%c0_45, %c235] : memref<16x326xf32, #tpu.memory_space<vmem>>, vector<4x16xf32>
    tpu.vector_store %arg11[%c0_45, %c235], %43 {strides = array<i32>} : memref<16x326xf32, #tpu.memory_space<vmem>>, vector<4x16xf32>,
    %c0_46 = arith.constant 0 : index
    %c0_47 = arith.constant 0 : index
    %c208 = arith.constant 208 : index
    %45 = vector.load %arg1[%c0_46, %c0_47, %c208] : memref<1x4x256xf32, #tpu.memory_space<vmem>>, vector<1x4x16xf32>
    %46 = vector.shape_cast %45 : vector<1x4x16xf32> to vector<4x16xf32>
    %c0_48 = arith.constant 0 : index
    %c253 = arith.constant 253 : index
    %47 = vector.load %arg11[%c0_48, %c253] : memref<16x326xf32, #tpu.memory_space<vmem>>, vector<4x16xf32>
    tpu.vector_store %arg11[%c0_48, %c253], %46 {strides = array<i32>} : memref<16x326xf32, #tpu.memory_space<vmem>>, vector<4x16xf32>,
    %c0_49 = arith.constant 0 : index
    %c0_50 = arith.constant 0 : index
    %c224 = arith.constant 224 : index
    %48 = vector.load %arg1[%c0_49, %c0_50, %c224] : memref<1x4x256xf32, #tpu.memory_space<vmem>>, vector<1x4x16xf32>
    %49 = vector.shape_cast %48 : vector<1x4x16xf32> to vector<4x16xf32>
    %c0_51 = arith.constant 0 : index
    %c271 = arith.constant 271 : index
    %50 = vector.load %arg11[%c0_51, %c271] : memref<16x326xf32, #tpu.memory_space<vmem>>, vector<4x16xf32>
    tpu.vector_store %arg11[%c0_51, %c271], %49 {strides = array<i32>} : memref<16x326xf32, #tpu.memory_space<vmem>>, vector<4x16xf32>,
    %c0_52 = arith.constant 0 : index
    %c0_53 = arith.constant 0 : index
    %c240 = arith.constant 240 : index
    %51 = vector.load %arg1[%c0_52, %c0_53, %c240] : memref<1x4x256xf32, #tpu.memory_space<vmem>>, vector<1x4x16xf32>
    %52 = vector.shape_cast %51 : vector<1x4x16xf32> to vector<4x16xf32>
    %c0_54 = arith.constant 0 : index
    %c289 = arith.constant 289 : index
    %53 = vector.load %arg11[%c0_54, %c289] : memref<16x326xf32, #tpu.memory_space<vmem>>, vector<4x16xf32>
    tpu.vector_store %arg11[%c0_54, %c289], %52 {strides = array<i32>} : memref<16x326xf32, #tpu.memory_space<vmem>>, vector<4x16xf32>,
    %54 = tpu.iota {dimensions = array<i32: 1>} : vector<1x288xi32>
    %c1_i32 = arith.constant 1 : i32
    %55 = vector.broadcast %c1_i32 : i32 to vector<1x288xi32>
    %56 = arith.addi %54, %55 : vector<1x288xi32>
    %c18_i32 = arith.constant 18 : i32
    %c0_i32 = arith.constant 0 : i32
    %57 = arith.cmpi eq, %c18_i32, %c0_i32 : i32
    %c1_i32_55 = arith.constant 1 : i32
    %58 = arith.select %57, %c1_i32_55, %c18_i32 : i32
    %59 = vector.broadcast %58 : i32 to vector<1x288xi32>
    %60 = arith.remsi %56, %59 : vector<1x288xi32>
    %c0_i32_56 = arith.constant 0 : i32
    %61 = vector.broadcast %c0_i32_56 : i32 to vector<1x288xi32>
    %62 = arith.cmpi ne, %60, %61 : vector<1x288xi32>
    %c0_i32_57 = arith.constant 0 : i32
    %63 = vector.broadcast %c0_i32_57 : i32 to vector<1x288xi32>
    %64 = arith.cmpi slt, %60, %63 : vector<1x288xi32>
    %c0_i32_58 = arith.constant 0 : i32
    %65 = arith.cmpi slt, %58, %c0_i32_58 : i32
    %66 = vector.broadcast %65 : i1 to vector<1x288xi1>
    %67 = vector.broadcast %66 : vector<1x288xi1> to vector<1x288xi1>
    %68 = arith.xori %64, %67 : vector<1x288xi1>
    %69 = arith.andi %68, %62 : vector<1x288xi1>
    %70 = vector.broadcast %58 : i32 to vector<1x288xi32>
    %71 = arith.addi %60, %70 : vector<1x288xi32>
    %72 = arith.select %69, %71, %60 : vector<1x288xi1>, vector<1x288xi32>
    %c1_i32_59 = arith.constant 1 : i32
    %73 = vector.broadcast %c1_i32_59 : i32 to vector<1x288xi32>
    %74 = arith.cmpi sge, %72, %73 : vector<1x288xi32>
    %c16_i32 = arith.constant 16 : i32
    %75 = vector.broadcast %c16_i32 : i32 to vector<1x288xi32>
    %76 = arith.cmpi sle, %72, %75 : vector<1x288xi32>
    %77 = arith.andi %74, %76 : vector<1x288xi1>
    %78 = vector.shape_cast %77 : vector<1x288xi1> to vector<1x288xi1>
    %79 = vector.broadcast %78 : vector<1x288xi1> to vector<4x288xi1>
    %c0_60 = arith.constant 0 : index
    %c0_61 = arith.constant 0 : index
    %80 = vector.load %arg11[%c0_60, %c0_61] : memref<16x326xf32, #tpu.memory_space<vmem>>, vector<4x288xf32>
    %c0_62 = arith.constant 0 : index
    %c0_63 = arith.constant 0 : index
    %c0_64 = arith.constant 0 : index
    %81 = vector.load %arg2[%c0_62, %c0_63, %c0_64] : memref<9x4x4xf32, #tpu.memory_space<vmem>>, vector<1x4x4xf32>
    %82 = vector.shape_cast %81 : vector<1x4x4xf32> to vector<4x4xf32>
    %cst_65 = arith.constant dense<0.000000e+00> : vector<4x288xf32>
    %83 = tpu.matmul %82, %80, %cst_65 {dimension_numbers = #tpu.dot_dimension_numbers<[1], [0], [0], [1], [0, 0, 1, 1], [], []>} : vector<4x4xf32>, vector<4x288xf32>, vector<4x288xf32> -> vector<4x288xf32>
    %c0_66 = arith.constant 0 : index
    %c1 = arith.constant 1 : index
    %84 = vector.load %arg11[%c0_66, %c1] : memref<16x326xf32, #tpu.memory_space<vmem>>, vector<4x288xf32>
    %c1_67 = arith.constant 1 : index
    %c0_68 = arith.constant 0 : index
    %c0_69 = arith.constant 0 : index
    %85 = vector.load %arg2[%c1_67, %c0_68, %c0_69] : memref<9x4x4xf32, #tpu.memory_space<vmem>>, vector<1x4x4xf32>
    %86 = vector.shape_cast %85 : vector<1x4x4xf32> to vector<4x4xf32>
    %cst_70 = arith.constant dense<0.000000e+00> : vector<4x288xf32>
    %87 = tpu.matmul %86, %84, %cst_70 {dimension_numbers = #tpu.dot_dimension_numbers<[1], [0], [0], [1], [0, 0, 1, 1], [], []>} : vector<4x4xf32>, vector<4x288xf32>, vector<4x288xf32> -> vector<4x288xf32>
    %88 = arith.addf %83, %87 : vector<4x288xf32>
    %c0_71 = arith.constant 0 : index
    %c2 = arith.constant 2 : index
    %89 = vector.load %arg11[%c0_71, %c2] : memref<16x326xf32, #tpu.memory_space<vmem>>, vector<4x288xf32>
    %c2_72 = arith.constant 2 : index
    %c0_73 = arith.constant 0 : index
    %c0_74 = arith.constant 0 : index
    %90 = vector.load %arg2[%c2_72, %c0_73, %c0_74] : memref<9x4x4xf32, #tpu.memory_space<vmem>>, vector<1x4x4xf32>
    %91 = vector.shape_cast %90 : vector<1x4x4xf32> to vector<4x4xf32>
    %cst_75 = arith.constant dense<0.000000e+00> : vector<4x288xf32>
    %92 = tpu.matmul %91, %89, %cst_75 {dimension_numbers = #tpu.dot_dimension_numbers<[1], [0], [0], [1], [0, 0, 1, 1], [], []>} : vector<4x4xf32>, vector<4x288xf32>, vector<4x288xf32> -> vector<4x288xf32>
    %93 = arith.addf %88, %92 : vector<4x288xf32>
    %c0_76 = arith.constant 0 : index
    %c18 = arith.constant 18 : index
    %94 = vector.load %arg11[%c0_76, %c18] : memref<16x326xf32, #tpu.memory_space<vmem>>, vector<4x288xf32>
    %c3 = arith.constant 3 : index
    %c0_77 = arith.constant 0 : index
    %c0_78 = arith.constant 0 : index
    %95 = vector.load %arg2[%c3, %c0_77, %c0_78] : memref<9x4x4xf32, #tpu.memory_space<vmem>>, vector<1x4x4xf32>
    %96 = vector.shape_cast %95 : vector<1x4x4xf32> to vector<4x4xf32>
    %cst_79 = arith.constant dense<0.000000e+00> : vector<4x288xf32>
    %97 = tpu.matmul %96, %94, %cst_79 {dimension_numbers = #tpu.dot_dimension_numbers<[1], [0], [0], [1], [0, 0, 1, 1], [], []>} : vector<4x4xf32>, vector<4x288xf32>, vector<4x288xf32> -> vector<4x288xf32>
    %98 = arith.addf %93, %97 : vector<4x288xf32>
    %c0_80 = arith.constant 0 : index
    %c19_81 = arith.constant 19 : index
    %99 = vector.load %arg11[%c0_80, %c19_81] : memref<16x326xf32, #tpu.memory_space<vmem>>, vector<4x288xf32>
    %c4 = arith.constant 4 : index
    %c0_82 = arith.constant 0 : index
    %c0_83 = arith.constant 0 : index
    %100 = vector.load %arg2[%c4, %c0_82, %c0_83] : memref<9x4x4xf32, #tpu.memory_space<vmem>>, vector<1x4x4xf32>
    %101 = vector.shape_cast %100 : vector<1x4x4xf32> to vector<4x4xf32>
    %cst_84 = arith.constant dense<0.000000e+00> : vector<4x288xf32>
    %102 = tpu.matmul %101, %99, %cst_84 {dimension_numbers = #tpu.dot_dimension_numbers<[1], [0], [0], [1], [0, 0, 1, 1], [], []>} : vector<4x4xf32>, vector<4x288xf32>, vector<4x288xf32> -> vector<4x288xf32>
    %103 = arith.addf %98, %102 : vector<4x288xf32>
    %c0_85 = arith.constant 0 : index
    %c20 = arith.constant 20 : index
    %104 = vector.load %arg11[%c0_85, %c20] : memref<16x326xf32, #tpu.memory_space<vmem>>, vector<4x288xf32>
    %c5 = arith.constant 5 : index
    %c0_86 = arith.constant 0 : index
    %c0_87 = arith.constant 0 : index
    %105 = vector.load %arg2[%c5, %c0_86, %c0_87] : memref<9x4x4xf32, #tpu.memory_space<vmem>>, vector<1x4x4xf32>
    %106 = vector.shape_cast %105 : vector<1x4x4xf32> to vector<4x4xf32>
    %cst_88 = arith.constant dense<0.000000e+00> : vector<4x288xf32>
    %107 = tpu.matmul %106, %104, %cst_88 {dimension_numbers = #tpu.dot_dimension_numbers<[1], [0], [0], [1], [0, 0, 1, 1], [], []>} : vector<4x4xf32>, vector<4x288xf32>, vector<4x288xf32> -> vector<4x288xf32>
    %108 = arith.addf %103, %107 : vector<4x288xf32>
    %c0_89 = arith.constant 0 : index
    %c36 = arith.constant 36 : index
    %109 = vector.load %arg11[%c0_89, %c36] : memref<16x326xf32, #tpu.memory_space<vmem>>, vector<4x288xf32>
    %c6 = arith.constant 6 : index
    %c0_90 = arith.constant 0 : index
    %c0_91 = arith.constant 0 : index
    %110 = vector.load %arg2[%c6, %c0_90, %c0_91] : memref<9x4x4xf32, #tpu.memory_space<vmem>>, vector<1x4x4xf32>
    %111 = vector.shape_cast %110 : vector<1x4x4xf32> to vector<4x4xf32>
    %cst_92 = arith.constant dense<0.000000e+00> : vector<4x288xf32>
    %112 = tpu.matmul %111, %109, %cst_92 {dimension_numbers = #tpu.dot_dimension_numbers<[1], [0], [0], [1], [0, 0, 1, 1], [], []>} : vector<4x4xf32>, vector<4x288xf32>, vector<4x288xf32> -> vector<4x288xf32>
    %113 = arith.addf %108, %112 : vector<4x288xf32>
    %c0_93 = arith.constant 0 : index
    %c37_94 = arith.constant 37 : index
    %114 = vector.load %arg11[%c0_93, %c37_94] : memref<16x326xf32, #tpu.memory_space<vmem>>, vector<4x288xf32>
    %c7 = arith.constant 7 : index
    %c0_95 = arith.constant 0 : index
    %c0_96 = arith.constant 0 : index
    %115 = vector.load %arg2[%c7, %c0_95, %c0_96] : memref<9x4x4xf32, #tpu.memory_space<vmem>>, vector<1x4x4xf32>
    %116 = vector.shape_cast %115 : vector<1x4x4xf32> to vector<4x4xf32>
    %cst_97 = arith.constant dense<0.000000e+00> : vector<4x288xf32>
    %117 = tpu.matmul %116, %114, %cst_97 {dimension_numbers = #tpu.dot_dimension_numbers<[1], [0], [0], [1], [0, 0, 1, 1], [], []>} : vector<4x4xf32>, vector<4x288xf32>, vector<4x288xf32> -> vector<4x288xf32>
    %118 = arith.addf %113, %117 : vector<4x288xf32>
    %c0_98 = arith.constant 0 : index
    %c38 = arith.constant 38 : index
    %119 = vector.load %arg11[%c0_98, %c38] : memref<16x326xf32, #tpu.memory_space<vmem>>, vector<4x288xf32>
    %c8 = arith.constant 8 : index
    %c0_99 = arith.constant 0 : index
    %c0_100 = arith.constant 0 : index
    %120 = vector.load %arg2[%c8, %c0_99, %c0_100] : memref<9x4x4xf32, #tpu.memory_space<vmem>>, vector<1x4x4xf32>
    %121 = vector.shape_cast %120 : vector<1x4x4xf32> to vector<4x4xf32>
    %cst_101 = arith.constant dense<0.000000e+00> : vector<4x288xf32>
    %122 = tpu.matmul %121, %119, %cst_101 {dimension_numbers = #tpu.dot_dimension_numbers<[1], [0], [0], [1], [0, 0, 1, 1], [], []>} : vector<4x4xf32>, vector<4x288xf32>, vector<4x288xf32> -> vector<4x288xf32>
    %123 = arith.addf %118, %122 : vector<4x288xf32>
    %c0_102 = arith.constant 0 : index
    %c0_103 = arith.constant 0 : index
    %124 = vector.load %arg3[%c0_102, %c0_103] : memref<4x1xf32, #tpu.memory_space<vmem>>, vector<4x1xf32>
    %125 = vector.broadcast %124 : vector<4x1xf32> to vector<4x288xf32>
    %126 = arith.addf %123, %125 : vector<4x288xf32>
    %cst_104 = arith.constant 2.000000e+01 : f32
    %127 = vector.broadcast %cst_104 : f32 to vector<4x288xf32>
    %128 = arith.minimumf %126, %127 : vector<4x288xf32>
    %129 = math.exp %128 : vector<4x288xf32>
    %cst_105 = arith.constant 2.000000e+00 : f32
    %130 = vector.broadcast %cst_105 : f32 to vector<4x288xf32>
    %131 = arith.addf %129, %130 : vector<4x288xf32>
    %132 = arith.mulf %129, %131 : vector<4x288xf32>
    %cst_106 = arith.constant 2.000000e+00 : f32
    %133 = vector.broadcast %cst_106 : f32 to vector<4x288xf32>
    %134 = arith.addf %132, %133 : vector<4x288xf32>
    %135 = arith.divf %132, %134 : vector<4x288xf32>
    %136 = arith.mulf %126, %135 : vector<4x288xf32>
    %cst_107 = arith.constant 0.000000e+00 : f32
    %137 = vector.broadcast %cst_107 : f32 to vector<4x288xf32>
    %138 = arith.select %79, %136, %137 : vector<4x288xi1>, vector<4x288xf32>
    %c4_108 = arith.constant 4 : index
    %c19_109 = arith.constant 19 : index
    %139 = vector.load %arg11[%c4_108, %c19_109] : memref<16x326xf32, #tpu.memory_space<vmem>>, vector<4x288xf32>
    tpu.vector_store %arg11[%c4_108, %c19_109], %138 {strides = array<i32>} : memref<16x326xf32, #tpu.memory_space<vmem>>, vector<4x288xf32>,
    %c0_110 = arith.constant 0 : index
    %c0_111 = arith.constant 0 : index
    %140 = vector.load %arg11[%c0_110, %c0_111] : memref<16x326xf32, #tpu.memory_space<vmem>>, vector<8x288xf32>
    %c0_112 = arith.constant 0 : index
    %c0_113 = arith.constant 0 : index
    %c0_114 = arith.constant 0 : index
    %141 = vector.load %arg4[%c0_112, %c0_113, %c0_114] : memref<9x4x8xf32, #tpu.memory_space<vmem>>, vector<1x4x8xf32>
    %142 = vector.shape_cast %141 : vector<1x4x8xf32> to vector<4x8xf32>
    %cst_115 = arith.constant dense<0.000000e+00> : vector<4x288xf32>
    %143 = tpu.matmul %142, %140, %cst_115 {dimension_numbers = #tpu.dot_dimension_numbers<[1], [0], [0], [1], [0, 0, 1, 1], [], []>} : vector<4x8xf32>, vector<8x288xf32>, vector<4x288xf32> -> vector<4x288xf32>
    %c0_116 = arith.constant 0 : index
    %c1_117 = arith.constant 1 : index
    %144 = vector.load %arg11[%c0_116, %c1_117] : memref<16x326xf32, #tpu.memory_space<vmem>>, vector<8x288xf32>
    %c1_118 = arith.constant 1 : index
    %c0_119 = arith.constant 0 : index
    %c0_120 = arith.constant 0 : index
    %145 = vector.load %arg4[%c1_118, %c0_119, %c0_120] : memref<9x4x8xf32, #tpu.memory_space<vmem>>, vector<1x4x8xf32>
    %146 = vector.shape_cast %145 : vector<1x4x8xf32> to vector<4x8xf32>
    %cst_121 = arith.constant dense<0.000000e+00> : vector<4x288xf32>
    %147 = tpu.matmul %146, %144, %cst_121 {dimension_numbers = #tpu.dot_dimension_numbers<[1], [0], [0], [1], [0, 0, 1, 1], [], []>} : vector<4x8xf32>, vector<8x288xf32>, vector<4x288xf32> -> vector<4x288xf32>
    %148 = arith.addf %143, %147 : vector<4x288xf32>
    %c0_122 = arith.constant 0 : index
    %c2_123 = arith.constant 2 : index
    %149 = vector.load %arg11[%c0_122, %c2_123] : memref<16x326xf32, #tpu.memory_space<vmem>>, vector<8x288xf32>
    %c2_124 = arith.constant 2 : index
    %c0_125 = arith.constant 0 : index
    %c0_126 = arith.constant 0 : index
    %150 = vector.load %arg4[%c2_124, %c0_125, %c0_126] : memref<9x4x8xf32, #tpu.memory_space<vmem>>, vector<1x4x8xf32>
    %151 = vector.shape_cast %150 : vector<1x4x8xf32> to vector<4x8xf32>
    %cst_127 = arith.constant dense<0.000000e+00> : vector<4x288xf32>
    %152 = tpu.matmul %151, %149, %cst_127 {dimension_numbers = #tpu.dot_dimension_numbers<[1], [0], [0], [1], [0, 0, 1, 1], [], []>} : vector<4x8xf32>, vector<8x288xf32>, vector<4x288xf32> -> vector<4x288xf32>
    %153 = arith.addf %148, %152 : vector<4x288xf32>
    %c0_128 = arith.constant 0 : index
    %c18_129 = arith.constant 18 : index
    %154 = vector.load %arg11[%c0_128, %c18_129] : memref<16x326xf32, #tpu.memory_space<vmem>>, vector<8x288xf32>
    %c3_130 = arith.constant 3 : index
    %c0_131 = arith.constant 0 : index
    %c0_132 = arith.constant 0 : index
    %155 = vector.load %arg4[%c3_130, %c0_131, %c0_132] : memref<9x4x8xf32, #tpu.memory_space<vmem>>, vector<1x4x8xf32>
    %156 = vector.shape_cast %155 : vector<1x4x8xf32> to vector<4x8xf32>
    %cst_133 = arith.constant dense<0.000000e+00> : vector<4x288xf32>
    %157 = tpu.matmul %156, %154, %cst_133 {dimension_numbers = #tpu.dot_dimension_numbers<[1], [0], [0], [1], [0, 0, 1, 1], [], []>} : vector<4x8xf32>, vector<8x288xf32>, vector<4x288xf32> -> vector<4x288xf32>
    %158 = arith.addf %153, %157 : vector<4x288xf32>
    %c0_134 = arith.constant 0 : index
    %c19_135 = arith.constant 19 : index
    %159 = vector.load %arg11[%c0_134, %c19_135] : memref<16x326xf32, #tpu.memory_space<vmem>>, vector<8x288xf32>
    %c4_136 = arith.constant 4 : index
    %c0_137 = arith.constant 0 : index
    %c0_138 = arith.constant 0 : index
    %160 = vector.load %arg4[%c4_136, %c0_137, %c0_138] : memref<9x4x8xf32, #tpu.memory_space<vmem>>, vector<1x4x8xf32>
    %161 = vector.shape_cast %160 : vector<1x4x8xf32> to vector<4x8xf32>
    %cst_139 = arith.constant dense<0.000000e+00> : vector<4x288xf32>
    %162 = tpu.matmul %161, %159, %cst_139 {dimension_numbers = #tpu.dot_dimension_numbers<[1], [0], [0], [1], [0, 0, 1, 1], [], []>} : vector<4x8xf32>, vector<8x288xf32>, vector<4x288xf32> -> vector<4x288xf32>
    %163 = arith.addf %158, %162 : vector<4x288xf32>
    %c0_140 = arith.constant 0 : index
    %c20_141 = arith.constant 20 : index
    %164 = vector.load %arg11[%c0_140, %c20_141] : memref<16x326xf32, #tpu.memory_space<vmem>>, vector<8x288xf32>
    %c5_142 = arith.constant 5 : index
    %c0_143 = arith.constant 0 : index
    %c0_144 = arith.constant 0 : index
    %165 = vector.load %arg4[%c5_142, %c0_143, %c0_144] : memref<9x4x8xf32, #tpu.memory_space<vmem>>, vector<1x4x8xf32>
    %166 = vector.shape_cast %165 : vector<1x4x8xf32> to vector<4x8xf32>
    %cst_145 = arith.constant dense<0.000000e+00> : vector<4x288xf32>
    %167 = tpu.matmul %166, %164, %cst_145 {dimension_numbers = #tpu.dot_dimension_numbers<[1], [0], [0], [1], [0, 0, 1, 1], [], []>} : vector<4x8xf32>, vector<8x288xf32>, vector<4x288xf32> -> vector<4x288xf32>
    %168 = arith.addf %163, %167 : vector<4x288xf32>
    %c0_146 = arith.constant 0 : index
    %c36_147 = arith.constant 36 : index
    %169 = vector.load %arg11[%c0_146, %c36_147] : memref<16x326xf32, #tpu.memory_space<vmem>>, vector<8x288xf32>
    %c6_148 = arith.constant 6 : index
    %c0_149 = arith.constant 0 : index
    %c0_150 = arith.constant 0 : index
    %170 = vector.load %arg4[%c6_148, %c0_149, %c0_150] : memref<9x4x8xf32, #tpu.memory_space<vmem>>, vector<1x4x8xf32>
    %171 = vector.shape_cast %170 : vector<1x4x8xf32> to vector<4x8xf32>
    %cst_151 = arith.constant dense<0.000000e+00> : vector<4x288xf32>
    %172 = tpu.matmul %171, %169, %cst_151 {dimension_numbers = #tpu.dot_dimension_numbers<[1], [0], [0], [1], [0, 0, 1, 1], [], []>} : vector<4x8xf32>, vector<8x288xf32>, vector<4x288xf32> -> vector<4x288xf32>
    %173 = arith.addf %168, %172 : vector<4x288xf32>
    %c0_152 = arith.constant 0 : index
    %c37_153 = arith.constant 37 : index
    %174 = vector.load %arg11[%c0_152, %c37_153] : memref<16x326xf32, #tpu.memory_space<vmem>>, vector<8x288xf32>
    %c7_154 = arith.constant 7 : index
    %c0_155 = arith.constant 0 : index
    %c0_156 = arith.constant 0 : index
    %175 = vector.load %arg4[%c7_154, %c0_155, %c0_156] : memref<9x4x8xf32, #tpu.memory_space<vmem>>, vector<1x4x8xf32>
    %176 = vector.shape_cast %175 : vector<1x4x8xf32> to vector<4x8xf32>
    %cst_157 = arith.constant dense<0.000000e+00> : vector<4x288xf32>
    %177 = tpu.matmul %176, %174, %cst_157 {dimension_numbers = #tpu.dot_dimension_numbers<[1], [0], [0], [1], [0, 0, 1, 1], [], []>} : vector<4x8xf32>, vector<8x288xf32>, vector<4x288xf32> -> vector<4x288xf32>
    %178 = arith.addf %173, %177 : vector<4x288xf32>
    %c0_158 = arith.constant 0 : index
    %c38_159 = arith.constant 38 : index
    %179 = vector.load %arg11[%c0_158, %c38_159] : memref<16x326xf32, #tpu.memory_space<vmem>>, vector<8x288xf32>
    %c8_160 = arith.constant 8 : index
    %c0_161 = arith.constant 0 : index
    %c0_162 = arith.constant 0 : index
    %180 = vector.load %arg4[%c8_160, %c0_161, %c0_162] : memref<9x4x8xf32, #tpu.memory_space<vmem>>, vector<1x4x8xf32>
    %181 = vector.shape_cast %180 : vector<1x4x8xf32> to vector<4x8xf32>
    %cst_163 = arith.constant dense<0.000000e+00> : vector<4x288xf32>
    %182 = tpu.matmul %181, %179, %cst_163 {dimension_numbers = #tpu.dot_dimension_numbers<[1], [0], [0], [1], [0, 0, 1, 1], [], []>} : vector<4x8xf32>, vector<8x288xf32>, vector<4x288xf32> -> vector<4x288xf32>
    %183 = arith.addf %178, %182 : vector<4x288xf32>
    %c0_164 = arith.constant 0 : index
    %c0_165 = arith.constant 0 : index
    %184 = vector.load %arg5[%c0_164, %c0_165] : memref<4x1xf32, #tpu.memory_space<vmem>>, vector<4x1xf32>
    %185 = vector.broadcast %184 : vector<4x1xf32> to vector<4x288xf32>
    %186 = arith.addf %183, %185 : vector<4x288xf32>
    %cst_166 = arith.constant 2.000000e+01 : f32
    %187 = vector.broadcast %cst_166 : f32 to vector<4x288xf32>
    %188 = arith.minimumf %186, %187 : vector<4x288xf32>
    %189 = math.exp %188 : vector<4x288xf32>
    %cst_167 = arith.constant 2.000000e+00 : f32
    %190 = vector.broadcast %cst_167 : f32 to vector<4x288xf32>
    %191 = arith.addf %189, %190 : vector<4x288xf32>
    %192 = arith.mulf %189, %191 : vector<4x288xf32>
    %cst_168 = arith.constant 2.000000e+00 : f32
    %193 = vector.broadcast %cst_168 : f32 to vector<4x288xf32>
    %194 = arith.addf %192, %193 : vector<4x288xf32>
    %195 = arith.divf %192, %194 : vector<4x288xf32>
    %196 = arith.mulf %186, %195 : vector<4x288xf32>
    %cst_169 = arith.constant 0.000000e+00 : f32
    %197 = vector.broadcast %cst_169 : f32 to vector<4x288xf32>
    %198 = arith.select %79, %196, %197 : vector<4x288xi1>, vector<4x288xf32>
    %c8_170 = arith.constant 8 : index
    %c19_171 = arith.constant 19 : index
    %199 = vector.load %arg11[%c8_170, %c19_171] : memref<16x326xf32, #tpu.memory_space<vmem>>, vector<4x288xf32>
    tpu.vector_store %arg11[%c8_170, %c19_171], %198 {strides = array<i32>} : memref<16x326xf32, #tpu.memory_space<vmem>>, vector<4x288xf32>,
    %c0_172 = arith.constant 0 : index
    %c0_173 = arith.constant 0 : index
    %200 = vector.load %arg11[%c0_172, %c0_173] : memref<16x326xf32, #tpu.memory_space<vmem>>, vector<12x288xf32>
    %c0_174 = arith.constant 0 : index
    %c0_175 = arith.constant 0 : index
    %c0_176 = arith.constant 0 : index
    %201 = vector.load %arg6[%c0_174, %c0_175, %c0_176] : memref<9x4x12xf32, #tpu.memory_space<vmem>>, vector<1x4x12xf32>
    %202 = vector.shape_cast %201 : vector<1x4x12xf32> to vector<4x12xf32>
    %cst_177 = arith.constant dense<0.000000e+00> : vector<4x288xf32>
    %203 = tpu.matmul %202, %200, %cst_177 {dimension_numbers = #tpu.dot_dimension_numbers<[1], [0], [0], [1], [0, 0, 1, 1], [], []>} : vector<4x12xf32>, vector<12x288xf32>, vector<4x288xf32> -> vector<4x288xf32>
    %c0_178 = arith.constant 0 : index
    %c1_179 = arith.constant 1 : index
    %204 = vector.load %arg11[%c0_178, %c1_179] : memref<16x326xf32, #tpu.memory_space<vmem>>, vector<12x288xf32>
    %c1_180 = arith.constant 1 : index
    %c0_181 = arith.constant 0 : index
    %c0_182 = arith.constant 0 : index
    %205 = vector.load %arg6[%c1_180, %c0_181, %c0_182] : memref<9x4x12xf32, #tpu.memory_space<vmem>>, vector<1x4x12xf32>
    %206 = vector.shape_cast %205 : vector<1x4x12xf32> to vector<4x12xf32>
    %cst_183 = arith.constant dense<0.000000e+00> : vector<4x288xf32>
    %207 = tpu.matmul %206, %204, %cst_183 {dimension_numbers = #tpu.dot_dimension_numbers<[1], [0], [0], [1], [0, 0, 1, 1], [], []>} : vector<4x12xf32>, vector<12x288xf32>, vector<4x288xf32> -> vector<4x288xf32>
    %208 = arith.addf %203, %207 : vector<4x288xf32>
    %c0_184 = arith.constant 0 : index
    %c2_185 = arith.constant 2 : index
    %209 = vector.load %arg11[%c0_184, %c2_185] : memref<16x326xf32, #tpu.memory_space<vmem>>, vector<12x288xf32>
    %c2_186 = arith.constant 2 : index
    %c0_187 = arith.constant 0 : index
    %c0_188 = arith.constant 0 : index
    %210 = vector.load %arg6[%c2_186, %c0_187, %c0_188] : memref<9x4x12xf32, #tpu.memory_space<vmem>>, vector<1x4x12xf32>
    %211 = vector.shape_cast %210 : vector<1x4x12xf32> to vector<4x12xf32>
    %cst_189 = arith.constant dense<0.000000e+00> : vector<4x288xf32>
    %212 = tpu.matmul %211, %209, %cst_189 {dimension_numbers = #tpu.dot_dimension_numbers<[1], [0], [0], [1], [0, 0, 1, 1], [], []>} : vector<4x12xf32>, vector<12x288xf32>, vector<4x288xf32> -> vector<4x288xf32>
    %213 = arith.addf %208, %212 : vector<4x288xf32>
    %c0_190 = arith.constant 0 : index
    %c18_191 = arith.constant 18 : index
    %214 = vector.load %arg11[%c0_190, %c18_191] : memref<16x326xf32, #tpu.memory_space<vmem>>, vector<12x288xf32>
    %c3_192 = arith.constant 3 : index
    %c0_193 = arith.constant 0 : index
    %c0_194 = arith.constant 0 : index
    %215 = vector.load %arg6[%c3_192, %c0_193, %c0_194] : memref<9x4x12xf32, #tpu.memory_space<vmem>>, vector<1x4x12xf32>
    %216 = vector.shape_cast %215 : vector<1x4x12xf32> to vector<4x12xf32>
    %cst_195 = arith.constant dense<0.000000e+00> : vector<4x288xf32>
    %217 = tpu.matmul %216, %214, %cst_195 {dimension_numbers = #tpu.dot_dimension_numbers<[1], [0], [0], [1], [0, 0, 1, 1], [], []>} : vector<4x12xf32>, vector<12x288xf32>, vector<4x288xf32> -> vector<4x288xf32>
    %218 = arith.addf %213, %217 : vector<4x288xf32>
    %c0_196 = arith.constant 0 : index
    %c19_197 = arith.constant 19 : index
    %219 = vector.load %arg11[%c0_196, %c19_197] : memref<16x326xf32, #tpu.memory_space<vmem>>, vector<12x288xf32>
    %c4_198 = arith.constant 4 : index
    %c0_199 = arith.constant 0 : index
    %c0_200 = arith.constant 0 : index
    %220 = vector.load %arg6[%c4_198, %c0_199, %c0_200] : memref<9x4x12xf32, #tpu.memory_space<vmem>>, vector<1x4x12xf32>
    %221 = vector.shape_cast %220 : vector<1x4x12xf32> to vector<4x12xf32>
    %cst_201 = arith.constant dense<0.000000e+00> : vector<4x288xf32>
    %222 = tpu.matmul %221, %219, %cst_201 {dimension_numbers = #tpu.dot_dimension_numbers<[1], [0], [0], [1], [0, 0, 1, 1], [], []>} : vector<4x12xf32>, vector<12x288xf32>, vector<4x288xf32> -> vector<4x288xf32>
    %223 = arith.addf %218, %222 : vector<4x288xf32>
    %c0_202 = arith.constant 0 : index
    %c20_203 = arith.constant 20 : index
    %224 = vector.load %arg11[%c0_202, %c20_203] : memref<16x326xf32, #tpu.memory_space<vmem>>, vector<12x288xf32>
    %c5_204 = arith.constant 5 : index
    %c0_205 = arith.constant 0 : index
    %c0_206 = arith.constant 0 : index
    %225 = vector.load %arg6[%c5_204, %c0_205, %c0_206] : memref<9x4x12xf32, #tpu.memory_space<vmem>>, vector<1x4x12xf32>
    %226 = vector.shape_cast %225 : vector<1x4x12xf32> to vector<4x12xf32>
    %cst_207 = arith.constant dense<0.000000e+00> : vector<4x288xf32>
    %227 = tpu.matmul %226, %224, %cst_207 {dimension_numbers = #tpu.dot_dimension_numbers<[1], [0], [0], [1], [0, 0, 1, 1], [], []>} : vector<4x12xf32>, vector<12x288xf32>, vector<4x288xf32> -> vector<4x288xf32>
    %228 = arith.addf %223, %227 : vector<4x288xf32>
    %c0_208 = arith.constant 0 : index
    %c36_209 = arith.constant 36 : index
    %229 = vector.load %arg11[%c0_208, %c36_209] : memref<16x326xf32, #tpu.memory_space<vmem>>, vector<12x288xf32>
    %c6_210 = arith.constant 6 : index
    %c0_211 = arith.constant 0 : index
    %c0_212 = arith.constant 0 : index
    %230 = vector.load %arg6[%c6_210, %c0_211, %c0_212] : memref<9x4x12xf32, #tpu.memory_space<vmem>>, vector<1x4x12xf32>
    %231 = vector.shape_cast %230 : vector<1x4x12xf32> to vector<4x12xf32>
    %cst_213 = arith.constant dense<0.000000e+00> : vector<4x288xf32>
    %232 = tpu.matmul %231, %229, %cst_213 {dimension_numbers = #tpu.dot_dimension_numbers<[1], [0], [0], [1], [0, 0, 1, 1], [], []>} : vector<4x12xf32>, vector<12x288xf32>, vector<4x288xf32> -> vector<4x288xf32>
    %233 = arith.addf %228, %232 : vector<4x288xf32>
    %c0_214 = arith.constant 0 : index
    %c37_215 = arith.constant 37 : index
    %234 = vector.load %arg11[%c0_214, %c37_215] : memref<16x326xf32, #tpu.memory_space<vmem>>, vector<12x288xf32>
    %c7_216 = arith.constant 7 : index
    %c0_217 = arith.constant 0 : index
    %c0_218 = arith.constant 0 : index
    %235 = vector.load %arg6[%c7_216, %c0_217, %c0_218] : memref<9x4x12xf32, #tpu.memory_space<vmem>>, vector<1x4x12xf32>
    %236 = vector.shape_cast %235 : vector<1x4x12xf32> to vector<4x12xf32>
    %cst_219 = arith.constant dense<0.000000e+00> : vector<4x288xf32>
    %237 = tpu.matmul %236, %234, %cst_219 {dimension_numbers = #tpu.dot_dimension_numbers<[1], [0], [0], [1], [0, 0, 1, 1], [], []>} : vector<4x12xf32>, vector<12x288xf32>, vector<4x288xf32> -> vector<4x288xf32>
    %238 = arith.addf %233, %237 : vector<4x288xf32>
    %c0_220 = arith.constant 0 : index
    %c38_221 = arith.constant 38 : index
    %239 = vector.load %arg11[%c0_220, %c38_221] : memref<16x326xf32, #tpu.memory_space<vmem>>, vector<12x288xf32>
    %c8_222 = arith.constant 8 : index
    %c0_223 = arith.constant 0 : index
    %c0_224 = arith.constant 0 : index
    %240 = vector.load %arg6[%c8_222, %c0_223, %c0_224] : memref<9x4x12xf32, #tpu.memory_space<vmem>>, vector<1x4x12xf32>
    %241 = vector.shape_cast %240 : vector<1x4x12xf32> to vector<4x12xf32>
    %cst_225 = arith.constant dense<0.000000e+00> : vector<4x288xf32>
    %242 = tpu.matmul %241, %239, %cst_225 {dimension_numbers = #tpu.dot_dimension_numbers<[1], [0], [0], [1], [0, 0, 1, 1], [], []>} : vector<4x12xf32>, vector<12x288xf32>, vector<4x288xf32> -> vector<4x288xf32>
    %243 = arith.addf %238, %242 : vector<4x288xf32>
    %c0_226 = arith.constant 0 : index
    %c0_227 = arith.constant 0 : index
    %244 = vector.load %arg7[%c0_226, %c0_227] : memref<4x1xf32, #tpu.memory_space<vmem>>, vector<4x1xf32>
    %245 = vector.broadcast %244 : vector<4x1xf32> to vector<4x288xf32>
    %246 = arith.addf %243, %245 : vector<4x288xf32>
    %cst_228 = arith.constant 2.000000e+01 : f32
    %247 = vector.broadcast %cst_228 : f32 to vector<4x288xf32>
    %248 = arith.minimumf %246, %247 : vector<4x288xf32>
    %249 = math.exp %248 : vector<4x288xf32>
    %cst_229 = arith.constant 2.000000e+00 : f32
    %250 = vector.broadcast %cst_229 : f32 to vector<4x288xf32>
    %251 = arith.addf %249, %250 : vector<4x288xf32>
    %252 = arith.mulf %249, %251 : vector<4x288xf32>
    %cst_230 = arith.constant 2.000000e+00 : f32
    %253 = vector.broadcast %cst_230 : f32 to vector<4x288xf32>
    %254 = arith.addf %252, %253 : vector<4x288xf32>
    %255 = arith.divf %252, %254 : vector<4x288xf32>
    %256 = arith.mulf %246, %255 : vector<4x288xf32>
    %cst_231 = arith.constant 0.000000e+00 : f32
    %257 = vector.broadcast %cst_231 : f32 to vector<4x288xf32>
    %258 = arith.select %79, %256, %257 : vector<4x288xi1>, vector<4x288xf32>
    %c12 = arith.constant 12 : index
    %c19_232 = arith.constant 19 : index
    %259 = vector.load %arg11[%c12, %c19_232] : memref<16x326xf32, #tpu.memory_space<vmem>>, vector<4x288xf32>
    tpu.vector_store %arg11[%c12, %c19_232], %258 {strides = array<i32>} : memref<16x326xf32, #tpu.memory_space<vmem>>, vector<4x288xf32>,
    %c0_233 = arith.constant 0 : index
    %c19_234 = arith.constant 19 : index
    %260 = vector.load %arg11[%c0_233, %c19_234] : memref<16x326xf32, #tpu.memory_space<vmem>>, vector<16x288xf32>
    %c0_235 = arith.constant 0 : index
    %c0_236 = arith.constant 0 : index
    %261 = vector.load %arg8[%c0_235, %c0_236] : memref<4x16xf32, #tpu.memory_space<vmem>>, vector<4x16xf32>
    %cst_237 = arith.constant dense<0.000000e+00> : vector<4x288xf32>
    %262 = tpu.matmul %261, %260, %cst_237 {dimension_numbers = #tpu.dot_dimension_numbers<[1], [0], [0], [1], [0, 0, 1, 1], [], []>} : vector<4x16xf32>, vector<16x288xf32>, vector<4x288xf32> -> vector<4x288xf32>
    %c0_238 = arith.constant 0 : index
    %c0_239 = arith.constant 0 : index
    %263 = vector.load %arg9[%c0_238, %c0_239] : memref<4x1xf32, #tpu.memory_space<vmem>>, vector<4x1xf32>
    %264 = vector.broadcast %263 : vector<4x1xf32> to vector<4x288xf32>
    %265 = arith.addf %262, %264 : vector<4x288xf32>
    %266 = vector.shape_cast %265 : vector<4x288xf32> to vector<4x16x18xf32>
    %267 = vector.extract_strided_slice %266 {offsets = [0, 0, 0], sizes = [4, 16, 16], strides = [1, 1, 1]} : vector<4x16x18xf32> to vector<4x16x16xf32>
    %268 = vector.shape_cast %267 : vector<4x16x16xf32> to vector<4x256xf32>
    %c0_240 = arith.constant 0 : index
    %c0_241 = arith.constant 0 : index
    %c0_242 = arith.constant 0 : index
    %269 = vector.load %arg1[%c0_240, %c0_241, %c0_242] : memref<1x4x256xf32, #tpu.memory_space<vmem>>, vector<1x4x256xf32>
    %270 = vector.shape_cast %269 : vector<1x4x256xf32> to vector<4x256xf32>
    %cst_243 = arith.constant 2.000000e-01 : f32
    %271 = vector.broadcast %cst_243 : f32 to vector<4x256xf32>
    %272 = arith.mulf %271, %268 : vector<4x256xf32>
    %273 = arith.addf %270, %272 : vector<4x256xf32>
    %c0_244 = arith.constant 0 : index
    %c0_245 = arith.constant 0 : index
    %c0_246 = arith.constant 0 : index
    %274 = vector.load %arg10[%c0_244, %c0_245, %c0_246] : memref<1x4x256xf32, #tpu.memory_space<vmem>>, vector<1x4x256xf32>
    %275 = vector.shape_cast %274 : vector<1x4x256xf32> to vector<4x256xf32>
    %276 = vector.shape_cast %273 : vector<4x256xf32> to vector<1x4x256xf32>
    tpu.vector_store %arg10[%c0_244, %c0_245, %c0_246], %276 {strides = array<i32>} : memref<1x4x256xf32, #tpu.memory_space<vmem>>, vector<1x4x256xf32>,
    return
  }
  func.func @transform_0(%arg0: i32) -> (i32, i32, i32) {
    %c0_i32 = arith.constant 0 : i32
    %c0_i32_0 = arith.constant 0 : i32
    %c0_i32_1 = arith.constant 0 : i32
    return %arg0, %c0_i32, %c0_i32_0 : i32, i32, i32
  }
  func.func @transform_1(%arg0: i32) -> (i32, i32, i32) {
    %c0_i32 = arith.constant 0 : i32
    %c0_i32_0 = arith.constant 0 : i32
    %c0_i32_1 = arith.constant 0 : i32
    %c0_i32_2 = arith.constant 0 : i32
    return %c0_i32, %c0_i32_0, %c0_i32_1 : i32, i32, i32
  }
  func.func @transform_2(%arg0: i32) -> (i32, i32) {
    %c0_i32 = arith.constant 0 : i32
    %c0_i32_0 = arith.constant 0 : i32
    %c0_i32_1 = arith.constant 0 : i32
    return %c0_i32, %c0_i32_0 : i32, i32
  }
  func.func @transform_3(%arg0: i32) -> (i32, i32, i32) {
    %c0_i32 = arith.constant 0 : i32
    %c0_i32_0 = arith.constant 0 : i32
    %c0_i32_1 = arith.constant 0 : i32
    %c0_i32_2 = arith.constant 0 : i32
    return %c0_i32, %c0_i32_0, %c0_i32_1 : i32, i32, i32
  }
  func.func @transform_4(%arg0: i32) -> (i32, i32) {
    %c0_i32 = arith.constant 0 : i32
    %c0_i32_0 = arith.constant 0 : i32
    %c0_i32_1 = arith.constant 0 : i32
    return %c0_i32, %c0_i32_0 : i32, i32
  }
  func.func @transform_5(%arg0: i32) -> (i32, i32, i32) {
    %c0_i32 = arith.constant 0 : i32
    %c0_i32_0 = arith.constant 0 : i32
    %c0_i32_1 = arith.constant 0 : i32
    %c0_i32_2 = arith.constant 0 : i32
    return %c0_i32, %c0_i32_0, %c0_i32_1 : i32, i32, i32
  }
  func.func @transform_6(%arg0: i32) -> (i32, i32) {
    %c0_i32 = arith.constant 0 : i32
    %c0_i32_0 = arith.constant 0 : i32
    %c0_i32_1 = arith.constant 0 : i32
    return %c0_i32, %c0_i32_0 : i32, i32
  }
  func.func @transform_7(%arg0: i32) -> (i32, i32) {
    %c0_i32 = arith.constant 0 : i32
    %c0_i32_0 = arith.constant 0 : i32
    %c0_i32_1 = arith.constant 0 : i32
    return %c0_i32, %c0_i32_0 : i32, i32
  }
  func.func @transform_8(%arg0: i32) -> (i32, i32) {
    %c0_i32 = arith.constant 0 : i32
    %c0_i32_0 = arith.constant 0 : i32
    %c0_i32_1 = arith.constant 0 : i32
    return %c0_i32, %c0_i32_0 : i32, i32
  }
  func.func @transform_9(%arg0: i32) -> (i32, i32, i32) {
    %c0_i32 = arith.constant 0 : i32
    %c0_i32_0 = arith.constant 0 : i32
    %c0_i32_1 = arith.constant 0 : i32
    return %arg0, %c0_i32, %c0_i32_0 : i32, i32, i32
  }
}

</mosaic_0001>

<bundles_post_ra>
// kernel: rdb_forward.1
= control target key start
LH: loop header
LB: loop body
LE: loop exit
PB: predicated region body
PF: predicated region fallthrough
CT: control target
= control target key end

     0   :  { %s4166_s30 = smov 0   ;;  %s4970_s0 = inlined_call_operand.vmem [shape: f32[2,4,256], index: 0, kind: input, shape index: {}]   ;;  %s4971_s1 = inlined_call_operand.vmem [shape: f32[9,4,4], index: 1, kind: input, shape index: {}]   ;;  %s4972_s2 = inlined_call_operand.vmem [shape: f32[4,1], index: 2, kind: input, shape index: {}]   ;;  %s4973_s3 = inlined_call_operand.vmem [shape: f32[9,4,8], index: 3, kind: input, shape index: {}]   ;;  %s4974_s4 = inlined_call_operand.vmem [shape: f32[4,1], index: 4, kind: input, shape index: {}]   ;;  %s4975_s5 = inlined_call_operand.vmem [shape: f32[9,4,12], index: 5, kind: input, shape index: {}]   ;;  %s4976_s6 = inlined_call_operand.vmem [shape: f32[4,1], index: 6, kind: input, shape index: {}]   ;;  %s4977_s7 = inlined_call_operand.vmem [shape: f32[4,16], index: 7, kind: input, shape index: {}]   ;;  %s4978_s8 = inlined_call_operand.vmem [shape: f32[4,1], index: 8, kind: input, shape index: {}]   ;;  %s4979_s9 = inlined_call_operand.vmem [shape: f32[2,4,256], index: 9, kind: output, shape index: {}]  }
   0x1 LB: > { %s3698_s10 = sadd.s32 4294967295, %s4067_s30   ;;  %p3702_p0 = scmp.ge.s32.totalorder %s4067_s30, 1  ;;  %s4067_s30 = sphi %s4166_s30, %s19_s30  }
   0x2   : > { %p287_p1 = scmp.lt.s32.totalorder %s4067_s30, 3 }
   0x4   : > { %p288_p2 = pnand %p3702_p0, %p287_p1 }
   0x5   : > { %p323_p3 = scmp.lt.s32.totalorder (!%p288_p2), %s3698_s10, 1  ;;  %s4069_s15 = smov (!%p288_p2), 19  }
   0x6   : > { %291 = sbr.rel (%p288_p2) target bundleno = 2273 (0x8e1), region = 56  ;;  %s4070_s16 = smov (!%p288_p2), 21  }
   0x7   : > { %s4071_s17 = smov (!%p288_p2), 23   ;;  %s4072_s18 = smov (!%p288_p2), 25  }
   0x8   : > { %s4073_s19 = smov (!%p288_p2), 27   ;;  %s4074_s20 = smov (!%p288_p2), 29  }
   0x9   : > { %s4075_s21 = smov (!%p288_p2), 31   ;;  %s4076_s22 = smov (!%p288_p2), 33  }
   0xa   : > { %s4077_s23 = smov (!%p288_p2), 35   ;;  %s4078_s24 = smov (!%p288_p2), 37  }
   0xb   : > { %s5071_s10 = smov (!%p323_p3, %s3698_s10), 1  ;;  %s4079_s25 = smov 39   ;;  %vm333_vm0 = vcmask 154624   ;;  %vm4982_vm1 = vcmask 1043608   ;;  %v4081_v25 = vmov 0.0   ;;  %vm351_vm2 = vcmask 281752  }
   0xc   : > { %s3871_s11 = sshll.u32 %s5071_s10, 3  ;;  %s4080_s26 = smov 41   ;;  %334 = vst.msk [vmem:[#allocation2] sm:$0xff] %vm333_vm0, %v4081_v25  ;;  %vm360_vm3 = vcmask 429352   ;;  %vm369_vm4 = vcmask 576952   ;;  %vm378_vm5 = vcmask 724552  }
   0xd   : > { %s4182_s14 = scalar_lea.vmem %s4970_s0, %s3871_s11  ;;  %340 = vst.msk [vmem:[#allocation2] sm:$0xf] %vm4982_vm1, %v4081_v25  ;;  %s4082_s27 = smov 43   ;;  %vm387_vm6 = vcmask 872152   ;;  %vm396_vm7 = vcmask 1019752   ;;  %vm405_vm8 = vcmask 1044472  }
   0xe   : > { %v344_v0 = vld [vmem:[%s4182_s14] sm:$0xf]  ;;  %v418_v15 = vld [vmem:[%s4182_s14 + $0x4] sm:$0xf]  ;;  %335 = vst.msk [vmem:[#allocation2 + $0x18] sm:$0xff] %vm333_vm0, %v4081_v25  ;;  %s4083_s28 = smov 45  }
   0xf   : > { %346 = vst [vmem:[#allocation1] ss:$2 sm:$0xff] %v344_v0  ;;  %v353_v1 = vld [vmem:[%s4182_s14] sm:$0xf]  ;;  %v427_v17 = vld [vmem:[%s4182_s14 + $0x4] sm:$0xf] }
  0x10   : > { %v362_v3 = vld [vmem:[%s4182_s14] sm:$0xf]  ;;  %v436_v19 = vld [vmem:[%s4182_s14 + $0x4] sm:$0xf]  ;;  %341 = vst [vmem:[#allocation2 + $0x8] sm:$0xf] %v4081_v25 }
  0x11   : > { %v371_v5 = vld [vmem:[%s4182_s14] sm:$0xf]  ;;  %v445_v21 = vld [vmem:[%s4182_s14 + $0x4] sm:$0xf]  ;;  %s4084_s29 = smov 47   ;;  %s4085_s12 = smov 49  }
  0x12   : > { %v380_v7 = vld [vmem:[%s4182_s14] sm:$0xf]  ;;  %v454_v23 = vld [vmem:[%s4182_s14 + $0x4] sm:$0xf]  ;;  %vm407_vm9 = vcmask 117760   ;;  %vm416_vm10 = vcmask 265352  }
  0x13   : > { %v389_v9 = vld [vmem:[%s4182_s14] sm:$0xf]  ;;  %v463_v26 = vld [vmem:[%s4182_s14 + $0x4] sm:$0xf]  ;;  %vm425_vm11 = vcmask 412952   ;;  %s4086_s13 = smov 127  }
  0x14   : > { %v398_v11 = vld [vmem:[%s4182_s14] sm:$0xf]  ;;  %v474_v28 = vld [vmem:[%s4182_s14 + $0x4] sm:$0xf]  ;;  %vm336_vm12 = vcmask 572816   ;;  %vm4983_vm13 = vcmask 412672  }
  0x15   : > { %v409_v13 = vld [vmem:[%s4182_s14] sm:$0xf]  ;;  %v483_v30 = vld [vmem:[%s4182_s14 + $0x4] sm:$0xf]  ;;  %337 = vst.msk [vmem:[#allocation2 + $0x10] sm:$0xff] %vm336_vm12, %v4081_v25  ;;  %vm434_vm14 = vcmask 560552  }
  0x16   : > { %v347_v2 = vld.sshfl [vmem:[#allocation1] sm:$0xff pattern:$0x75316420]  ;;  %343 = vst.msk [vmem:[#allocation2 + $0x10] sm:$0xf] %vm4983_vm13, %v4081_v25  ;;  %vm443_vm15 = vcmask 708152  }
  0x17   : > { %348 = vrot.lane.b32.xlu0 %v347_v2, %s4069_s15  ;;  %355 = vst [vmem:[#allocation1] ss:$2 sm:$0xff] %v353_v1  ;;  %v3707_v55 = vld [vmem:[%s4971_s1 + $0x4] sm:$0xf]  ;;  %v619_v56 = vld [vmem:[%s4971_s1] sm:$0xf] }
  0x18   : > { %338 = vst.msk [vmem:[#allocation2 + $0x28] sm:$0xff] %vm336_vm12, %v4081_v25  ;;  %vm4992_vm12 = vcmask 900096  }
  0x1e   : > { %v356_v4 = vld.sshfl [vmem:[#allocation1] sm:$0xff pattern:$0x75316420] }
  0x1f   : > { %364 = vst [vmem:[#allocation1] ss:$2 sm:$0xff] %v362_v3  ;;  %357 = vrot.lane.b32.xlu1 %v356_v4, %s4070_s16  ;;  %s4087_s16 = smov 126  }
  0x26   : > { %v365_v6 = vld.sshfl [vmem:[#allocation1] sm:$0xff pattern:$0x75316420] }
  0x27   : > { %373 = vst [vmem:[#allocation1] ss:$2 sm:$0xff] %v371_v5  ;;  %366 = vrot.lane.b32.xlu2 %v365_v6, %s4071_s17  ;;  %s4088_s17 = smov 110   ;;  %v3720_v5 = vld [vmem:[%s4971_s1 + $0x8] sm:$0xf] }
  0x2e   : > { %v374_v8 = vld.sshfl [vmem:[#allocation1] sm:$0xff pattern:$0x75316420] }
  0x2f   : > { %382 = vst [vmem:[#allocation1] ss:$2 sm:$0xff] %v380_v7  ;;  %375 = vrot.lane.b32.xlu1 %v374_v8, %s4072_s18  ;;  %s4089_s18 = smov 109  }
  0x36   : > { %v383_v10 = vld.sshfl [vmem:[#allocation1] sm:$0xff pattern:$0x75316420] }
  0x37   : > { %384 = vrot.lane.b32.xlu0 %v383_v10, %s4073_s19  ;;  %391 = vst [vmem:[#allocation1] ss:$2 sm:$0xff] %v389_v9  ;;  %s4090_s19 = smov 108   ;;  %v3727_v10 = vld [vmem:[%s4971_s1 + $0xc] sm:$0xf] }
  0x3e   : > { %v392_v12 = vld.sshfl [vmem:[#allocation1] sm:$0xff pattern:$0x75316420] }
  0x3f   : > { %393 = vrot.lane.b32.xlu0 %v392_v12, %s4074_s20  ;;  %400 = vst [vmem:[#allocation1] ss:$2 sm:$0xff] %v398_v11  ;;  %s4091_s20 = smov 92  }
  0x46   : > { %v401_v14 = vld.sshfl [vmem:[#allocation1] sm:$0xff pattern:$0x75316420] }
  0x47   : > { %402 = vrot.lane.b32.xlu0 %v401_v14, %s4075_s21  ;;  %411 = vst [vmem:[#allocation1] ss:$2 sm:$0xff] %v409_v13  ;;  %s4092_s21 = smov 91   ;;  %v3734_v13 = vld [vmem:[%s4971_s1 + $0x10] sm:$0xf] }
  0x4e   : > { %v412_v16 = vld.sshfl [vmem:[#allocation1] sm:$0xff pattern:$0x75316420] }
  0x4f   : > { %413 = vrot.lane.b32.xlu1 %v412_v16, %s4076_s22  ;;  %420 = vst [vmem:[#allocation1] ss:$2 sm:$0xff] %v418_v15  ;;  %s4093_s22 = smov 90  }
  0x56   : > { %v421_v18 = vld.sshfl [vmem:[#allocation1] sm:$0xff pattern:$0x75316420] }
  0x57   : > { %429 = vst [vmem:[#allocation1] ss:$2 sm:$0xff] %v427_v17  ;;  %422 = vrot.lane.b32.xlu2 %v421_v18, %s4077_s23  ;;  %s4106_s23 = smov 38  }
  0x5e   : > { %v430_v20 = vld.sshfl [vmem:[#allocation1] sm:$0xff pattern:$0x75316420] }
  0x5f   : > { %438 = vst [vmem:[#allocation1] ss:$2 sm:$0xff] %v436_v19  ;;  %431 = vrot.lane.b32.xlu0 %v430_v20, %s4078_s24  ;;  %v3741_v19 = vld [vmem:[%s4971_s1 + $0x14] sm:$0xf]  ;;  %v1355_v20 = vld [vmem:[%s4972_s2] sm:$0xf] }
  0x60   : > { %s4107_s24 = smov 22  }
  0x66   : > { %v439_v22 = vld.sshfl [vmem:[#allocation1] sm:$0xff pattern:$0x75316420] }
  0x67   : > { %447 = vst [vmem:[#allocation1] ss:$2 sm:$0xff] %v445_v21  ;;  %440 = vrot.lane.b32.xlu2 %v439_v22, %s4079_s25  ;;  %v4094_v22 = vmov 0   ;;  %s4111_s25 = smov 64  }
  0x68   : > { %3928 = vset.pattern.permute.xlu1 %v4094_v22  ;;  %3969 = vset.pattern.permute.xlu0 %v4094_v22 }
  0x6e   : > { %v448_v24 = vld.sshfl [vmem:[#allocation1] sm:$0xff pattern:$0x75316420] }
  0x6f   : > { %449 = vrot.lane.b32.xlu1 %v448_v24, %s4080_s26  ;;  %456 = vst [vmem:[#allocation1] ss:$2 sm:$0xff] %v454_v23  ;;  %s4113_s26 = smov 48  }
  0x76   : > { %v457_v27 = vld.sshfl [vmem:[#allocation1] sm:$0xff pattern:$0x75316420] }
  0x77   : > { %458 = vrot.lane.b32.xlu1 %v457_v27, %s4082_s27  ;;  %465 = vst [vmem:[#allocation1] ss:$2 sm:$0xff] %v463_v26  ;;  %v3748_v27 = vld [vmem:[%s4971_s1 + $0x18] sm:$0xf]  ;;  %s4095_s27 = smov 2  }
  0x7e   : > { %v466_v29 = vld.sshfl [vmem:[#allocation1] sm:$0xff pattern:$0x75316420] }
  0x7f   : > { %476 = vst [vmem:[#allocation1] ss:$2 sm:$0xff] %v474_v28  ;;  %467 = vrot.lane.b32.xlu2 %v466_v29, %s4083_s28  ;;  %s4096_s28 = smov 20  }
  0x81   : > { %v367_v35 = vpop.permute.xlu2 %366 }
  0x86   : > { %v477_v31 = vld.sshfl [vmem:[#allocation1] sm:$0xff pattern:$0x75316420] }
  0x87   : > { %485 = vst [vmem:[#allocation1] ss:$2 sm:$0xff] %v483_v30  ;;  %478 = vrot.lane.b32.xlu2 %v477_v31, %s4084_s29  ;;  %s4097_s29 = smov 4  }
  0x89   : > { %v349_v32 = vpop.permute.xlu0 %348 }
  0x8a   : > { %352 = vst.msk [vmem:[#allocation2] sm:$0xf] %vm351_vm2, %v349_v32  ;;  %vm4981_vm2 = vcmask 1043456  }
  0x8e   : > { %v486_v33 = vld.sshfl [vmem:[#allocation1] sm:$0xff pattern:$0x75316420] }
  0x8f   : > { %487 = vrot.lane.b32.xlu0 %v486_v33, %s4085_s12  ;;  %v3755_v33 = vld [vmem:[%s4971_s1 + $0x1c] sm:$0xf]  ;;  %s4098_s12 = smov 74  }
  0x91   : > { %v358_v34 = vpop.permute.xlu1 %357 }
  0x92   : > { %361 = vst.msk [vmem:[#allocation2] sm:$0xf] %vm360_vm3, %v358_v34  ;;  %vm472_vm3 = vcmask 101376  }
  0x93   : > { %370 = vst.msk [vmem:[#allocation2] sm:$0xf] %vm369_vm4, %v367_v35  ;;  %vm452_vm4 = vcmask 855752  }
  0xa1   : > { %v376_v36 = vpop.permute.xlu1 %375 }
  0xa2   : > { %379 = vst.msk [vmem:[#allocation2] sm:$0xf] %vm378_vm5, %v376_v36  ;;  %vm481_vm5 = vcmask 248952   ;;  %v3762_v36 = vld [vmem:[%s4971_s1 + $0x20] sm:$0xf] }
  0xa9   : > { %v385_v37 = vpop.permute.xlu0 %384 }
  0xaa   : > { %388 = vst.msk [vmem:[#allocation2] sm:$0xf] %vm387_vm6, %v385_v37  ;;  %vm461_vm6 = vcmask 1003352  }
  0xb1   : > { %v394_v38 = vpop.permute.xlu0 %393  ;;  %v423_v42 = vpop.permute.xlu2 %422 }
  0xb2   : > { %397 = vst.msk [vmem:[#allocation2] sm:$0xf] %vm396_vm7, %v394_v38  ;;  %vm470_vm7 = vcmask 1044456  }
  0xb9   : > { %v403_v39 = vpop.permute.xlu0 %402 }
  0xba   : > { %406 = vst.msk [vmem:[#allocation2] sm:$0xf] %vm405_vm8, %v403_v39  ;;  %vm490_vm8 = vcmask 396552  }
  0xbb   : > { %408 = vst.msk [vmem:[#allocation2 + $0x8] sm:$0xf] %vm407_vm9, %v403_v39  ;;  %vm4991_vm9 = vcmask 1039360  }
  0xc1   : > { %v616_v40 = vld [vmem:[#allocation2] sm:$0xf]  ;;  %v414_v41 = vpop.permute.xlu1 %413  ;;  %v441_v43 = vpop.permute.xlu2 %440 }
  0xc2   : > { %625 = vrot.lane.b32.xlu1 %v616_v40, %s4086_s13  ;;  %417 = vst.msk [vmem:[#allocation2 + $0x8] sm:$0xf] %vm416_vm10, %v414_v41  ;;  %3714 = vmatpush.msk.msra.mxu3 %vm4981_vm2, %v616_v40  ;;  %vm4980_vm10 = vcmask 31744  }
  0xc3   : > { %426 = vst.msk [vmem:[#allocation2 + $0x8] sm:$0xf] %vm425_vm11, %v423_v42  ;;  %3715 = vmatmul.msk.f32.vlgmr.msra.gmra.mxu3 %vm4980_vm10, %v619_v56  ;;  %vm782_vm11 = vcmask 1031168  }
  0xca   : > { %776 = vrot.lane.b32.xlu1 %v616_v40, %s4087_s16 }
  0xd1   : > { %v432_v44 = vpop.permute.xlu0 %431 }
  0xd2   : > { %859 = vrot.lane.b32.xlu1 %v616_v40, %s4088_s17  ;;  %435 = vst.msk [vmem:[#allocation2 + $0x8] sm:$0xf] %vm434_vm14, %v432_v44  ;;  %vm4990_vm14 = vcmask 891904  }
  0xd3   : > { %444 = vst.msk [vmem:[#allocation2 + $0x8] sm:$0xf] %vm443_vm15, %v441_v43  ;;  %vm4987_vm15 = vcmask 883712  }
  0xd9   : > { %v468_v45 = vpop.permute.xlu2 %467 }
  0xda   : > { %942 = vrot.lane.b32.xlu1 %v616_v40, %s4089_s18  ;;  %473 = vst.msk [vmem:[#allocation2 + $0x10] sm:$0xf] %vm472_vm3, %v468_v45  ;;  %vm4985_vm3 = vcmask 752640  }
  0xe1   : > { %v450_v46 = vpop.permute.xlu1 %449  ;;  %v479_v47 = vpop.permute.xlu2 %478 }
  0xe2   : > { %1025 = vrot.lane.b32.xlu1 %v616_v40, %s4090_s19  ;;  %453 = vst.msk [vmem:[#allocation2 + $0x8] sm:$0xf] %vm452_vm4, %v450_v46  ;;  %vm4986_vm4 = vcmask 744448  }
  0xe3   : > { %482 = vst.msk [vmem:[#allocation2 + $0x10] sm:$0xf] %vm481_vm5, %v479_v47  ;;  %vm4984_vm5 = vcmask 736256  }
  0xe9   : > { %v459_v48 = vpop.permute.xlu1 %458 }
  0xea   : > { %462 = vst.msk [vmem:[#allocation2 + $0x8] sm:$0xf] %vm461_vm6, %v459_v48  ;;  %1108 = vrot.lane.b32.xlu1 %v616_v40, %s4091_s20 }
  0xeb   : > { %471 = vst.msk [vmem:[#allocation2 + $0x8] sm:$0xf] %vm470_vm7, %v468_v45 }
  0xf2   : > { %1191 = vrot.lane.b32.xlu1 %v616_v40, %s4092_s21  ;;  %v617_v49 = vld [vmem:[#allocation2 + $0x8] sm:$0xf] }
  0xf3   : > { %627 = vrot.lane.b32.xlu2 %v617_v49, %s4086_s13 }
  0xfa   : > { %1274 = vrot.lane.b32.xlu1 %v616_v40, %s4093_s22 }
  0xfb   : > { %778 = vrot.lane.b32.xlu2 %v617_v49, %s4087_s16 }
 0x101   : > { %v488_v50 = vpop.permute.xlu0 %487 }
 0x102   : > { %491 = vst.msk [vmem:[#allocation2 + $0x10] sm:$0xf] %vm490_vm8, %v488_v50  ;;  %1358 = vperm.xlu1 %3928, %v1355_v20  }
 0x103   : > { %861 = vrot.lane.b32.xlu2 %v617_v49, %s4088_s17 }
 0x109   : > { %v618_v51 = vld [vmem:[#allocation2 + $0x10] sm:$0xf] }
 0x10a   : > { %629 = vrot.lane.b32.xlu0 %v618_v51, %s4086_s13 }
 0x10b   : > { %944 = vrot.lane.b32.xlu2 %v617_v49, %s4089_s18 }
 0x112   : > { %780 = vrot.lane.b32.xlu0 %v618_v51, %s4087_s16 }
 0x113   : > { %1027 = vrot.lane.b32.xlu2 %v617_v49, %s4090_s19 }
 0x11a   : > { %863 = vrot.lane.b32.xlu0 %v618_v51, %s4088_s17 }
 0x11b   : > { %1110 = vrot.lane.b32.xlu2 %v617_v49, %s4091_s20 }
 0x122   : > { %946 = vrot.lane.b32.xlu0 %v618_v51, %s4089_s18 }
 0x123   : > { %1193 = vrot.lane.b32.xlu2 %v617_v49, %s4092_s21 }
 0x12a   : > { %1029 = vrot.lane.b32.xlu0 %v618_v51, %s4090_s19 }
 0x12b   : > { %1276 = vrot.lane.b32.xlu2 %v617_v49, %s4093_s22 }
 0x132   : > { %1112 = vrot.lane.b32.xlu0 %v618_v51, %s4091_s20 }
 0x134   : > { %v626_v52 = vpop.permute.xlu1 %625 }
 0x13a   : > { %1195 = vrot.lane.b32.xlu0 %v618_v51, %s4092_s21 }
 0x13c   : > { %v777_v58 = vpop.permute.xlu1 %776 }
 0x142   : > { %1278 = vrot.lane.b32.xlu0 %v618_v51, %s4093_s22 }
 0x144   : > { %v860_v60 = vpop.permute.xlu1 %859 }
 0x146   : > { %v731_v44 = vpop.f32.mrf.mxu3 }
 0x14c   : > { %v943_v62 = vpop.permute.xlu1 %942 }
 0x14d   : > { %v628_v53 = vpop.permute.xlu2 %627 }
 0x14e   : > { %v632_v54 = vsel %vm4991_vm9, %v626_v52, %v628_v53 }
 0x14f   : > { %3708 = vmatpush.msk.msra.mxu0 %vm4981_vm2, %v632_v54 }
 0x150   : > { %3709 = vmatmul.msk.f32.vlgmr.msra.gmra.mxu0 %vm4980_vm10, %v3707_v55 }
 0x151   : > { %3716 = vmatpush.msk.msrb.mxu0 %vm4981_vm2, %v617_v49 }
 0x154   : > { %v1026_v8 = vpop.permute.xlu1 %1025 }
 0x155   : > { %v779_v57 = vpop.permute.xlu2 %778 }
 0x156   : > { %v783_v1 = vsel %vm782_vm11, %v777_v58, %v779_v57 }
 0x158   : > { %3717 = vmatmul.msk.f32.vlgmr.msrb.gmra.mxu0 %vm4980_vm10, %v619_v56 }
 0x15c   : > { %v1109_v15 = vpop.permute.xlu1 %1108 }
 0x15d   : > { %v862_v59 = vpop.permute.xlu2 %861 }
 0x15e   : > { %v866_v2 = vsel %vm4992_vm12, %v860_v60, %v862_v59 }
 0x164   : > { %v1192_v23 = vpop.permute.xlu1 %1191 }
 0x165   : > { %v945_v61 = vpop.permute.xlu2 %944 }
 0x166   : > { %v949_v6 = vsel %vm4990_vm14, %v943_v62, %v945_v61 }
 0x16c   : > { %v1275_v29 = vpop.permute.xlu1 %1274 }
 0x16d   : > { %v1028_v3 = vpop.permute.xlu2 %1027 }
 0x16e   : > { %v1032_v11 = vsel %vm4987_vm15, %v1026_v8, %v1028_v3 }
 0x175   : > { %v1111_v14 = vpop.permute.xlu2 %1110 }
 0x176   : > { %v1115_v17 = vsel %vm4985_vm3, %v1109_v15, %v1111_v14 }
 0x17c   : > { %v630_v63 = vpop.permute.xlu0 %629 }
 0x17d   : > { %3712 = vmatpush.msk.msra.mxu2 %vm4981_vm2, %v630_v63  ;;  %v633_v0 = vsel %vm4991_vm9, %v628_v53, %v630_v63  ;;  %v1194_v21 = vpop.permute.xlu2 %1193  ;;  %v492_v53 = vlaneseq }
 0x17e   : > { %3710 = vmatpush.msk.msra.mxu1 %vm4981_vm2, %v633_v0  ;;  %3713 = vmatmul.msk.f32.vlgmr.msra.gmra.mxu2 %vm4980_vm10, %v3707_v55  ;;  %v1198_v25 = vsel %vm4986_vm4, %v1192_v23, %v1194_v21 }
 0x17f   : > { %3721 = vmatpush.msk.msrb.mxu2 %vm4981_vm2, %v783_v1  ;;  %3711 = vmatmul.msk.f32.vlgmr.msra.gmra.mxu1 %vm4980_vm10, %v3707_v55  ;;  %v493_v55 = vand.u32 127, %v492_v53 }
 0x180   : > { %3718 = vmatpush.msk.msrb.mxu1 %vm4981_vm2, %v618_v51 }
 0x181   : > { %v495_v23 = vadd.s32 256, %v493_v55 }
 0x182   : > { %3728 = vmatpush.msk.msra.mxu1 %vm4981_vm2, %v866_v2 }
 0x184   : > { %v781_v4 = vpop.permute.xlu0 %780 }
 0x185   : > { %3725 = vmatpush.msk.msra.mxu0 %vm4981_vm2, %v781_v4  ;;  %v784_v7 = vsel %vm782_vm11, %v779_v57, %v781_v4  ;;  %v1277_v28 = vpop.permute.xlu2 %1276 }
 0x186   : > { %3723 = vmatpush.msk.msrb.mxu3 %vm4981_vm2, %v784_v7  ;;  %3722 = vmatmul.msk.f32.vlgmr.msrb.gmra.mxu2 %vm4980_vm10, %v3720_v5  ;;  %v1281_v31 = vsel %vm4984_vm5, %v1275_v29, %v1277_v28 }
 0x187   : > { %3735 = vmatpush.msk.msrb.mxu0 %vm4981_vm2, %v949_v6  ;;  %3719 = vmatmul.msk.f32.vlgmr.msrb.gmra.mxu1 %vm4980_vm10, %v619_v56 }
 0x188   : > { %3724 = vmatmul.msk.f32.vlgmr.msrb.gmra.mxu3 %vm4980_vm10, %v3720_v5  ;;  %3726 = vmatmul.msk.f32.vlgmr.msra.gmra.mxu0 %vm4980_vm10, %v3720_v5  ;;  %v494_v5 = vadd.s32 128, %v493_v55 }
 0x18a   : > { %v4345_v15 = vadd.s32 1, %v494_v5 }
 0x18c   : > { %v864_v9 = vpop.permute.xlu0 %863 }
 0x18d   : > { %v867_v12 = vsel %vm4992_vm12, %v862_v59, %v864_v9  ;;  %3732 = vmatpush.msk.msra.mxu3 %vm4981_vm2, %v864_v9  ;;  %v4331_v59 = vadd.s32 1, %v493_v55 }
 0x18e   : > { %3730 = vmatpush.msk.msra.mxu2 %vm4981_vm2, %v867_v12 }
 0x18f   : > { %3742 = vmatpush.msk.msrb.mxu3 %vm4981_vm2, %v1032_v11  ;;  %3729 = vmatmul.msk.f32.vlgmr.msra.gmra.mxu1 %vm4980_vm10, %v3727_v10  ;;  %v502_v60 = vand.u32 65535, %v4331_v59  ;;  %v503_v63 = vshrl.u32 %v4331_v59, 16 }
 0x190   : > { %3731 = vmatmul.msk.f32.vlgmr.msra.gmra.mxu2 %vm4980_vm10, %v3727_v10  ;;  %3733 = vmatmul.msk.f32.vlgmr.msra.gmra.mxu3 %vm4980_vm10, %v3727_v10 }
 0x191   : > { %3736 = vmatmul.msk.f32.vlgmr.msrb.gmra.mxu0 %vm4980_vm10, %v3734_v13  ;;  %v4337_v0 = vmul.u32 58254, %v502_v60  ;;  %v505_v2 = vmul.u32 14564, %v502_v60 }
 0x193   : > { %v509_v4 = vshll.u32 %v4337_v0, 16 }
 0x194   : > { %v947_v16 = vpop.permute.xlu0 %946 }
 0x195   : > { %v950_v18 = vsel %vm4990_vm14, %v945_v61, %v947_v16  ;;  %3739 = vmatpush.msk.msrb.mxu2 %vm4981_vm2, %v947_v16  ;;  %vm513_vm6 = vc.u32 %v505_v2, %v509_v4 }
 0x196   : > { %3737 = vmatpush.msk.msrb.mxu1 %vm4981_vm2, %v950_v18 }
 0x197   : > { %3749 = vmatpush.msk.msra.mxu2 %vm4981_vm2, %v1115_v17  ;;  %3738 = vmatmul.msk.f32.vlgmr.msrb.gmra.mxu1 %vm4980_vm10, %v3734_v13  ;;  %v514_v17 = vsel %vm513_vm6, 1, %v4094_v22 }
 0x198   : > { %3740 = vmatmul.msk.f32.vlgmr.msrb.gmra.mxu2 %vm4980_vm10, %v3734_v13  ;;  %3743 = vmatmul.msk.f32.vlgmr.msrb.gmra.mxu3 %vm4980_vm10, %v3741_v19  ;;  %v508_v13 = vmul.u32 58254, %v503_v63 }
 0x19c   : > { %v1030_v24 = vpop.permute.xlu0 %1029 }
 0x19d   : > { %v1033_v26 = vsel %vm4987_vm15, %v1028_v3, %v1030_v24  ;;  %3746 = vmatpush.msk.msra.mxu1 %vm4981_vm2, %v1030_v24  ;;  %v4339_v3 = vmul.u32 14564, %v503_v63 }
 0x19e   : > { %3744 = vmatpush.msk.msra.mxu0 %vm4981_vm2, %v1033_v26  ;;  %v516_v26 = vadd.s32 %v514_v17, %v508_v13 }
 0x19f   : > { %3756 = vmatpush.msk.msrb.mxu1 %vm4981_vm2, %v1198_v25  ;;  %3745 = vmatmul.msk.f32.vlgmr.msra.gmra.mxu0 %vm4980_vm10, %v3741_v19  ;;  %v511_v10 = vshll.u32 %v4339_v3, 16  ;;  %v512_v63 = vshrl.u32 %v4339_v3, 16 }
 0x1a0   : > { %3747 = vmatmul.msk.f32.vlgmr.msra.gmra.mxu1 %vm4980_vm10, %v3741_v19  ;;  %3750 = vmatmul.msk.f32.vlgmr.msra.gmra.mxu2 %vm4980_vm10, %v3748_v27  ;;  %v531_v19 = vand.u32 65535, %v4345_v15 }
 0x1a2   : > { %v534_v29 = vmul.u32 14564, %v531_v19 }
 0x1a4   : > { %v1113_v30 = vpop.permute.xlu0 %1112 }
 0x1a5   : > { %v1116_v32 = vsel %vm4985_vm3, %v1111_v14, %v1113_v30  ;;  %3753 = vmatpush.msk.msrb.mxu0 %vm4981_vm2, %v1113_v30  ;;  %v515_v14 = vadd.s32 %v509_v4, %v505_v2 }
 0x1a6   : > { %3751 = vmatpush.msk.msra.mxu3 %vm4981_vm2, %v1116_v32 }
 0x1a7   : > { %3763 = vmatpush.msk.msra.mxu0 %vm4981_vm2, %v1281_v31  ;;  %3752 = vmatmul.msk.f32.vlgmr.msra.gmra.mxu3 %vm4980_vm10, %v3748_v27  ;;  %vm517_vm7 = vc.u32 %v515_v14, %v511_v10  ;;  %v4353_v31 = vadd.s32 1, %v495_v23 }
 0x1a8   : > { %3754 = vmatmul.msk.f32.vlgmr.msrb.gmra.mxu0 %vm4980_vm10, %v3748_v27  ;;  %3757 = vmatmul.msk.f32.vlgmr.msrb.gmra.mxu1 %vm4980_vm10, %v3755_v33  ;;  %v535_v27 = vmul.u32 58254, %v531_v19 }
 0x1ac   : > { %v1196_v34 = vpop.permute.xlu0 %1195 }
 0x1ad   : > { %v1199_v35 = vsel %vm4986_vm4, %v1194_v21, %v1196_v34  ;;  %3760 = vmatpush.msk.msrb.mxu3 %vm4981_vm2, %v1196_v34  ;;  %v532_v21 = vshrl.u32 %v4345_v15, 16  ;;  %v538_v34 = vshll.u32 %v535_v27, 16 }
 0x1ae   : > { %3758 = vmatpush.msk.msrb.mxu2 %vm4981_vm2, %v1199_v35 }
 0x1af   : > { %3759 = vmatmul.msk.f32.vlgmr.msrb.gmra.mxu2 %vm4980_vm10, %v3755_v33  ;;  %3761 = vmatmul.msk.f32.vlgmr.msrb.gmra.mxu3 %vm4980_vm10, %v3755_v33  ;;  %v4351_v30 = vmul.u32 14564, %v532_v21  ;;  %vm542_vm8 = vc.u32 %v534_v29, %v538_v34 }
 0x1b0   : > { %3764 = vmatmul.msk.f32.vlgmr.msra.gmra.mxu0 %vm4980_vm10, %v3762_v36 }
 0x1b1   : > { %v541_v19 = vshrl.u32 %v4351_v30, 16 }
 0x1b4   : > { %v1279_v37 = vpop.permute.xlu0 %1278 }
 0x1b5   : > { %v1282_v38 = vsel %vm4984_vm5, %v1277_v28, %v1279_v37  ;;  %3767 = vmatpush.msk.msra.mxu2 %vm4981_vm2, %v1279_v37  ;;  %v518_v28 = vsel %vm517_vm7, 1, %v4094_v22  ;;  %v510_v37 = vshrl.u32 %v4337_v0, 16 }
 0x1b6   : > { %3765 = vmatpush.msk.msra.mxu1 %vm4981_vm2, %v1282_v38  ;;  %v540_v38 = vshll.u32 %v4351_v30, 16 }
 0x1b7   : > { %3766 = vmatmul.msk.f32.vlgmr.msra.gmra.mxu1 %vm4980_vm10, %v3762_v36  ;;  %3768 = vmatmul.msk.f32.vlgmr.msra.gmra.mxu2 %vm4980_vm10, %v3762_v36 }
 0x1cd   : > { %v662_v39 = vpop.f32.mrf.mxu0 }
 0x1ce   : > { %v732_v52 = vadd.f32 %v731_v44, %v662_v39  ;;  %v560_v39 = vand.u32 65535, %v4353_v31  ;;  %v544_v44 = vadd.s32 %v538_v34, %v534_v29 }
 0x1d0   : > { %vm546_vm6 = vc.u32 %v544_v44, %v540_v38 }
 0x1d5   : > { %v751_v41 = vpop.f32.mrf.mxu0 }
 0x1fc   : > { %v682_v40 = vpop.f32.mrf.mxu1 }
 0x1fd   : > { %v752_v1 = vadd.f32 %v751_v41, %v682_v40  ;;  %v1359_v41 = vpop.permute.xlu1 %1358 }
 0x201   : > { %v702_v42 = vpop.f32.mrf.mxu2 }
 0x204   : > { %v771_v43 = vpop.f32.mrf.mxu1 }
 0x205   : > { %v851_v45 = vpop.f32.mrf.mxu0  ;;  %v772_v7 = vadd.f32 %v771_v43, %v702_v42  ;;  %v520_v42 = vadd.s32 %v518_v28, %v516_v26  ;;  %v537_v43 = vmul.u32 58254, %v532_v21 }
 0x207   : > { %v856_v24 = vadd.f32 %v851_v45, %v772_v7  ;;  %v521_v0 = vadd.s32 %v520_v42, %v510_v37 }
 0x209   : > { %v811_v46 = vpop.f32.mrf.mxu2 }
 0x20a   : > { %v854_v57 = vadd.f32 %v811_v46, %v732_v52  ;;  %v543_v46 = vsel %vm542_vm8, 1, %v4094_v22  ;;  %v563_v52 = vmul.u32 14564, %v560_v39 }
 0x20b   : > { %v831_v48 = vpop.f32.mrf.mxu3 }
 0x20c   : > { %v894_v47 = vpop.f32.mrf.mxu1  ;;  %v855_v11 = vadd.f32 %v831_v48, %v752_v1  ;;  %v564_v48 = vmul.u32 58254, %v560_v39  ;;  %v547_v1 = vsel %vm546_vm6, 1, %v4094_v22 }
 0x20d   : > { %v937_v62 = vadd.f32 %v894_v47, %v854_v57  ;;  %v561_v47 = vshrl.u32 %v4353_v31, 16 }
 0x20e   : > { %v977_v50 = vpop.f32.mrf.mxu0  ;;  %v567_v57 = vshll.u32 %v564_v48, 16 }
 0x20f   : > { %v1020_v8 = vadd.f32 %v977_v50, %v937_v62  ;;  %v565_v55 = vmul.u32 14564, %v561_v47  ;;  %v566_v13 = vmul.u32 58254, %v561_v47 }
 0x210   : > { %vm571_vm7 = vc.u32 %v563_v52, %v567_v57 }
 0x211   : > { %v569_v5 = vshll.u32 %v565_v55, 16 }
 0x213   : > { %v914_v49 = vpop.f32.mrf.mxu2  ;;  %v934_v54 = vpop.f32.mrf.mxu3 }
 0x214   : > { %v997_v51 = vpop.f32.mrf.mxu1  ;;  %v938_v18 = vadd.f32 %v914_v49, %v855_v11  ;;  %v939_v32 = vadd.f32 %v934_v54, %v856_v24  ;;  %v545_v54 = vadd.s32 %v543_v46, %v537_v43 }
 0x216   : > { %v1021_v33 = vadd.f32 %v997_v51, %v938_v18  ;;  %v549_v10 = vadd.s32 %v547_v1, %v545_v54 }
 0x21b   : > { %v1017_v56 = vpop.f32.mrf.mxu2  ;;  %v1060_v6 = vpop.f32.mrf.mxu3 }
 0x21c   : > { %v1080_v58 = vpop.f32.mrf.mxu0  ;;  %v1103_v16 = vadd.f32 %v1060_v6, %v1020_v8  ;;  %v1022_v50 = vadd.f32 %v1017_v56, %v939_v32  ;;  %v573_v56 = vadd.s32 %v567_v57, %v563_v52  ;;  %v539_v8 = vshrl.u32 %v535_v27, 16 }
 0x21d   : > { %v4334_v61 = vpop.f32.mrf.mxu1  ;;  %v1104_v49 = vadd.f32 %v1080_v58, %v1021_v33  ;;  %v568_v33 = vshrl.u32 %v564_v48, 16 }
 0x21e   : > { %v1105_v6 = vadd.f32 %v4334_v61, %v1022_v50  ;;  %vm575_vm8 = vc.u32 %v573_v56, %v569_v5  ;;  %v550_v61 = vadd.s32 %v549_v10, %v539_v8 }
 0x21f   : > { %v576_v26 = vsel %vm575_vm8, 1, %v4094_v22 }
 0x220   : > { %v551_v29 = vadd.s32 %v550_v61, %v541_v19 }
 0x222   : > { %v552_v38 = vshrl.u32 %v551_v29, 4 }
 0x223   : > { %v1143_v12 = vpop.f32.mrf.mxu2 }
 0x224   : > { %v1186_v20 = vadd.f32 %v1143_v12, %v1103_v16  ;;  %v522_v12 = vadd.s32 %v521_v0, %v512_v63  ;;  %v572_v16 = vsel %vm571_vm7, 1, %v4094_v22 }
 0x225   : > { %v4342_v9 = vpop.f32.mrf.mxu0  ;;  %v1226_v25 = vpop.f32.mrf.mxu1  ;;  %v574_v23 = vadd.s32 %v572_v16, %v566_v13 }
 0x226   : > { %v1269_v35 = vadd.f32 %v1226_v25, %v1186_v20  ;;  %v1188_v3 = vadd.f32 %v4342_v9, %v1105_v6  ;;  %v523_v21 = vshrl.u32 %v522_v12, 4 }
 0x227   : > { %v578_v34 = vadd.s32 %v576_v26, %v574_v23 }
 0x228   : > { %v524_v32 = vmul.u32 18, %v523_v21 }
 0x229   : > { %v579_v42 = vadd.s32 %v578_v34, %v568_v33 }
 0x22a   : > { %v1163_v36 = vpop.f32.mrf.mxu3  ;;  %v525_v39 = vsub.s32 %v4331_v59, %v524_v32 }
 0x22b   : > { %v1187_v53 = vadd.f32 %v1163_v36, %v1104_v49 }
 0x22c   : > { %vm586_vm6 = vcmp.ne.s32.totalorder %v525_v39, 0  ;;  %vm589_vm7 = vcmp.lt.s32.totalorder %v525_v39, 0  ;;  %v595_v47 = vadd.s32 18, %v525_v39 }
 0x22d   : > { %v1309_v40 = vpop.f32.mrf.mxu0  ;;  %vm592_vm8 = vmand %vm589_vm7, %vm586_vm6 }
 0x22e   : > { %v1352_v45 = vadd.f32 %v1309_v40, %v1269_v35  ;;  %v570_v40 = vshrl.u32 %v565_v55, 16  ;;  %v598_v55 = vsel %vm592_vm8, %v595_v47, %v525_v39 }
 0x22f   : > { %vm601_vm8 = vcmp.ge.s32.totalorder %v598_v55, 1  ;;  %vm604_vm3 = vcmp.le.s32.totalorder %v598_v55, 16 }
 0x230   : > { %v4360_v51 = vadd.f32 %v1359_v41, %v1352_v45  ;;  %v580_v45 = vadd.s32 %v579_v42, %v570_v40 }
 0x232   : > { %v1364_v60 = vmin.f32 %v4360_v51, 20.0  ;;  %v1246_v62 = vpop.f32.mrf.mxu2  ;;  %v1266_v11 = vpop.f32.mrf.mxu3  ;;  %v581_v52 = vshrl.u32 %v580_v45, 4 }
 0x233   : > { %v1270_v2 = vadd.f32 %v1246_v62, %v1187_v53  ;;  %v1271_v17 = vadd.f32 %v1266_v11, %v1188_v3 }
 0x234   : > { %v1367_v4 = vmul.f32 1.442695, %v1364_v60  ;;  %v1329_v58 = vpop.f32.mrf.mxu1  ;;  %v582_v0 = vmul.u32 18, %v581_v52 }
 0x235   : > { %v1353_v7 = vadd.f32 %v1329_v58, %v1270_v2 }
 0x236   : > { %4025 = vpow2.f32 %v1367_v4  ;;  %v583_v6 = vsub.s32 %v4353_v31, %v582_v0 }
 0x237   : > { %v4367_v14 = vadd.f32 %v1359_v41, %v1353_v7 }
 0x238   : > { %v597_v21 = vadd.s32 18, %v583_v6 }
 0x239   : > { %v1365_v18 = vmin.f32 %v4367_v14, 20.0 }
 0x23a   : > { %v1349_v20 = vpop.f32.mrf.mxu2 }
 0x23b   : > { %v1369_v24 = vmul.f32 1.442695, %v1365_v18  ;;  %v1354_v25 = vadd.f32 %v1349_v20, %v1271_v17 }
 0x23c   : > { %v4026_v27 = vpop.eup %4025 }
 0x23d   : > { %v1373_v9 = vadd.f32 2.0, %v4026_v27  ;;  %4027 = vpow2.f32 %v1369_v24  ;;  %v4373_v28 = vadd.f32 %v1359_v41, %v1354_v25  ;;  %v553_v41 = vmul.u32 18, %v552_v38 }
 0x23f   : > { %v1376_v35 = vmul.f32 %v4026_v27, %v1373_v9  ;;  %v1366_v30 = vmin.f32 %v4373_v28, 20.0  ;;  %v554_v49 = vsub.s32 %v4345_v15, %v553_v41 }
 0x241   : > { %v1379_v36 = vadd.f32 2.0, %v1376_v35  ;;  %v1371_v37 = vmul.f32 1.442695, %v1366_v30  ;;  %vm587_vm10 = vcmp.ne.s32.totalorder %v554_v49, 0  ;;  %vm590_vm2 = vcmp.lt.s32.totalorder %v554_v49, 0 }
 0x242   : > { %vm593_vm7 = vmand %vm590_vm2, %vm587_vm10  ;;  %v596_v4 = vadd.s32 18, %v554_v49 }
 0x243   : > { %v4028_v22 = vpop.eup %4027  ;;  %4029 = vrcp.f32 %v1379_v36  ;;  %v1393_v57 = vand.u32 2147483648, %v1379_v36  ;;  %v1391_v63 = vand.u32 2147483647, %v1379_v36  ;;  %vm1387_vm6 = vweird.f32 %v1379_v36  ;;  %vm4385_vm2 = vmand %vm601_vm8, %vm604_vm3 }
 0x244   : > { %v1374_v43 = vadd.f32 2.0, %v4028_v22  ;;  %4031 = vpow2.f32 %v1371_v37  ;;  %v599_v12 = vsel %vm593_vm7, %v596_v4, %v554_v49  ;;  %v3776_v4 = vld [vmem:[%s4973_s3 + $0x8] sm:$0xf] }
 0x245   : > { %v1394_v58 = vor.u32 1.1754944e-38, %v1393_v57  ;;  %vm1392_vm5 = vcmp.eq.f32.partialorder %v1391_v63, 8.507059e+37  ;;  %vm605_vm7 = vcmp.le.s32.totalorder %v599_v12, 16 }
 0x246   : > { %v4377_v44 = vmul.f32 %v4028_v22, %v1374_v43 }
 0x248   : > { %v1380_v46 = vadd.f32 2.0, %v4377_v44 }
 0x249   : > { %v4030_v48 = vpop.eup %4029 }
 0x24a   : > { %v4032_v59 = vpop.eup %4031  ;;  %v1383_v50 = vmul.f32 %v4030_v48, %v1379_v36  ;;  %4033 = vrcp.f32 %v1380_v46  ;;  %vm1388_vm1 = vweird.f32 %v4030_v48  ;;  %v1408_v11 = vand.u32 2147483648, %v1380_v46 }
 0x24b   : > { %v1375_v53 = vadd.f32 2.0, %v4032_v59  ;;  %vm1389_vm13 = vmor %vm1387_vm6, %vm1388_vm1  ;;  %v1406_v3 = vand.u32 2147483647, %v1380_v46  ;;  %vm588_vm1 = vcmp.ne.s32.totalorder %v583_v6, 0  ;;  %vm1402_vm10 = vweird.f32 %v1380_v46 }
 0x24c   : > { %v1384_v54 = vsub.f32 1.0, %v1383_v50  ;;  %vm602_vm6 = vcmp.ge.s32.totalorder %v599_v12, 1  ;;  %v1409_v31 = vor.u32 1.1754944e-38, %v1408_v11  ;;  %v2155_v50 = vld [vmem:[%s4974_s4] sm:$0xf] }
 0x24d   : > { %v4381_v60 = vmul.f32 %v4032_v59, %v1375_v53  ;;  %vm1407_vm3 = vcmp.eq.f32.partialorder %v1406_v3, 8.507059e+37  ;;  %v1458_v53 = vld [vmem:[%s4973_s3] sm:$0xf] }
 0x24e   : > { %v1385_v62 = vmul.f32 %v4030_v48, %v1384_v54 }
 0x24f   : > { %v1381_v1 = vadd.f32 2.0, %v4381_v60 }
 0x250   : > { %v4034_v2 = vpop.eup %4033  ;;  %v1386_v15 = vadd.f32 %v4030_v48, %v1385_v62  ;;  %v3769_v62 = vld [vmem:[%s4973_s3 + $0x4] sm:$0xf] }
 0x251   : > { %v1398_v5 = vmul.f32 %v4034_v2, %v1380_v46  ;;  %4035 = vrcp.f32 %v1381_v1  ;;  %vm1403_vm4 = vweird.f32 %v4034_v2  ;;  %v1423_v27 = vand.u32 2147483648, %v1381_v1 }
 0x252   : > { %v1390_v56 = vsel %vm1389_vm13, %v4030_v48, %v1386_v15  ;;  %vm591_vm13 = vcmp.lt.s32.totalorder %v583_v6, 0  ;;  %v1421_v29 = vand.u32 2147483647, %v1381_v1 }
 0x253   : > { %v1395_v7 = vsel %vm1392_vm5, %v1394_v58, %v1390_v56  ;;  %v1399_v8 = vsub.f32 1.0, %v1398_v5  ;;  %vm1404_vm5 = vmor %vm1402_vm10, %vm1403_vm4  ;;  %v1424_v30 = vor.u32 1.1754944e-38, %v1423_v27 }
 0x254   : > { %v1396_v10 = vmul.f32 %v1395_v7, %v1376_v35  ;;  %vm594_vm8 = vmand %vm591_vm13, %vm588_vm1  ;;  %vm1417_vm1 = vweird.f32 %v1381_v1  ;;  %v3784_v7 = vld [vmem:[%s4973_s3 + $0x10] sm:$0xf] }
 0x255   : > { %v1400_v13 = vmul.f32 %v4034_v2, %v1399_v8  ;;  %vm4396_vm10 = vmand %vm602_vm6, %vm605_vm7  ;;  %v600_v33 = vsel %vm594_vm8, %v597_v21, %v583_v6  ;;  %vm4988_vm7 = vcmask 1047708   ;;  %vm1475_vm8 = vcmask 64512  }
 0x256   : > { %v1427_v17 = vmul.f32 %v1396_v10, %v4360_v51  ;;  %vm606_vm15 = vcmp.le.s32.totalorder %v600_v33, 16 }
 0x257   : > { %v4036_v18 = vpop.eup %4035  ;;  %v1401_v19 = vadd.f32 %v4034_v2, %v1400_v13  ;;  %v3780_v13 = vld [vmem:[%s4973_s3 + $0xc] sm:$0xf] }
 0x258   : > { %v1413_v61 = vmul.f32 %v4036_v18, %v1381_v1  ;;  %v1430_v20 = vsel %vm4385_vm2, %v1427_v17, 0.0  ;;  %vm1418_vm4 = vweird.f32 %v4036_v18 }
 0x259   : > { %v1405_v23 = vsel %vm1404_vm5, %v4034_v2, %v1401_v19  ;;  %v1436_v24 = vrot.slane %v1430_v20, 4  ;;  %vm1419_vm13 = vmor %vm1417_vm1, %vm1418_vm4  ;;  %vm603_vm5 = vcmp.ge.s32.totalorder %v600_v33, 1  ;;  %vm4999_vm4 = vcmask 883712  }
 0x25a   : > { %v1410_v51 = vsel %vm1407_vm3, %v1409_v31, %v1405_v23  ;;  %v1414_v25 = vsub.f32 1.0, %v1413_v61  ;;  %vm1422_vm3 = vcmp.eq.f32.partialorder %v1421_v29, 8.507059e+37  ;;  %vm4405_vm6 = vmand %vm603_vm5, %vm606_vm15  ;;  %vm4989_vm15 = vcmask 416772  }
 0x25b   : > { %v1411_v26 = vmul.f32 %v1410_v51, %v4377_v44  ;;  %1439 = vrot.lane.b32.xlu2 %v1436_v24, %s4069_s15  ;;  %v3788_v24 = vld [vmem:[%s4973_s3 + $0x14] sm:$0xf]  ;;  %vm5000_vm1 = vmmov %vm4999_vm4  ;;  %vm5002_vm5 = vcmask 752640  }
 0x25c   : > { %v1415_v9 = vmul.f32 %v4036_v18, %v1414_v25 }
 0x25d   : > { %v1428_v34 = vmul.f32 %v1411_v26, %v4367_v14 }
 0x25e   : > { %v1416_v35 = vadd.f32 %v4036_v18, %v1415_v9 }
 0x25f   : > { %v1431_v36 = vsel %vm4396_vm10, %v1428_v34, 0.0 }
 0x260   : > { %v1420_v37 = vsel %vm1419_vm13, %v4036_v18, %v1416_v35  ;;  %v1437_v38 = vrot.slane %v1431_v36, 4  ;;  %v3792_v35 = vld [vmem:[%s4973_s3 + $0x18] sm:$0xf]  ;;  %vm5001_vm13 = vcmask 744448  }
 0x261   : > { %v1425_v39 = vsel %vm1422_vm3, %v1424_v30, %v1420_v37  ;;  %vm5003_vm3 = vmmov %vm5002_vm5 }
 0x262   : > { %v1426_v40 = vmul.f32 %v1425_v39, %v4381_v60  ;;  %1441 = vrot.lane.b32.xlu0 %v1437_v38, %s4069_s15 }
 0x264   : > { %v1429_v14 = vmul.f32 %v1426_v40, %v4373_v28 }
 0x266   : > { %v1432_v22 = vsel %vm4405_vm6, %v1429_v14, 0.0 }
 0x267   : > { %v1438_v43 = vrot.slane %v1432_v22, 4 }
 0x269   : > { %1443 = vrot.lane.b32.xlu1 %v1438_v43, %s4069_s15 }
 0x2b5   : > { %v1440_v41 = vpop.permute.xlu2 %1439 }
 0x2b6   : > { %1451 = vst.msk [vmem:[#allocation2] sm:$0xf0] %vm4988_vm7, %v1440_v41 }
 0x2bd   : > { %v4414_v44 = vld [vmem:[#allocation2] sm:$0xff] }
 0x2be   : > { %1557 = vmatpush.msrb.mxu2 %v4414_v44 }
 0x2bf   : > { %3773 = vmatmul.msk.f32.vlgmr.msrb.gmra.mxu2 %vm1475_vm8, %v1458_v53 }
 0x2d4   : > { %v1442_v45 = vpop.permute.xlu0 %1441 }
 0x2d5   : > { %v1445_v46 = vsel %vm333_vm0, %v1440_v41, %v1442_v45  ;;  %v3800_v41 = vld [vmem:[%s4973_s3 + $0x20] sm:$0xf] }
 0x2d6   : > { %1452 = vst [vmem:[#allocation2 + $0x8] sm:$0xf0] %v1445_v46 }
 0x2db   : > { %v1444_v28 = vpop.permute.xlu1 %1443 }
 0x2dc   : > { %v1446_v47 = vsel %vm333_vm0, %v1442_v45, %v1444_v28 }
 0x2dd   : > { %1454 = vst.msk [vmem:[#allocation2 + $0x10] sm:$0xf0] %vm4989_vm15, %v1446_v47  ;;  %v4420_v48 = vld [vmem:[#allocation2 + $0x8] sm:$0xff] }
 0x2de   : > { %v4424_v49 = vpack.i.bf16 %v4420_v48, %v4414_v44 }
 0x2e0   : > { %3935 = vrot.lane.b32.xlu1 %v4424_v49, %s4087_s16  ;;  %3930 = vrot.lane.b32.xlu2 %v4424_v49, %s4086_s13 }
 0x2e4   : > { %v4430_v59 = vld [vmem:[#allocation2 + $0x10] sm:$0xff] }
 0x2e5   : > { %1468 = vrot.lane.b32.xlu0 %v4430_v59, %s4086_s13  ;;  %v3990_v52 = vpack.i.bf16 %v4430_v59, %v4420_v48 }
 0x2e8   : > { %1687 = vrot.lane.b32.xlu1 %v4430_v59, %s4088_s17  ;;  %1608 = vrot.lane.b32.xlu2 %v4430_v59, %s4087_s16 }
 0x2ed   : > { %3940 = vrot.lane.b32.xlu0 %v4424_v49, %s4088_s17 }
 0x2f0   : > { %3950 = vrot.lane.b32.xlu1 %v4424_v49, %s4090_s19  ;;  %3945 = vrot.lane.b32.xlu2 %v4424_v49, %s4089_s18 }
 0x2f5   : > { %1766 = vrot.lane.b32.xlu0 %v4430_v59, %s4089_s18 }
 0x2f8   : > { %1924 = vrot.lane.b32.xlu1 %v4430_v59, %s4091_s20  ;;  %1845 = vrot.lane.b32.xlu2 %v4430_v59, %s4090_s19 }
 0x2fd   : > { %3955 = vrot.lane.b32.xlu0 %v4424_v49, %s4091_s20 }
 0x300   : > { %3965 = vrot.lane.b32.xlu1 %v4424_v49, %s4093_s22  ;;  %3960 = vrot.lane.b32.xlu2 %v4424_v49, %s4092_s21 }
 0x305   : > { %2003 = vrot.lane.b32.xlu0 %v4430_v59, %s4092_s21 }
 0x308   : > { %2082 = vrot.lane.b32.xlu2 %v4430_v59, %s4093_s22 }
 0x30d   : > { %2158 = vperm.xlu0 %3969, %v2155_v50  }
 0x310   : > { %3971 = vrot.lane.b32.xlu2 %v4424_v49, %s4086_s13 }
 0x315   : > { %3976 = vrot.lane.b32.xlu0 %v4424_v49, %s4087_s16 }
 0x31d   : > { %2269 = vrot.lane.b32.xlu0 %v4430_v59, %s4086_s13 }
 0x325   : > { %2615 = vrot.lane.b32.xlu0 %v4430_v59, %s4089_s18 }
 0x32d   : > { %3991 = vrot.lane.b32.xlu0 %v3990_v52, %s4090_s19  ;;  %v3796_v52 = vld [vmem:[%s4973_s3 + $0x1c] sm:$0xf] }
 0x33a   : > { %v3931_v54 = vpop.permute.xlu2 %3930 }
 0x33b   : > { %v3933_v55 = vunpack.i.h.bf16 %v3931_v54  ;;  %v3932_v57 = vunpack.i.l.bf16 %v3931_v54 }
 0x33d   : > { %v1470_v60 = vsel %vm4991_vm9, %v3932_v57, %v3933_v55 }
 0x33e   : > { %1494 = vmatpush.msra.mxu3 %v1470_v60 }
 0x33f   : > { %3770 = vmatmul.msk.f32.vlgmr.msra.gmra.mxu3 %vm1475_vm8, %v3769_v62 }
 0x340   : > { %1577 = vmatpush.msrb.mxu3 %v4420_v48 }
 0x342   : > { %v1609_v63 = vpop.permute.xlu2 %1608 }
 0x343   : > { %1673 = vmatpush.msra.mxu3 %v1609_v63 }
 0x347   : > { %3774 = vmatmul.msk.f32.vlgmr.msrb.gmra.mxu3 %vm1475_vm8, %v1458_v53 }
 0x34a   : > { %v3946_v0 = vpop.permute.xlu2 %3945 }
 0x34b   : > { %v3948_v1 = vunpack.i.h.bf16 %v3946_v0  ;;  %v3947_v2 = vunpack.i.l.bf16 %v3946_v0 }
 0x34d   : > { %v1768_v15 = vsel %vm4990_vm14, %v3947_v2, %v3948_v1 }
 0x34e   : > { %1791 = vmatpush.msrb.mxu3 %v1768_v15 }
 0x34f   : > { %3779 = vmatmul.msk.f32.vlgmr.msra.gmra.mxu3 %vm1475_vm8, %v3776_v4 }
 0x352   : > { %v3936_v58 = vpop.permute.xlu1 %3935  ;;  %v1846_v19 = vpop.permute.xlu2 %1845 }
 0x353   : > { %v3938_v5 = vunpack.i.h.bf16 %v3936_v58  ;;  %v3937_v56 = vunpack.i.l.bf16 %v3936_v58 }
 0x355   : > { %v1611_v6 = vsel %vm782_vm11, %v3938_v5, %v1609_v63  ;;  %v1610_v11 = vsel %vm782_vm11, %v3937_v56, %v3938_v5 }
 0x356   : > { %1653 = vmatpush.msra.mxu2 %v1611_v6 }
 0x357   : > { %v1469_v8 = vpop.permute.xlu0 %1468  ;;  %3778 = vmatmul.msk.f32.vlgmr.msra.gmra.mxu2 %vm1475_vm8, %v3776_v4  ;;  %3785 = vmatmul.msk.f32.vlgmr.msrb.gmra.mxu3 %vm1475_vm8, %v3784_v7 }
 0x358   : > { %v1471_v10 = vsel %vm4991_vm9, %v3933_v55, %v1469_v8  ;;  %1534 = vmatpush.msrb.mxu1 %v1469_v8  ;;  %v1559_v55 = vpop.f32.mrf.mxu2 }
 0x359   : > { %1514 = vmatpush.msrb.mxu0 %v1471_v10  ;;  %3772 = vmatmul.msk.f32.vlgmr.msrb.gmra.mxu1 %vm1475_vm8, %v3769_v62 }
 0x35a   : > { %1633 = vmatpush.msra.mxu1 %v1610_v11  ;;  %3771 = vmatmul.msk.f32.vlgmr.msrb.gmra.mxu0 %vm1475_vm8, %v3769_v62  ;;  %v1688_v12 = vpop.permute.xlu1 %1687  ;;  %v3961_v29 = vpop.permute.xlu2 %3960 }
 0x35b   : > { %1597 = vmatpush.msra.mxu0 %v4430_v59  ;;  %1752 = vmatpush.msrb.mxu2 %v1688_v12  ;;  %v3963_v33 = vunpack.i.h.bf16 %v3961_v29  ;;  %v3962_v34 = vunpack.i.l.bf16 %v3961_v29 }
 0x35d   : > { %v2005_v38 = vsel %vm5001_vm13, %v3962_v34, %v3963_v33 }
 0x35f   : > { %v3941_v3 = vpop.permute.xlu0 %3940  ;;  %3783 = vmatmul.msk.f32.vlgmr.msrb.gmra.mxu2 %vm1475_vm8, %v3780_v13 }
 0x360   : > { %v3943_v17 = vunpack.i.h.bf16 %v3941_v3  ;;  %v3942_v18 = vunpack.i.l.bf16 %v3941_v3 }
 0x361   : > { %3777 = vmatmul.msk.f32.vlgmr.msra.gmra.mxu1 %vm1475_vm8, %v3776_v4 }
 0x362   : > { %3775 = vmatmul.msk.f32.vlgmr.msra.gmra.mxu0 %vm1475_vm8, %v1458_v53  ;;  %v3951_v31 = vpop.permute.xlu1 %3950  ;;  %v1690_v61 = vsel %vm4992_vm12, %v3943_v17, %v1688_v12  ;;  %v1689_v20 = vsel %vm4992_vm12, %v3942_v18, %v3943_v17  ;;  %v2083_v47 = vpop.permute.xlu2 %2082 }
 0x363   : > { %v3953_v21 = vunpack.i.h.bf16 %v3951_v31  ;;  %v3952_v23 = vunpack.i.l.bf16 %v3951_v31  ;;  %1732 = vmatpush.msrb.mxu1 %v1690_v61  ;;  %1712 = vmatpush.msrb.mxu0 %v1689_v20 }
 0x365   : > { %v1847_v51 = vsel %vm4999_vm4, %v3952_v23, %v3953_v21  ;;  %v1848_v25 = vsel %vm5000_vm1, %v3953_v21, %v1846_v19  ;;  %vm5004_vm4 = vcmask 736256   ;;  %vm5005_vm1 = vmmov %vm5001_vm13 }
 0x366   : > { %1870 = vmatpush.msra.mxu2 %v1847_v51  ;;  %1890 = vmatpush.msra.mxu3 %v1848_v25  ;;  %vm5006_vm13 = vmmov %vm5004_vm4 }
 0x367   : > { %v1767_v26 = vpop.permute.xlu0 %1766  ;;  %3789 = vmatmul.msk.f32.vlgmr.msra.gmra.mxu2 %vm1475_vm8, %v3788_v24  ;;  %3790 = vmatmul.msk.f32.vlgmr.msra.gmra.mxu3 %vm1475_vm8, %v3788_v24 }
 0x368   : > { %v1769_v27 = vsel %vm4990_vm14, %v3948_v1, %v1767_v26  ;;  %1831 = vmatpush.msra.mxu1 %v1767_v26 }
 0x369   : > { %3782 = vmatmul.msk.f32.vlgmr.msrb.gmra.mxu1 %vm1475_vm8, %v3780_v13  ;;  %1811 = vmatpush.msra.mxu0 %v1769_v27 }
 0x36a   : > { %3781 = vmatmul.msk.f32.vlgmr.msrb.gmra.mxu0 %vm1475_vm8, %v3780_v13  ;;  %v1925_v9 = vpop.permute.xlu1 %1924 }
 0x36b   : > { %1910 = vmatpush.msrb.mxu0 %v1846_v19  ;;  %1989 = vmatpush.msrb.mxu3 %v1925_v9 }
 0x36f   : > { %v3956_v30 = vpop.permute.xlu0 %3955  ;;  %3795 = vmatmul.msk.f32.vlgmr.msrb.gmra.mxu3 %vm1475_vm8, %v3792_v35 }
 0x370   : > { %v3958_v36 = vunpack.i.h.bf16 %v3956_v30  ;;  %v3957_v37 = vunpack.i.l.bf16 %v3956_v30 }
 0x371   : > { %3787 = vmatmul.msk.f32.vlgmr.msra.gmra.mxu1 %vm1475_vm8, %v3784_v7 }
 0x372   : > { %3786 = vmatmul.msk.f32.vlgmr.msra.gmra.mxu0 %vm1475_vm8, %v3784_v7  ;;  %v3966_v39 = vpop.permute.xlu1 %3965  ;;  %v1926_v40 = vsel %vm5002_vm5, %v3957_v37, %v3958_v36  ;;  %v1927_v14 = vsel %vm5003_vm3, %v3958_v36, %v1925_v9 }
 0x373   : > { %2028 = vmatpush.msra.mxu0 %v2005_v38  ;;  %v3968_v22 = vunpack.i.h.bf16 %v3966_v39  ;;  %v3967_v43 = vunpack.i.l.bf16 %v3966_v39  ;;  %1949 = vmatpush.msrb.mxu1 %v1926_v40 }
 0x374   : > { %1969 = vmatpush.msrb.mxu2 %v1927_v14 }
 0x375   : > { %3794 = vmatmul.msk.f32.vlgmr.msrb.gmra.mxu2 %vm1475_vm8, %v3792_v35  ;;  %v2084_v45 = vsel %vm5004_vm4, %v3967_v43, %v3968_v22  ;;  %v2085_v50 = vsel %vm5006_vm13, %v3968_v22, %v2083_v47 }
 0x376   : > { %2107 = vmatpush.msra.mxu3 %v2084_v45 }
 0x377   : > { %v2004_v46 = vpop.permute.xlu0 %2003  ;;  %3801 = vmatmul.msk.f32.vlgmr.msra.gmra.mxu3 %vm1475_vm8, %v3800_v41 }
 0x378   : > { %v2006_v28 = vsel %vm5005_vm1, %v3963_v33, %v2004_v46  ;;  %2068 = vmatpush.msra.mxu2 %v2004_v46 }
 0x379   : > { %3793 = vmatmul.msk.f32.vlgmr.msrb.gmra.mxu1 %vm1475_vm8, %v3792_v35 }
 0x37a   : > { %2048 = vmatpush.msra.mxu1 %v2006_v28  ;;  %3791 = vmatmul.msk.f32.vlgmr.msrb.gmra.mxu0 %vm1475_vm8, %v3788_v24 }
 0x37b   : > { %2127 = vmatpush.msrb.mxu0 %v2085_v50 }
 0x37c   : > { %2147 = vmatpush.msrb.mxu1 %v2083_v47 }
 0x37d   : > { %3799 = vmatmul.msk.f32.vlgmr.msra.gmra.mxu2 %vm1475_vm8, %v3796_v52 }
 0x37f   : > { %v2159_v37 = vpop.permute.xlu0 %2158 }
 0x381   : > { %3798 = vmatmul.msk.f32.vlgmr.msra.gmra.mxu1 %vm1475_vm8, %v3796_v52 }
 0x382   : > { %3797 = vmatmul.msk.f32.vlgmr.msra.gmra.mxu0 %vm1475_vm8, %v3796_v52 }
 0x389   : > { %3803 = vmatmul.msk.f32.vlgmr.msrb.gmra.mxu1 %vm1475_vm8, %v3800_v41 }
 0x38a   : > { %3802 = vmatmul.msk.f32.vlgmr.msrb.gmra.mxu0 %vm1475_vm8, %v3800_v41 }
 0x3c2   : > { %v1496_v53 = vpop.f32.mrf.mxu3 }
 0x3c3   : > { %v1560_v7 = vadd.f32 %v1559_v55, %v1496_v53 }
 0x3ca   : > { %v1579_v54 = vpop.f32.mrf.mxu3 }
 0x3d2   : > { %v1675_v62 = vpop.f32.mrf.mxu3 }
 0x3d6   : > { %v1536_v57 = vpop.f32.mrf.mxu1 }
 0x3d7   : > { %v1516_v60 = vpop.f32.mrf.mxu0 }
 0x3d8   : > { %v1580_v3 = vadd.f32 %v1579_v54, %v1516_v60 }
 0x3da   : > { %v1655_v63 = vpop.f32.mrf.mxu2  ;;  %v1793_v2 = vpop.f32.mrf.mxu3 }
 0x3db   : > { %v1679_v20 = vadd.f32 %v1655_v63, %v1580_v3 }
 0x3de   : > { %v1635_v0 = vpop.f32.mrf.mxu1 }
 0x3df   : > { %v1599_v1 = vpop.f32.mrf.mxu0  ;;  %v1678_v10 = vadd.f32 %v1635_v0, %v1560_v7 }
 0x3e0   : > { %v1600_v11 = vadd.f32 %v1599_v1, %v1536_v57 }
 0x3e2   : > { %v1754_v15 = vpop.f32.mrf.mxu2  ;;  %v1680_v18 = vadd.f32 %v1675_v62, %v1600_v11 }
 0x3e4   : > { %v1759_v21 = vadd.f32 %v1754_v15, %v1680_v18 }
 0x3e6   : > { %v1734_v4 = vpop.f32.mrf.mxu1 }
 0x3e7   : > { %v1714_v58 = vpop.f32.mrf.mxu0  ;;  %v1758_v23 = vadd.f32 %v1734_v4, %v1679_v20 }
 0x3e8   : > { %v1757_v12 = vadd.f32 %v1714_v58, %v1678_v10 }
 0x3ea   : > { %v1892_v5 = vpop.f32.mrf.mxu3  ;;  %v1872_v8 = vpop.f32.mrf.mxu2  ;;  %v1836_v31 = vadd.f32 %v1793_v2, %v1757_v12 }
 0x3ec   : > { %v1915_v24 = vadd.f32 %v1872_v8, %v1836_v31 }
 0x3ee   : > { %v1833_v56 = vpop.f32.mrf.mxu1 }
 0x3ef   : > { %v1813_v6 = vpop.f32.mrf.mxu0  ;;  %v1838_v51 = vadd.f32 %v1833_v56, %v1759_v21 }
 0x3f0   : > { %v1837_v25 = vadd.f32 %v1813_v6, %v1758_v23 }
 0x3f2   : > { %v1991_v13 = vpop.f32.mrf.mxu3  ;;  %v1916_v35 = vadd.f32 %v1892_v5, %v1837_v25 }
 0x3f6   : > { %v1951_v17 = vpop.f32.mrf.mxu1 }
 0x3f7   : > { %v1912_v19 = vpop.f32.mrf.mxu0  ;;  %v1994_v26 = vadd.f32 %v1951_v17, %v1915_v24 }
 0x3f8   : > { %v1971_v61 = vpop.f32.mrf.mxu2  ;;  %v1917_v9 = vadd.f32 %v1912_v19, %v1838_v51 }
 0x3f9   : > { %v1995_v39 = vadd.f32 %v1971_v61, %v1916_v35 }
 0x3fa   : > { %v2109_v33 = vpop.f32.mrf.mxu3  ;;  %v1996_v38 = vadd.f32 %v1991_v13, %v1917_v9 }
 0x3fe   : > { %v2050_v27 = vpop.f32.mrf.mxu1 }
 0x3ff   : > { %v2030_v29 = vpop.f32.mrf.mxu0  ;;  %v2074_v22 = vadd.f32 %v2050_v27, %v1995_v39 }
 0x400   : > { %v2073_v34 = vadd.f32 %v2030_v29, %v1994_v26  ;;  %v2070_v30 = vpop.f32.mrf.mxu2 }
 0x401   : > { %v2075_v14 = vadd.f32 %v2070_v30, %v1996_v38 }
 0x402   : > { %v2152_v36 = vadd.f32 %v2109_v33, %v2073_v34 }
 0x404   : > { %v4546_v40 = vadd.f32 %v2159_v37, %v2152_v36 }
 0x406   : > { %v2164_v43 = vmin.f32 %v4546_v40, 20.0  ;;  %v2149_v41 = vpop.f32.mrf.mxu1 }
 0x407   : > { %v2154_v45 = vadd.f32 %v2149_v41, %v2075_v14  ;;  %v2129_v46 = vpop.f32.mrf.mxu0 }
 0x408   : > { %v2167_v28 = vmul.f32 1.442695, %v2164_v43  ;;  %v2153_v47 = vadd.f32 %v2129_v46, %v2074_v22 }
 0x409   : > { %v4549_v50 = vadd.f32 %v2159_v37, %v2154_v45 }
 0x40a   : > { %4037 = vpow2.f32 %v2167_v28  ;;  %v4551_v52 = vadd.f32 %v2159_v37, %v2153_v47 }
 0x40b   : > { %v2166_v53 = vmin.f32 %v4549_v50, 20.0 }
 0x40c   : > { %v2165_v54 = vmin.f32 %v4551_v52, 20.0 }
 0x40d   : > { %v2171_v55 = vmul.f32 1.442695, %v2166_v53 }
 0x40e   : > { %v2169_v57 = vmul.f32 1.442695, %v2165_v54 }
 0x40f   : > { %4039 = vpow2.f32 %v2171_v55 }
 0x410   : > { %v4038_v60 = vpop.eup %4037  ;;  %4041 = vpow2.f32 %v2169_v57 }
 0x411   : > { %v2173_v62 = vadd.f32 2.0, %v4038_v60 }
 0x413   : > { %v2176_v63 = vmul.f32 %v4038_v60, %v2173_v62 }
 0x415   : > { %v4040_v0 = vpop.eup %4039  ;;  %v2179_v1 = vadd.f32 2.0, %v2176_v63 }
 0x416   : > { %v4042_v2 = vpop.eup %4041  ;;  %v2175_v15 = vadd.f32 2.0, %v4040_v0 }
 0x417   : > { %v2174_v4 = vadd.f32 2.0, %v4042_v2  ;;  %4043 = vrcp.f32 %v2179_v1  ;;  %vm2187_vm8 = vweird.f32 %v2179_v1  ;;  %v2193_v25 = vand.u32 2147483648, %v2179_v1 }
 0x418   : > { %v2178_v58 = vmul.f32 %v4040_v0, %v2175_v15  ;;  %v2191_v9 = vand.u32 2147483647, %v2179_v1 }
 0x419   : > { %v2177_v5 = vmul.f32 %v4042_v2, %v2174_v4  ;;  %v2194_v38 = vor.u32 1.1754944e-38, %v2193_v25  ;;  %v3977_v2 = vpop.permute.xlu0 %3976 }
 0x41a   : > { %v2181_v56 = vadd.f32 2.0, %v2178_v58 }
 0x41b   : > { %v2180_v6 = vadd.f32 2.0, %v2177_v5 }
 0x41c   : > { %4045 = vrcp.f32 %v2181_v56  ;;  %v2221_v19 = vand.u32 2147483647, %v2181_v56  ;;  %v2223_v31 = vand.u32 2147483648, %v2181_v56  ;;  %vm2217_vm1 = vweird.f32 %v2181_v56 }
 0x41d   : > { %v4044_v7 = vpop.eup %4043  ;;  %4047 = vrcp.f32 %v2180_v6  ;;  %v2208_v21 = vand.u32 2147483648, %v2180_v6  ;;  %v2206_v51 = vand.u32 2147483647, %v2180_v6  ;;  %vm2202_vm15 = vweird.f32 %v2180_v6 }
 0x41e   : > { %v2183_v8 = vmul.f32 %v4044_v7, %v2179_v1  ;;  %vm2188_vm5 = vweird.f32 %v4044_v7  ;;  %v2224_v29 = vor.u32 1.1754944e-38, %v2223_v31  ;;  %vm2222_vm14 = vcmp.eq.f32.partialorder %v2221_v19, 8.507059e+37  ;;  %v3074_v1 = vld [vmem:[%s4976_s6] sm:$0xf] }
 0x41f   : > { %vm4556_vm13 = vmor %vm2187_vm8, %vm2188_vm5  ;;  %v2209_v35 = vor.u32 1.1754944e-38, %v2208_v21  ;;  %vm2207_vm12 = vcmp.eq.f32.partialorder %v2206_v51, 8.507059e+37  ;;  %vm2192_vm8 = vcmp.eq.f32.partialorder %v2191_v9, 8.507059e+37 }
 0x420   : > { %v2184_v10 = vsub.f32 1.0, %v2183_v8 }
 0x421   : > { %v2270_v4 = vpop.permute.xlu0 %2269 }
 0x422   : > { %v4046_v11 = vpop.eup %4045  ;;  %v2185_v3 = vmul.f32 %v4044_v7, %v2184_v10 }
 0x423   : > { %v4048_v12 = vpop.eup %4047  ;;  %v2213_v13 = vmul.f32 %v4046_v11, %v2181_v56  ;;  %vm2218_vm3 = vweird.f32 %v4046_v11 }
 0x424   : > { %v2198_v17 = vmul.f32 %v4048_v12, %v2180_v6  ;;  %v2186_v23 = vadd.f32 %v4044_v7, %v2185_v3  ;;  %vm2203_vm4 = vweird.f32 %v4048_v12  ;;  %vm2219_vm7 = vmor %vm2217_vm1, %vm2218_vm3  ;;  %v3804_v3 = vld [vmem:[%s4975_s5 + $0x4] sm:$0xf]  ;;  %vm5016_vm1 = vcmask 900096  }
 0x425   : > { %v2214_v18 = vsub.f32 1.0, %v2213_v13  ;;  %vm2204_vm9 = vmor %vm2202_vm15, %vm2203_vm4 }
 0x426   : > { %v2199_v61 = vsub.f32 1.0, %v2198_v17  ;;  %v2190_v30 = vsel %vm4556_vm13, %v4044_v7, %v2186_v23  ;;  %v3979_v17 = vunpack.i.h.bf16 %v3977_v2 }
 0x427   : > { %v2215_v20 = vmul.f32 %v4046_v11, %v2214_v18  ;;  %v2195_v43 = vsel %vm2192_vm8, %v2194_v38, %v2190_v30  ;;  %v3978_v18 = vunpack.i.l.bf16 %v3977_v2 }
 0x428   : > { %v2200_v24 = vmul.f32 %v4048_v12, %v2199_v61  ;;  %v2196_v28 = vmul.f32 %v2195_v43, %v2176_v63 }
 0x429   : > { %v2216_v26 = vadd.f32 %v4046_v11, %v2215_v20  ;;  %v4664_v56 = vpop.permute.xlu0 %2615  ;;  %v2437_v51 = vsel %vm782_vm11, %v3978_v18, %v3979_v17 }
 0x42a   : > { %v2201_v33 = vadd.f32 %v4048_v12, %v2200_v24  ;;  %v2227_v53 = vmul.f32 %v2196_v28, %v4546_v40  ;;  %v4584_v40 = vpop.permute.xlu2 %3971  ;;  %v3817_v24 = vld [vmem:[%s4975_s5 + $0x8] sm:$0xf] }
 0x42b   : > { %v2220_v34 = vsel %vm2219_vm7, %v4046_v11, %v2216_v26  ;;  %vm2284_vm7 = vcmask 97280   ;;  %v3974_v25 = vunpack.i.h.bf16 %v4584_v40  ;;  %v3973_v26 = vunpack.i.l.bf16 %v4584_v40 }
 0x42c   : > { %v2225_v36 = vsel %vm2222_vm14, %v2224_v29, %v2220_v34  ;;  %v2205_v37 = vsel %vm2204_vm9, %v4048_v12, %v2201_v33  ;;  %v2230_v54 = vsel %vm4385_vm2, %v2227_v53, 0.0  ;;  %vm5009_vm9 = vcmask 412672  }
 0x42d   : > { %v2226_v39 = vmul.f32 %v2225_v36, %v2178_v58  ;;  %v2210_v14 = vsel %vm2207_vm12, %v2209_v35, %v2205_v37  ;;  %vm5010_vm12 = vcmask 1043608   ;;  %vm5011_vm14 = vcmask 1043456  }
 0x42e   : > { %v2211_v22 = vmul.f32 %v2210_v14, %v2177_v5  ;;  %v4660_v5 = vld [vmem:[%s4975_s5] sm:$0xf]  ;;  %vm5012_vm15 = vmmov %vm5011_vm14  ;;  %v3824_v14 = vld [vmem:[%s4975_s5 + $0xc] sm:$0xf] }
 0x42f   : > { %v2229_v41 = vmul.f32 %v2226_v39, %v4549_v50  ;;  %vm5013_vm5 = vmmov %vm5011_vm14 }
 0x430   : > { %v2228_v45 = vmul.f32 %v2211_v22, %v4551_v52  ;;  %vm5014_vm3 = vmmov %vm5013_vm5 }
 0x431   : > { %v2232_v46 = vsel %vm4405_vm6, %v2229_v41, 0.0  ;;  %vm5015_vm4 = vmmov %vm5014_vm3 }
 0x432   : > { %2240 = vrot.lane.b32.xlu1 %v2232_v46, %s4069_s15  ;;  %v2231_v47 = vsel %vm4396_vm10, %v2228_v45, 0.0  ;;  %vm5019_vm8 = vmmov %vm5014_vm3 }
 0x433   : > { %2238 = vrot.lane.b32.xlu2 %v2231_v47, %s4069_s15 }
 0x43a   : > { %2236 = vrot.lane.b32.xlu1 %v2230_v54, %s4069_s15 }
 0x43b   : > { %2429 = vrot.lane.b32.xlu2 %v4430_v59, %s4087_s16 }
 0x442   : > { %3981 = vrot.lane.b32.xlu1 %v4424_v49, %s4088_s17 }
 0x443   : > { %3986 = vrot.lane.b32.xlu2 %v4424_v49, %s4089_s18 }
 0x44a   : > { %2522 = vrot.lane.b32.xlu1 %v4430_v59, %s4088_s17 }
 0x44b   : > { %2704 = vrot.lane.b32.xlu2 %v4414_v44, %s4090_s19 }
 0x48d   : > { %v2239_v50 = vpop.permute.xlu2 %2238 }
 0x4a4   : > { %v2241_v52 = vpop.permute.xlu1 %2240 }
 0x4a5   : > { %v2243_v55 = vsel %vm333_vm0, %v2239_v50, %v2241_v52 }
 0x4a6   : > { %2249 = vst.msk [vmem:[#allocation2 + $0x28] sm:$0xf] %vm5009_vm9, %v2243_v55  ;;  %vm5020_vm9 = vmmov %vm5014_vm3 }
 0x4ac   : > { %v2237_v57 = vpop.permute.xlu1 %2236 }
 0x4ad   : > { %v2242_v60 = vsel %vm333_vm0, %v2237_v57, %v2239_v50  ;;  %2247 = vst.msk [vmem:[#allocation2 + $0x18] sm:$0xf] %vm5010_vm12, %v2237_v57  ;;  %v4590_v62 = vld [vmem:[#allocation2 + $0x28] sm:$0xf]  ;;  %vm5021_vm12 = vmmov %vm5014_vm3 }
 0x4ae   : > { %2248 = vst [vmem:[#allocation2 + $0x20] sm:$0xf] %v2242_v60  ;;  %2435 = vrot.lane.b32.xlu0 %v4590_v62, %s4087_s16  ;;  %2275 = vrot.lane.b32.xlu1 %v4590_v62, %s4086_s13 }
 0x4b4   : > { %v2253_v63 = vld [vmem:[#allocation2 + $0x18] sm:$0xf]  ;;  %v4666_v6 = vpop.permute.xlu1 %3981 }
 0x4b5   : > { %2271 = vrot.lane.b32.xlu2 %v2253_v63, %s4086_s13  ;;  %3811 = vmatpush.msk.msra.mxu1 %vm5011_vm14, %v2253_v63  ;;  %v4603_v0 = vld [vmem:[#allocation2 + $0x20] sm:$0xf]  ;;  %v3984_v9 = vunpack.i.h.bf16 %v4666_v6  ;;  %vm5022_vm14 = vmmov %vm5016_vm1  ;;  %v3983_v39 = vunpack.i.l.bf16 %v4666_v6 }
 0x4b6   : > { %2528 = vrot.lane.b32.xlu0 %v4590_v62, %s4088_s17  ;;  %2431 = vrot.lane.b32.xlu1 %v2253_v63, %s4087_s16 }
 0x4b7   : > { %2378 = vmatpush.msra.mxu1 %v4414_v44  ;;  %v4641_v44 = vpop.permute.xlu2 %2429 }
 0x4b8   : > { %3812 = vmatmul.msk.f32.vlgmr.msra.gmra.mxu1 %vm2284_vm7, %v4660_v5  ;;  %v2438_v23 = vsel %vm782_vm11, %v3979_v17, %v4641_v44 }
 0x4bc   : > { %v2523_v10 = vpop.permute.xlu1 %2522 }
 0x4bd   : > { %2617 = vrot.lane.b32.xlu2 %v2253_v63, %s4089_s18  ;;  %v2531_v36 = vsel %vm5022_vm14, %v3984_v9, %v2523_v10 }
 0x4be   : > { %2524 = vrot.lane.b32.xlu1 %v2253_v63, %s4088_s17  ;;  %2273 = vrot.lane.b32.xlu0 %v4603_v0, %s4086_s13  ;;  %s4099_s13 = smov 58  }
 0x4bf   : > { %v4649_v15 = vpop.permute.xlu2 %3986 }
 0x4c0   : > { %v3989_v47 = vunpack.i.h.bf16 %v4649_v15  ;;  %v3988_v53 = vunpack.i.l.bf16 %v4649_v15  ;;  %v3838_v15 = vld [vmem:[%s4975_s5 + $0x14] sm:$0xf] }
 0x4c5   : > { %2714 = vrot.lane.b32.xlu2 %v4590_v62, %s4090_s19 }
 0x4c6   : > { %2621 = vrot.lane.b32.xlu1 %v4590_v62, %s4089_s18  ;;  %2803 = vrot.lane.b32.xlu0 %v2253_v63, %s4091_s20 }
 0x4c7   : > { %v4655_v58 = vpop.permute.xlu2 %2704 }
 0x4cd   : > { %2433 = vrot.lane.b32.xlu2 %v4603_v0, %s4087_s16  ;;  %s4100_s16 = smov 114  }
 0x4ce   : > { %2710 = vrot.lane.b32.xlu1 %v2253_v63, %s4090_s19  ;;  %2896 = vrot.lane.b32.xlu0 %v2253_v63, %s4092_s21 }
 0x4d5   : > { %2526 = vrot.lane.b32.xlu2 %v4603_v0, %s4088_s17 }
 0x4d6   : > { %2801 = vrot.lane.b32.xlu1 %v4430_v59, %s4091_s20  ;;  %2619 = vrot.lane.b32.xlu0 %v4603_v0, %s4089_s18 }
 0x4dd   : > { %3996 = vrot.lane.b32.xlu2 %v4424_v49, %s4091_s20 }
 0x4de   : > { %2712 = vrot.lane.b32.xlu1 %v4603_v0, %s4090_s19  ;;  %4001 = vrot.lane.b32.xlu0 %v4424_v49, %s4092_s21  ;;  %s4101_s19 = smov 76  }
 0x4e5   : > { %2807 = vrot.lane.b32.xlu2 %v4590_v62, %s4091_s20 }
 0x4e6   : > { %2805 = vrot.lane.b32.xlu1 %v4603_v0, %s4091_s20  ;;  %2894 = vrot.lane.b32.xlu0 %v4430_v59, %s4092_s21 }
 0x4ed   : > { %2900 = vrot.lane.b32.xlu2 %v4590_v62, %s4092_s21 }
 0x4ee   : > { %2898 = vrot.lane.b32.xlu1 %v4603_v0, %s4092_s21  ;;  %2993 = vrot.lane.b32.xlu0 %v4590_v62, %s4093_s22  ;;  %s4102_s21 = smov 94  }
 0x4f5   : > { %2991 = vrot.lane.b32.xlu2 %v4603_v0, %s4093_s22 }
 0x4f6   : > { %2989 = vrot.lane.b32.xlu1 %v2253_v63, %s4093_s22  ;;  %3077 = vperm.xlu0 %3969, %v3074_v1  }
 0x4fd   : > { %2987 = vrot.lane.b32.xlu2 %v4430_v59, %s4093_s22 }
 0x4fe   : > { %4006 = vrot.lane.b32.xlu1 %v4424_v49, %s4093_s22  ;;  %v4670_v49 = vpop.permute.xlu0 %3991  ;;  %s4104_s22 = smov 56  }
 0x4ff   : > { %v3993_v63 = vunpack.i.l.bf16 %v4670_v49 }
 0x50f   : > { %v2272_v7 = vpop.permute.xlu2 %2271 }
 0x517   : > { %v4668_v8 = vpop.permute.xlu2 %2617 }
 0x51f   : > { %v4672_v11 = vpop.permute.xlu2 %2714 }
 0x520   : > { %v2436_v12 = vpop.permute.xlu0 %2435  ;;  %v2276_v13 = vpop.permute.xlu1 %2275 }
 0x521   : > { %3809 = vmatpush.msk.msra.mxu0 %vm5012_vm15, %v2276_v13 }
 0x523   : > { %2349 = vmatpush.msra.mxu0 %v2270_v4 }
 0x524   : > { %3810 = vmatmul.msk.f32.vlgmr.msra.gmra.mxu0 %vm2284_vm7, %v3804_v3 }
 0x527   : > { %v2434_v19 = vpop.permute.xlu2 %2433 }
 0x528   : > { %v2440_v31 = vsel %vm782_vm11, %v2434_v19, %v2436_v12  ;;  %v2529_v61 = vpop.permute.xlu0 %2528  ;;  %v2432_v20 = vpop.permute.xlu1 %2431 }
 0x529   : > { %v2439_v21 = vsel %vm782_vm11, %v2432_v20, %v2434_v19  ;;  %3820 = vmatpush.msk.msrb.mxu1 %vm5013_vm5, %v2440_v31  ;;  %vm5017_vm11 = vcmask 1039360  }
 0x52a   : > { %3818 = vmatpush.msk.msrb.mxu0 %vm5014_vm3, %v2439_v21  ;;  %vm5018_vm13 = vmmov %vm5017_vm11  ;;  %v3852_v21 = vld [vmem:[%s4975_s5 + $0x1c] sm:$0xf] }
 0x52b   : > { %2488 = vmatpush.msrb.mxu1 %v2438_v23  ;;  %vm5023_vm15 = vmmov %vm5017_vm11 }
 0x52c   : > { %2468 = vmatpush.msrb.mxu0 %v2437_v51  ;;  %3821 = vmatmul.msk.f32.vlgmr.msrb.gmra.mxu1 %vm2284_vm7, %v3817_v24  ;;  %v2277_v37 = vsel %vm5023_vm15, %v3973_v26, %v3974_v25  ;;  %vm5024_vm5 = vmmov %vm5017_vm11 }
 0x52d   : > { %3829 = vmatpush.msk.msra.mxu1 %vm5015_vm4, %v2529_v61  ;;  %3819 = vmatmul.msk.f32.vlgmr.msrb.gmra.mxu0 %vm2284_vm7, %v3817_v24  ;;  %v2278_v38 = vsel %vm5024_vm5, %v3974_v25, %v2270_v4  ;;  %vm5025_vm4 = vmmov %vm5014_vm3 }
 0x52e   : > { %vm5032_vm15 = vmmov %vm5014_vm3 }
 0x52f   : > { %2601 = vmatpush.msra.mxu1 %v2523_v10  ;;  %v2527_v27 = vpop.permute.xlu2 %2526  ;;  %vm5033_vm5 = vmmov %vm5014_vm3 }
 0x530   : > { %v2533_v29 = vsel %vm5016_vm1, %v2527_v27, %v2529_v61  ;;  %v2274_v33 = vpop.permute.xlu0 %2273  ;;  %v2525_v34 = vpop.permute.xlu1 %2524 }
 0x531   : > { %v2279_v35 = vsel %vm5017_vm11, %v2272_v7, %v2274_v33  ;;  %v2280_v30 = vsel %vm5018_vm13, %v2274_v33, %v2276_v13  ;;  %3827 = vmatpush.msk.msra.mxu0 %vm5019_vm8, %v2533_v29  ;;  %v2532_v22 = vsel %vm5016_vm1, %v2525_v34, %v2527_v27  ;;  %vm5026_vm11 = vmmov %vm5014_vm3 }
 0x532   : > { %3805 = vmatpush.msk.msrb.mxu2 %vm5020_vm9, %v2279_v35  ;;  %3807 = vmatpush.msk.msrb.mxu3 %vm5021_vm12, %v2280_v30  ;;  %vm5027_vm13 = vmmov %vm5014_vm3  ;;  %vm5030_vm12 = vcmask 891904  }
 0x533   : > { %2581 = vmatpush.msra.mxu0 %v2531_v36  ;;  %vm5028_vm8 = vmmov %vm5014_vm3 }
 0x534   : > { %2309 = vmatpush.msrb.mxu2 %v2277_v37  ;;  %2329 = vmatpush.msrb.mxu3 %v2278_v38  ;;  %vm5029_vm9 = vmmov %vm5016_vm1 }
 0x535   : > { %3806 = vmatmul.msk.f32.vlgmr.msrb.gmra.mxu2 %vm2284_vm7, %v3804_v3  ;;  %3808 = vmatmul.msk.f32.vlgmr.msrb.gmra.mxu3 %vm2284_vm7, %v3804_v3  ;;  %v2530_v45 = vsel %vm5029_vm9, %v3983_v39, %v3984_v9  ;;  %vm5031_vm14 = vmmov %vm5030_vm12  ;;  %v3859_v9 = vld [vmem:[%s4975_s5 + $0x20] sm:$0xf]  ;;  %v2380_v37 = vpop.f32.mrf.mxu1 }
 0x536   : > { %3813 = vmatpush.msk.msra.mxu2 %vm5014_vm3, %v4603_v0  ;;  %3815 = vmatpush.msk.msra.mxu3 %vm5025_vm4, %v4590_v62  ;;  %vm5034_vm3 = vmmov %vm5030_vm12  ;;  %v3994_v62 = vunpack.i.h.bf16 %v4670_v49 }
 0x537   : > { %3828 = vmatmul.msk.f32.vlgmr.msra.gmra.mxu0 %vm2284_vm7, %v3824_v14  ;;  %3830 = vmatmul.msk.f32.vlgmr.msra.gmra.mxu1 %vm2284_vm7, %v3824_v14  ;;  %v2623_v57 = vsel %vm5034_vm3, %v3988_v53, %v3989_v47  ;;  %vm5035_vm4 = vmmov %vm5034_vm3 }
 0x538   : > { %2398 = vmatpush.msra.mxu2 %v4420_v48  ;;  %2418 = vmatpush.msra.mxu3 %v4430_v59  ;;  %v2804_v43 = vpop.permute.xlu0 %2803  ;;  %v2622_v41 = vpop.permute.xlu1 %2621  ;;  %v3831_v48 = vld [vmem:[%s4975_s5 + $0x10] sm:$0xf]  ;;  %v2624_v60 = vsel %vm5035_vm4, %v3989_v47, %v4664_v56  ;;  %vm5036_vm1 = vmmov %vm5033_vm5 }
 0x539   : > { %3836 = vmatpush.msk.msrb.mxu0 %vm5028_vm8, %v2622_v41  ;;  %v3997_v59 = vpop.permute.xlu2 %3996  ;;  %vm5039_vm8 = vmmov %vm5036_vm1 }
 0x53a   : > { %3822 = vmatpush.msk.msrb.mxu2 %vm5026_vm11, %v2436_v12  ;;  %3825 = vmatpush.msk.msrb.mxu3 %vm5027_vm13, %v2532_v22  ;;  %vm5037_vm11 = vcmask 883712   ;;  %vm5040_vm9 = vmmov %vm5036_vm1  ;;  %v3999_v6 = vunpack.i.h.bf16 %v3997_v59  ;;  %v3998_v7 = vunpack.i.l.bf16 %v3997_v59 }
 0x53b   : > { %2694 = vmatpush.msrb.mxu0 %v4664_v56  ;;  %vm5038_vm13 = vmmov %vm5037_vm11 }
 0x53c   : > { %2508 = vmatpush.msrb.mxu2 %v4641_v44  ;;  %2561 = vmatpush.msrb.mxu3 %v2530_v45  ;;  %vm5046_vm4 = vmmov %vm5036_vm1 }
 0x53d   : > { %3814 = vmatmul.msk.f32.vlgmr.msra.gmra.mxu2 %vm2284_vm7, %v4660_v5  ;;  %3816 = vmatmul.msk.f32.vlgmr.msra.gmra.mxu3 %vm2284_vm7, %v4660_v5 }
 0x53f   : > { %3837 = vmatmul.msk.f32.vlgmr.msrb.gmra.mxu0 %vm2284_vm7, %v3831_v48 }
 0x540   : > { %v4733_v46 = vpop.permute.xlu0 %2896  ;;  %v2711_v28 = vpop.permute.xlu1 %2710 }
 0x541   : > { %v2808_v55 = vpop.permute.xlu2 %2807 }
 0x545   : > { %3823 = vmatmul.msk.f32.vlgmr.msrb.gmra.mxu2 %vm2284_vm7, %v3817_v24  ;;  %3826 = vmatmul.msk.f32.vlgmr.msrb.gmra.mxu3 %vm2284_vm7, %v3824_v14 }
 0x548   : > { %v2620_v54 = vpop.permute.xlu0 %2619  ;;  %v2802_v40 = vpop.permute.xlu1 %2801 }
 0x549   : > { %v2625_v50 = vsel %vm5030_vm12, %v4668_v8, %v2620_v54  ;;  %v2626_v52 = vsel %vm5031_vm14, %v2620_v54, %v2622_v41  ;;  %vm5041_vm12 = vmmov %vm5037_vm11  ;;  %v2901_v56 = vpop.permute.xlu2 %2900 }
 0x54a   : > { %3832 = vmatpush.msk.msra.mxu2 %vm5032_vm15, %v2625_v50  ;;  %3834 = vmatpush.msk.msra.mxu3 %vm5033_vm5, %v2626_v52  ;;  %v2716_v4 = vsel %vm5041_vm12, %v4655_v58, %v3993_v63  ;;  %vm5042_vm14 = vmmov %vm5037_vm11  ;;  %vm5044_vm5 = vcmask 752640  }
 0x54b   : > { %v2717_v5 = vsel %vm5042_vm14, %v3993_v63, %v3994_v62  ;;  %vm5043_vm15 = vmmov %vm5036_vm1 }
 0x54c   : > { %2654 = vmatpush.msra.mxu2 %v2623_v57  ;;  %2674 = vmatpush.msra.mxu3 %v2624_v60  ;;  %vm5045_vm3 = vmmov %vm5044_vm5 }
 0x54d   : > { %3833 = vmatmul.msk.f32.vlgmr.msra.gmra.mxu2 %vm2284_vm7, %v3831_v48  ;;  %3835 = vmatmul.msk.f32.vlgmr.msra.gmra.mxu3 %vm2284_vm7, %v3831_v48  ;;  %vm5052_vm14 = vmmov %vm5036_vm1 }
 0x54e   : > { %3843 = vmatpush.msk.msrb.mxu3 %vm5036_vm1, %v4672_v11 }
 0x550   : > { %2787 = vmatpush.msrb.mxu3 %v3994_v62  ;;  %v4002_v0 = vpop.permute.xlu0 %4001  ;;  %v2713_v44 = vpop.permute.xlu1 %2712 }
 0x551   : > { %v2718_v1 = vsel %vm5037_vm11, %v2711_v28, %v2713_v44  ;;  %v2719_v2 = vsel %vm5038_vm13, %v2713_v44, %v4672_v11  ;;  %v3845_v11 = vld [vmem:[%s4975_s5 + $0x18] sm:$0xf]  ;;  %vm5047_vm11 = vmmov %vm5045_vm3  ;;  %v2992_v3 = vpop.permute.xlu2 %2991  ;;  %v4004_v17 = vunpack.i.h.bf16 %v4002_v0  ;;  %v4003_v18 = vunpack.i.l.bf16 %v4002_v0 }
 0x552   : > { %3839 = vmatpush.msk.msrb.mxu1 %vm5039_vm8, %v2718_v1  ;;  %3841 = vmatpush.msk.msrb.mxu2 %vm5040_vm9, %v2719_v2  ;;  %v2809_v12 = vsel %vm5047_vm11, %v3998_v7, %v3999_v6  ;;  %vm5048_vm13 = vmmov %vm5045_vm3  ;;  %vm5050_vm9 = vcmask 744448  }
 0x553   : > { %v2810_v13 = vsel %vm5048_vm13, %v3999_v6, %v2802_v40  ;;  %vm5049_vm8 = vmmov %vm5036_vm1 }
 0x554   : > { %2747 = vmatpush.msrb.mxu1 %v2716_v4  ;;  %2767 = vmatpush.msrb.mxu2 %v2717_v5  ;;  %vm5051_vm12 = vmmov %vm5050_vm9 }
 0x555   : > { %3840 = vmatmul.msk.f32.vlgmr.msrb.gmra.mxu1 %vm2284_vm7, %v3838_v15  ;;  %3842 = vmatmul.msk.f32.vlgmr.msrb.gmra.mxu2 %vm2284_vm7, %v3838_v15  ;;  %vm5057_vm11 = vmmov %vm5036_vm1 }
 0x556   : > { %3844 = vmatmul.msk.f32.vlgmr.msrb.gmra.mxu3 %vm2284_vm7, %v3838_v15  ;;  %3850 = vmatpush.msk.msra.mxu2 %vm5043_vm15, %v2808_v55  ;;  %vm5053_vm15 = vmmov %vm5036_vm1 }
 0x558   : > { %2880 = vmatpush.msra.mxu2 %v2802_v40  ;;  %v2895_v8 = vpop.permute.xlu0 %2894  ;;  %v2806_v49 = vpop.permute.xlu1 %2805 }
 0x559   : > { %v2811_v58 = vsel %vm5044_vm5, %v2804_v43, %v2806_v49  ;;  %v2812_v10 = vsel %vm5045_vm3, %v2806_v49, %v2808_v55  ;;  %vm5054_vm5 = vmmov %vm5050_vm9  ;;  %v2988_v25 = vpop.permute.xlu2 %2987 }
 0x55a   : > { %3846 = vmatpush.msk.msra.mxu0 %vm5046_vm4, %v2811_v58  ;;  %3848 = vmatpush.msk.msra.mxu1 %vm5036_vm1, %v2812_v10  ;;  %v2902_v23 = vsel %vm5054_vm5, %v4003_v18, %v4004_v17  ;;  %vm5055_vm3 = vmmov %vm5054_vm5  ;;  %vm5056_vm4 = vcmask 736256  }
 0x55b   : > { %v2903_v24 = vsel %vm5055_vm3, %v4004_v17, %v2895_v8  ;;  %vm5058_vm13 = vmmov %vm5056_vm4 }
 0x55c   : > { %2840 = vmatpush.msra.mxu0 %v2809_v12  ;;  %2860 = vmatpush.msra.mxu1 %v2810_v13 }
 0x55d   : > { %3847 = vmatmul.msk.f32.vlgmr.msra.gmra.mxu0 %vm2284_vm7, %v3845_v11  ;;  %3849 = vmatmul.msk.f32.vlgmr.msra.gmra.mxu1 %vm2284_vm7, %v3845_v11 }
 0x55e   : > { %3851 = vmatmul.msk.f32.vlgmr.msra.gmra.mxu2 %vm2284_vm7, %v3845_v11  ;;  %3857 = vmatpush.msk.msrb.mxu1 %vm5049_vm8, %v2901_v56  ;;  %vm5059_vm8 = vmmov %vm5036_vm1 }
 0x560   : > { %2973 = vmatpush.msrb.mxu1 %v2895_v8  ;;  %v2899_v19 = vpop.permute.xlu1 %2898  ;;  %v2994_v20 = vpop.permute.xlu0 %2993 }
 0x561   : > { %v2904_v31 = vsel %vm5050_vm9, %v4733_v46, %v2899_v19  ;;  %v2905_v61 = vsel %vm5051_vm12, %v2899_v19, %v2901_v56  ;;  %v2998_v51 = vsel %vm5056_vm4, %v2992_v3, %v2994_v20  ;;  %vm5060_vm9 = vmmov %vm5056_vm4 }
 0x562   : > { %3853 = vmatpush.msk.msra.mxu3 %vm5052_vm14, %v2904_v31  ;;  %3855 = vmatpush.msk.msrb.mxu0 %vm5053_vm15, %v2905_v61  ;;  %vm5061_vm12 = vmmov %vm5056_vm4 }
 0x564   : > { %2933 = vmatpush.msra.mxu3 %v2902_v23  ;;  %2953 = vmatpush.msrb.mxu0 %v2903_v24 }
 0x565   : > { %3854 = vmatmul.msk.f32.vlgmr.msra.gmra.mxu3 %vm2284_vm7, %v3852_v21  ;;  %3856 = vmatmul.msk.f32.vlgmr.msrb.gmra.mxu0 %vm2284_vm7, %v3852_v21 }
 0x566   : > { %3858 = vmatmul.msk.f32.vlgmr.msrb.gmra.mxu1 %vm2284_vm7, %v3852_v21  ;;  %3862 = vmatpush.msk.msrb.mxu3 %vm5036_vm1, %v2998_v51 }
 0x567   : > { %3864 = vmatpush.msk.msra.mxu0 %vm5057_vm11, %v2994_v20 }
 0x568   : > { %v2990_v26 = vpop.permute.xlu1 %2989  ;;  %v3078_v10 = vpop.permute.xlu0 %3077 }
 0x569   : > { %3066 = vmatpush.msra.mxu0 %v2988_v25  ;;  %v2997_v27 = vsel %vm5058_vm13, %v2990_v26, %v2992_v3 }
 0x56a   : > { %3860 = vmatpush.msk.msrb.mxu2 %vm5059_vm8, %v2997_v27 }
 0x56d   : > { %3865 = vmatmul.msk.f32.vlgmr.msra.gmra.mxu0 %vm2284_vm7, %v3859_v9 }
 0x570   : > { %v4007_v29 = vpop.permute.xlu1 %4006 }
 0x571   : > { %v4009_v33 = vunpack.i.h.bf16 %v4007_v29  ;;  %v4008_v34 = vunpack.i.l.bf16 %v4007_v29 }
 0x573   : > { %v2995_v35 = vsel %vm5060_vm9, %v4008_v34, %v4009_v33  ;;  %v2996_v30 = vsel %vm5061_vm12, %v4009_v33, %v2988_v25  ;;  %vm5062_vm12 = vcmask 416772  }
 0x574   : > { %3026 = vmatpush.msrb.mxu2 %v2995_v35  ;;  %3046 = vmatpush.msrb.mxu3 %v2996_v30 }
 0x575   : > { %3861 = vmatmul.msk.f32.vlgmr.msrb.gmra.mxu2 %vm2284_vm7, %v3859_v9  ;;  %3863 = vmatmul.msk.f32.vlgmr.msrb.gmra.mxu3 %vm2284_vm7, %v3859_v9 }
 0x5a1   : > { %v2351_v36 = vpop.f32.mrf.mxu0 }
 0x5a9   : > { %v2490_v22 = vpop.f32.mrf.mxu1 }
 0x5aa   : > { %v2470_v14 = vpop.f32.mrf.mxu0 }
 0x5b4   : > { %v2583_v45 = vpop.f32.mrf.mxu0  ;;  %v2603_v59 = vpop.f32.mrf.mxu1 }
 0x5b8   : > { %v2311_v38 = vpop.f32.mrf.mxu2  ;;  %v2331_v39 = vpop.f32.mrf.mxu3 }
 0x5b9   : > { %v2381_v15 = vadd.f32 %v2380_v37, %v2311_v38 }
 0x5bb   : > { %v2513_v6 = vadd.f32 %v2470_v14, %v2381_v15 }
 0x5bc   : > { %v2696_v47 = vpop.f32.mrf.mxu0 }
 0x5c0   : > { %v2400_v43 = vpop.f32.mrf.mxu2  ;;  %v2420_v41 = vpop.f32.mrf.mxu3 }
 0x5c1   : > { %v2421_v54 = vadd.f32 %v2420_v41, %v2351_v36  ;;  %v2401_v1 = vadd.f32 %v2400_v43, %v2331_v39 }
 0x5c3   : > { %v2514_v56 = vadd.f32 %v2490_v22, %v2401_v1 }
 0x5c5   : > { %v2607_v49 = vadd.f32 %v2583_v45, %v2514_v56 }
 0x5c8   : > { %v2510_v48 = vpop.f32.mrf.mxu2  ;;  %v2563_v46 = vpop.f32.mrf.mxu3 }
 0x5c9   : > { %v2515_v52 = vadd.f32 %v2510_v48, %v2421_v54  ;;  %v2606_v11 = vadd.f32 %v2563_v46, %v2513_v6 }
 0x5cb   : > { %v2608_v60 = vadd.f32 %v2603_v59, %v2515_v52 }
 0x5cd   : > { %v2701_v63 = vadd.f32 %v2696_v47, %v2608_v60 }
 0x5d0   : > { %v2656_v28 = vpop.f32.mrf.mxu2  ;;  %v2676_v40 = vpop.f32.mrf.mxu3 }
 0x5d1   : > { %v2699_v13 = vadd.f32 %v2656_v28, %v2606_v11  ;;  %v2700_v3 = vadd.f32 %v2676_v40, %v2607_v49 }
 0x5d2   : > { %v2749_v53 = vpop.f32.mrf.mxu1 }
 0x5d3   : > { %v2792_v61 = vadd.f32 %v2749_v53, %v2699_v13 }
 0x5d8   : > { %v2769_v50 = vpop.f32.mrf.mxu2 }
 0x5d9   : > { %v2789_v62 = vpop.f32.mrf.mxu3  ;;  %v2793_v19 = vadd.f32 %v2769_v50, %v2700_v3 }
 0x5da   : > { %v2842_v55 = vpop.f32.mrf.mxu0  ;;  %v2862_v57 = vpop.f32.mrf.mxu1  ;;  %v2794_v2 = vadd.f32 %v2789_v62, %v2701_v63 }
 0x5db   : > { %v2885_v20 = vadd.f32 %v2842_v55, %v2792_v61  ;;  %v2886_v21 = vadd.f32 %v2862_v57, %v2793_v19 }
 0x5e1   : > { %v2882_v0 = vpop.f32.mrf.mxu2 }
 0x5e2   : > { %v2955_v44 = vpop.f32.mrf.mxu0  ;;  %v2887_v4 = vadd.f32 %v2882_v0, %v2794_v2 }
 0x5e3   : > { %v2975_v5 = vpop.f32.mrf.mxu1  ;;  %v2979_v23 = vadd.f32 %v2955_v44, %v2886_v21 }
 0x5e4   : > { %v2980_v7 = vadd.f32 %v2975_v5, %v2887_v4 }
 0x5e8   : > { %v2935_v18 = vpop.f32.mrf.mxu3 }
 0x5e9   : > { %v2978_v24 = vadd.f32 %v2935_v18, %v2885_v20 }
 0x5ea   : > { %v3068_v8 = vpop.f32.mrf.mxu0 }
 0x5eb   : > { %v3073_v58 = vadd.f32 %v3068_v8, %v2980_v7 }
 0x5ed   : > { %v3082_v12 = vadd.f32 %v3078_v10, %v3073_v58 }
 0x5ef   : > { %v3085_v17 = vmin.f32 %v3082_v12, 20.0 }
 0x5f1   : > { %v3090_v31 = vmul.f32 1.442695, %v3085_v17 }
 0x5f3   : > { %4049 = vpow2.f32 %v3090_v31 }
 0x5f8   : > { %v3028_v51 = vpop.f32.mrf.mxu2  ;;  %v3048_v25 = vpop.f32.mrf.mxu3 }
 0x5f9   : > { %v4050_v26 = vpop.eup %4049  ;;  %v3071_v27 = vadd.f32 %v3028_v51, %v2978_v24  ;;  %v3072_v9 = vadd.f32 %v3048_v25, %v2979_v23 }
 0x5fa   : > { %v3094_v29 = vadd.f32 2.0, %v4050_v26 }
 0x5fb   : > { %v4807_v33 = vadd.f32 %v3078_v10, %v3071_v27  ;;  %v4809_v34 = vadd.f32 %v3078_v10, %v3072_v9  ;;  %v3173_v27 = vld [vmem:[#allocation2 + $0x8] sm:$0xff] }
 0x5fc   : > { %v3097_v35 = vmul.f32 %v4050_v26, %v3094_v29  ;;  %v3174_v26 = vld [vmem:[#allocation2 + $0x10] sm:$0xff] }
 0x5fd   : > { %v3083_v30 = vmin.f32 %v4807_v33, 20.0  ;;  %v3084_v36 = vmin.f32 %v4809_v34, 20.0  ;;  %v4015_v9 = vpack.i.bf16 %v3174_v26, %v3173_v27 }
 0x5fe   : > { %v3100_v37 = vadd.f32 2.0, %v3097_v35 }
 0x5ff   : > { %v3086_v38 = vmul.f32 1.442695, %v3083_v30  ;;  %v3088_v39 = vmul.f32 1.442695, %v3084_v36 }
 0x600   : > { %4051 = vrcp.f32 %v3100_v37  ;;  %v3142_v46 = vand.u32 2147483648, %v3100_v37  ;;  %v3140_v53 = vand.u32 2147483647, %v3100_v37  ;;  %vm3136_vm14 = vweird.f32 %v3100_v37 }
 0x601   : > { %4053 = vpow2.f32 %v3086_v38 }
 0x602   : > { %4055 = vpow2.f32 %v3088_v39  ;;  %v3143_v55 = vor.u32 1.1754944e-38, %v3142_v46  ;;  %vm3141_vm5 = vcmp.eq.f32.partialorder %v3140_v53, 8.507059e+37 }
 0x606   : > { %v4052_v14 = vpop.eup %4051 }
 0x607   : > { %v4054_v22 = vpop.eup %4053  ;;  %v3132_v43 = vmul.f32 %v4052_v14, %v3100_v37  ;;  %vm3137_vm7 = vweird.f32 %v4052_v14 }
 0x608   : > { %v4056_v41 = vpop.eup %4055  ;;  %v3092_v45 = vadd.f32 2.0, %v4054_v22  ;;  %vm3138_vm15 = vmor %vm3136_vm14, %vm3137_vm7  ;;  %vm3213_vm7 = vcmask 130048  }
 0x609   : > { %v3133_v48 = vsub.f32 1.0, %v3132_v43  ;;  %v3093_v59 = vadd.f32 2.0, %v4056_v41 }
 0x60a   : > { %v3095_v28 = vmul.f32 %v4054_v22, %v3092_v45 }
 0x60b   : > { %v3134_v47 = vmul.f32 %v4052_v14, %v3133_v48  ;;  %v3096_v54 = vmul.f32 %v4056_v41, %v3093_v59 }
 0x60c   : > { %v3098_v40 = vadd.f32 2.0, %v3095_v28 }
 0x60d   : > { %v3135_v50 = vadd.f32 %v4052_v14, %v3134_v47  ;;  %v3099_v52 = vadd.f32 2.0, %v3096_v54 }
 0x60e   : > { %4057 = vrcp.f32 %v3098_v40  ;;  %v3112_v56 = vand.u32 2147483648, %v3098_v40  ;;  %v3110_v8 = vand.u32 2147483647, %v3098_v40  ;;  %vm3106_vm1 = vweird.f32 %v3098_v40 }
 0x60f   : > { %v3139_v57 = vsel %vm3138_vm15, %v4052_v14, %v3135_v50  ;;  %4059 = vrcp.f32 %v3099_v52  ;;  %v3127_v49 = vand.u32 2147483648, %v3099_v52  ;;  %v3125_v10 = vand.u32 2147483647, %v3099_v52  ;;  %v3179_v14 = vld [vmem:[%s4978_s8] sm:$0xf] }
 0x610   : > { %v3144_v60 = vsel %vm3141_vm5, %v3143_v55, %v3139_v57  ;;  %vm3111_vm13 = vcmp.eq.f32.partialorder %v3110_v8, 8.507059e+37  ;;  %vm3333_vm5 = vcmask 1047556  }
 0x611   : > { %v3145_v62 = vmul.f32 %v3144_v60, %v3097_v35  ;;  %v3128_v3 = vor.u32 1.1754944e-38, %v3127_v49  ;;  %vm3126_vm9 = vcmp.eq.f32.partialorder %v3125_v10, 8.507059e+37  ;;  %v3172_v35 = vld [vmem:[#allocation2] sm:$0xff] }
 0x613   : > { %v3148_v63 = vmul.f32 %v3145_v62, %v3082_v12  ;;  %v3113_v12 = vor.u32 1.1754944e-38, %v3112_v56 }
 0x614   : > { %v4058_v0 = vpop.eup %4057 }
 0x615   : > { %v4060_v44 = vpop.eup %4059  ;;  %v3102_v1 = vmul.f32 %v4058_v0, %v3098_v40  ;;  %v3151_v2 = vsel %vm4405_vm6, %v3148_v63, 0.0  ;;  %vm3107_vm3 = vweird.f32 %v4058_v0  ;;  %vm3121_vm6 = vweird.f32 %v3099_v52  ;;  %v3178_v40 = vld [vmem:[%s4977_s7] sm:$0xf] }
 0x616   : > { %v3117_v15 = vmul.f32 %v4060_v44, %v3099_v52  ;;  %v3157_v4 = vrot.slane %v3151_v2, 4  ;;  %vm3122_vm4 = vweird.f32 %v4060_v44  ;;  %vm3108_vm11 = vmor %vm3106_vm1, %vm3107_vm3  ;;  %vm5068_vm3 = vcmask 31744  }
 0x617   : > { %v3103_v5 = vsub.f32 1.0, %v3102_v1  ;;  %vm3123_vm8 = vmor %vm3121_vm6, %vm3122_vm4  ;;  %vm3301_vm4 = vcmask 15360   ;;  %vm3614_vm1 = vcmask 261120   ;;  %vm3618_vm6 = vcmask 523264  }
 0x618   : > { %v3118_v6 = vsub.f32 1.0, %v3117_v15  ;;  %3162 = vrot.lane.b32.xlu0 %v3157_v4, %s4069_s15 }
 0x619   : > { %v3104_v7 = vmul.f32 %v4058_v0, %v3103_v5 }
 0x61a   : > { %v3119_v58 = vmul.f32 %v4060_v44, %v3118_v6 }
 0x61b   : > { %v3105_v11 = vadd.f32 %v4058_v0, %v3104_v7 }
 0x61c   : > { %v3120_v42 = vadd.f32 %v4060_v44, %v3119_v58 }
 0x61d   : > { %v3109_v13 = vsel %vm3108_vm11, %v4058_v0, %v3105_v11  ;;  %v4108_v11 = vmov 1983009808   ;;  %vm3616_vm11 = vcmask 392192  }
 0x61e   : > { %v3114_v17 = vsel %vm3111_vm13, %v3113_v12, %v3109_v13  ;;  %v3124_v18 = vsel %vm3123_vm8, %v4060_v44, %v3120_v42  ;;  %v3336_v12 = vunpack.c.l.s4 %v4108_v11  ;;  %vm3622_vm13 = vcmask 785408  }
 0x61f   : > { %v3115_v19 = vmul.f32 %v3114_v17, %v3095_v28  ;;  %v3129_v31 = vsel %vm3126_vm9, %v3128_v3, %v3124_v18  ;;  %vm3620_vm8 = vcmask 654336   ;;  %vm3624_vm9 = vcmask 916480  }
 0x620   : > { %v3130_v61 = vmul.f32 %v3129_v31, %v3096_v54  ;;  %v4857_v3 = vunpack.c.0.s8 %v3336_v12 }
 0x621   : > { %v3146_v20 = vmul.f32 %v3115_v19, %v4807_v33 }
 0x622   : > { %v3147_v21 = vmul.f32 %v3130_v61, %v4809_v34 }
 0x623   : > { %v3149_v23 = vsel %vm4385_vm2, %v3146_v20, 0.0  ;;  %vm5063_vm2 = vcmask 1047708  }
 0x624   : > { %v3150_v24 = vsel %vm4396_vm10, %v3147_v21, 0.0  ;;  %v3155_v51 = vrot.slane %v3149_v23, 4  ;;  %v4109_v23 = vmov 1934713408  }
 0x625   : > { %v3156_v25 = vrot.slane %v3150_v24, 4  ;;  %v3362_v24 = vunpack.c.l.s4 %v4109_v23 }
 0x626   : > { %3158 = vrot.lane.b32.xlu1 %v3155_v51, %s4069_s15 }
 0x627   : > { %3160 = vrot.lane.b32.xlu2 %v3156_v25, %s4069_s15  ;;  %s4110_s15 = smov 96  }
 0x62f   : > { %4016 = vrot.lane.b32.xlu2 %v4015_v9, %s4089_s18 }
 0x681   : > { %v3161_v29 = vpop.permute.xlu2 %3160 }
 0x689   : > { %v4017_v22 = vpop.permute.xlu2 %4016 }
 0x68a   : > { %v3163_v33 = vpop.permute.xlu0 %3162  ;;  %v4019_v41 = vunpack.i.h.bf16 %v4017_v22  ;;  %v4018_v59 = vunpack.i.l.bf16 %v4017_v22 }
 0x68b   : > { %v3165_v34 = vsel %vm333_vm0, %v3161_v29, %v3163_v33 }
 0x68c   : > { %3171 = vst.msk [vmem:[#allocation2 + $0x28] sm:$0xf0] %vm5062_vm12, %v3165_v34  ;;  %vm5069_vm12 = vcmask 1043456  }
 0x693   : > { %v3177_v38 = vld [vmem:[#allocation2 + $0x28] sm:$0xff] }
 0x698   : > { %v3159_v16 = vpop.permute.xlu1 %3158 }
 0x699   : > { %v3164_v32 = vsel %vm333_vm0, %v3159_v16, %v3161_v29  ;;  %3169 = vst.msk [vmem:[#allocation2 + $0x18] sm:$0xf0] %vm5063_vm2, %v3159_v16  ;;  %vm5064_vm0 = vcmask 891904   ;;  %v4868_v16 = vunpack.c.0.s8 %v3362_v24 }
 0x69a   : > { %3170 = vst [vmem:[#allocation2 + $0x20] sm:$0xf0] %v3164_v32  ;;  %vm5065_vm10 = vmmov %vm5064_vm0 }
 0x69b   : > { %vm5066_vm14 = vmmov %vm5064_vm0 }
 0x69c   : > { %vm5067_vm15 = vmmov %vm5064_vm0 }
 0x69d   : > { %v3204_v52 = vsel %vm5067_vm15, %v4018_v59, %v4019_v41 }
 0x6a0   : > { %v3175_v30 = vld [vmem:[#allocation2 + $0x18] sm:$0xff] }
 0x6a1   : > { %v4020_v36 = vpack.i.bf16 %v3172_v35, %v3175_v30  ;;  %v3176_v37 = vld [vmem:[#allocation2 + $0x20] sm:$0xff] }
 0x6a2   : > { %v4010_v39 = vpack.i.bf16 %v3177_v38, %v3176_v37 }
 0x6a3   : > { %4021 = vrot.lane.b32.xlu0 %v4020_v36, %s4089_s18 }
 0x6a4   : > { %4011 = vrot.lane.b32.xlu1 %v4010_v39, %s4089_s18  ;;  %s4112_s18 = smov 32  }
 0x6ac   : > { %3182 = vperm.xlu1 %3928, %v3179_v14  }
 0x715   : > { %v4022_v43 = vpop.permute.xlu0 %4021 }
 0x716   : > { %v4023_v45 = vunpack.i.l.bf16 %v4022_v43  ;;  %v4012_v48 = vpop.permute.xlu1 %4011  ;;  %v4024_v46 = vunpack.i.h.bf16 %v4022_v43 }
 0x717   : > { %v4014_v28 = vunpack.i.h.bf16 %v4012_v48  ;;  %v4013_v47 = vunpack.i.l.bf16 %v4012_v48 }
 0x718   : > { %v3203_v50 = vsel %vm5066_vm14, %v4024_v46, %v4018_v59 }
 0x719   : > { %3271 = vmatpush.msra.mxu3 %v4014_v28  ;;  %v3205_v53 = vsel %vm5064_vm0, %v4023_v45, %v4013_v47  ;;  %v3206_v54 = vsel %vm5065_vm10, %v4013_v47, %v4014_v28 }
 0x71a   : > { %3231 = vmatpush.msra.mxu1 %v3205_v53  ;;  %3251 = vmatpush.msra.mxu2 %v3206_v54 }
 0x71b   : > { %3272 = vmatpush.msra.mxu3 %v4019_v41 }
 0x71c   : > { %3232 = vmatpush.msra.mxu1 %v3203_v50  ;;  %3252 = vmatpush.msra.mxu2 %v3204_v52 }
 0x71d   : > { %3868 = vmatmul.msk.f32.vlgmr.msra.gmra.mxu3 %vm3213_vm7, %v3178_v40  ;;  %3866 = vmatmul.msk.f32.vlgmr.msra.gmra.mxu1 %vm3213_vm7, %v3178_v40 }
 0x71e   : > { %3867 = vmatmul.msk.f32.vlgmr.msra.gmra.mxu2 %vm3213_vm7, %v3178_v40  ;;  %v3183_v55 = vpop.permute.xlu1 %3182 }
 0x79a   : > { %v3234_v57 = vpop.f32.mrf.mxu1 }
 0x79b   : > { %v4844_v60 = vadd.f32 %v3234_v57, %v3183_v55 }
 0x79d   : > { %3297 = vrot.lane.b32.xlu1 %v4844_v60, %s4095_s27  ;;  %3293 = vrot.lane.b32.xlu0 %v4844_v60, %s4096_s28  ;;  %s4115_s28 = smov 80  }
 0x79e   : > { %3281 = vrot.lane.b32.xlu2 %v4844_v60, %s4091_s20  ;;  %s4103_s20 = smov 40  }
 0x7a0   : > { %v3274_v62 = vpop.f32.mrf.mxu3 }
 0x7a1   : > { %v3275_v63 = vadd.f32 %v3274_v62, %v3183_v55  ;;  %v3254_v0 = vpop.f32.mrf.mxu2 }
 0x7a2   : > { %v3255_v44 = vadd.f32 %v3254_v0, %v3183_v55 }
 0x7a5   : > { %3325 = vrot.lane.b32.xlu1 %v3275_v63, %s4097_s29  ;;  %3278 = vrot.lane.b32.xlu0 %v4844_v60, %s4088_s17  ;;  %s4105_s17 = smov 112  }
 0x7a6   : > { %3284 = vrot.lane.b32.xlu2 %v4844_v60, %s4098_s12 }
 0x7ad   : > { %3313 = vrot.lane.b32.xlu1 %v3255_v44, %s4099_s13  ;;  %3329 = vrot.lane.b32.xlu0 %v3275_v63, %s4100_s16  ;;  %s332_s13 = scalar_lea.vmem %s4979_s9, %s3871_s11 }
 0x7ae   : > { %3310 = vrot.lane.b32.xlu2 %v3255_v44, %s4101_s19 }
 0x7b5   : > { %3307 = vrot.lane.b32.xlu1 %v3255_v44, %s4102_s21  ;;  %3323 = vrot.lane.b32.xlu0 %v3255_v44, %s4097_s29 }
 0x7b6   : > { %3316 = vrot.lane.b32.xlu2 %v3255_v44, %s4103_s20 }
 0x7bd   : > { %3287 = vrot.lane.b32.xlu1 %v4844_v60, %s4104_s22  ;;  %3304 = vrot.lane.b32.xlu0 %v3255_v44, %s4105_s17 }
 0x7be   : > { %3299 = vrot.lane.b32.xlu2 %v3255_v44, %s4095_s27  ;;  %s4114_s27 = smov 16  }
 0x7c5   : > { %3290 = vrot.lane.b32.xlu0 %v4844_v60, %s4106_s23 }
 0x7c6   : > { %3319 = vrot.lane.b32.xlu2 %v3255_v44, %s4107_s24 }
 0x7f8   : > { %v3282_v1 = vpop.permute.xlu2 %3281 }
 0x7f9   : > { %v3332_v17 = vrot.slane %v3282_v1, 4 }
 0x7fb   : > { %v3334_v27 = vsel %vm3333_vm5, %v3332_v17, %v4844_v60 }
 0x7fc   : > { %v3338_v35 = vperm.slane %v3334_v27, %v4857_v3 }
 0x7fe   : > { %v3359_v46 = vrot.slane %v3338_v35, 4 }
 0x800   : > { %v3285_v2 = vpop.permute.xlu2 %3284 }
 0x801   : > { %v3339_v18 = vrot.slane %v3285_v2, 4 }
 0x808   : > { %v3311_v15 = vpop.permute.xlu2 %3310 }
 0x809   : > { %v3389_v30 = vrot.slane %v3311_v15, 4 }
 0x80f   : > { %v3298_v4 = vpop.permute.xlu1 %3297  ;;  %v3294_v5 = vpop.permute.xlu0 %3293 }
 0x810   : > { %v3317_v56 = vpop.permute.xlu2 %3316  ;;  %v3345_v38 = vrot.slane %v3294_v5, 4 }
 0x817   : > { %v3326_v6 = vpop.permute.xlu1 %3325  ;;  %v3279_v7 = vpop.permute.xlu0 %3278 }
 0x818   : > { %v3300_v8 = vpop.permute.xlu2 %3299  ;;  %v3340_v51 = vsel %vm3333_vm5, %v3339_v18, %v3279_v7 }
 0x819   : > { %v3344_v29 = vperm.slane %v3340_v51, %v4857_v3  ;;  %v3302_v28 = vsel %vm3301_vm4, %v3298_v4, %v3300_v8 }
 0x81a   : > { %v3351_v60 = vrot.slane %v3302_v28, 4 }
 0x81b   : > { %v3357_v22 = vrot.slane %v3344_v29, 4  ;;  %v3360_v52 = vsel %vm3333_vm5, %v3344_v29, %v3359_v46 }
 0x81c   : > { %v3368_v4 = vperm.slane %v3360_v52, %v4868_v16 }
 0x81d   : > { %v3358_v50 = vsel %vm3333_vm5, %v3357_v22, %v3338_v35 }
 0x81e   : > { %v3364_v15 = vperm.slane %v3358_v50, %v4868_v16 }
 0x81f   : > { %v3314_v49 = vpop.permute.xlu1 %3313  ;;  %v3330_v58 = vpop.permute.xlu0 %3329 }
 0x820   : > { %v3407_v10 = vrot.slane %v3330_v58, 4  ;;  %v3320_v42 = vpop.permute.xlu2 %3319  ;;  %v3395_v61 = vrot.slane %v3314_v49, 4  ;;  %v3383_v24 = vrot.slane %v3364_v15, 4 }
 0x822   : > { %v3408_v13 = vsel %vm3333_vm5, %v3407_v10, %v3320_v42 }
 0x823   : > { %v3412_v20 = vperm.slane %v3408_v13, %v4857_v3 }
 0x825   : > { %v3425_v33 = vrot.slane %v3412_v20, 4 }
 0x827   : > { %v3308_v19 = vpop.permute.xlu1 %3307  ;;  %v3324_v31 = vpop.permute.xlu0 %3323 }
 0x828   : > { %v3327_v21 = vsel %vm5068_vm3, %v3324_v31, %v3326_v6  ;;  %v3396_v26 = vsel %vm3333_vm5, %v3395_v61, %v3308_v19  ;;  %v3387_v61 = vrot.slane %v3368_v4, 4 }
 0x829   : > { %v3401_v25 = vrot.slane %v3327_v21, 4  ;;  %v3400_v32 = vperm.slane %v3396_v26, %v4857_v3 }
 0x82b   : > { %v3402_v9 = vsel %vm3333_vm5, %v3401_v25, %v3317_v56  ;;  %v3413_v48 = vrot.slane %v3400_v32, 4 }
 0x82c   : > { %v3406_v34 = vperm.slane %v3402_v9, %v4857_v3 }
 0x82e   : > { %v3426_v36 = vsel %vm3333_vm5, %v3425_v33, %v3406_v34  ;;  %v3427_v37 = vrot.slane %v3406_v34, 4 }
 0x82f   : > { %v3288_v39 = vpop.permute.xlu1 %3287  ;;  %v3305_v14 = vpop.permute.xlu0 %3304  ;;  %v3432_v41 = vperm.slane %v3426_v36, %v4868_v16 }
 0x830   : > { %v3428_v43 = vsel %vm3333_vm5, %v3412_v20, %v3427_v37  ;;  %v3390_v45 = vsel %vm3333_vm5, %v3389_v30, %v3305_v14  ;;  %v3346_v53 = vsel %vm3333_vm5, %v3345_v38, %v3288_v39 }
 0x831   : > { %v3394_v59 = vperm.slane %v3390_v45, %v4857_v3  ;;  %v3436_v47 = vperm.slane %v3428_v43, %v4868_v16  ;;  %v3437_v55 = vrot.slane %v3432_v41, 4  ;;  %v3350_v62 = vperm.slane %v3346_v53, %v4857_v3 }
 0x833   : > { %v3414_v54 = vsel %vm3333_vm5, %v3413_v48, %v3394_v59  ;;  %v3415_v40 = vrot.slane %v3394_v59, 4  ;;  %v3441_v0 = vrot.slane %v3436_v47, 4  ;;  %v3371_v58 = vrot.slane %v3350_v62, 4 }
 0x834   : > { %v3420_v57 = vperm.slane %v3414_v54, %v4868_v16 }
 0x835   : > { %v3416_v63 = vsel %vm3333_vm5, %v3400_v32, %v3415_v40 }
 0x836   : > { %v3424_v44 = vperm.slane %v3416_v63, %v4868_v16  ;;  %v3438_v1 = vsel %vm3333_vm5, %v3437_v55, %v3420_v57  ;;  %v3439_v2 = vrot.slane %v3420_v57, 4 }
 0x837   : > { %v3503_v5 = vrot.slane %v3438_v1, 4  ;;  %v3291_v56 = vpop.permute.xlu0 %3290 }
 0x838   : > { %v3440_v6 = vsel %vm3333_vm5, %v3432_v41, %v3439_v2  ;;  %v3443_v7 = vrot.slane %v3424_v44, 4  ;;  %v3352_v8 = vsel %vm3333_vm5, %v3351_v60, %v3291_v56  ;;  %v3442_v49 = vsel %vm3333_vm5, %v3441_v0, %v3424_v44 }
 0x839   : > { %v3356_v10 = vperm.slane %v3352_v8, %v4857_v3  ;;  %v3504_v11 = vsel %vm3333_vm5, %v3442_v49, %v3503_v5  ;;  %v3515_v12 = vrot.slane %v3440_v6, 4  ;;  %v3501_v25 = vrot.slane %v3442_v49, 4 }
 0x83a   : > { %v3444_v42 = vsel %vm3333_vm5, %v3436_v47, %v3443_v7  ;;  %v4896_v13 = vperm.slane %v3504_v11, %v4857_v3 }
 0x83b   : > { %v3369_v17 = vrot.slane %v3356_v10, 4  ;;  %v3372_v18 = vsel %vm3333_vm5, %v3356_v10, %v3371_v58  ;;  %v3513_v19 = vrot.slane %v3444_v42, 4  ;;  %v3516_v31 = vsel %vm3333_vm5, %v3444_v42, %v3515_v12 }
 0x83c   : > { %v3380_v20 = vperm.slane %v3372_v18, %v4868_v16  ;;  %v4902_v21 = vperm.slane %v3516_v31, %v4857_v3  ;;  %v3539_v23 = vrot.slane %v4896_v13, 4  ;;  %v3502_v43 = vsel %vm3333_vm5, %v3501_v25, %v3438_v1 }
 0x83d   : > { %v3370_v51 = vsel %vm3333_vm5, %v3369_v17, %v3350_v62  ;;  %v3514_v32 = vsel %vm3333_vm5, %v3513_v19, %v3440_v6  ;;  %v3508_v54 = vperm.slane %v3502_v43, %v4857_v3 }
 0x83e   : > { %v3376_v26 = vperm.slane %v3370_v51, %v4868_v16  ;;  %v3385_v27 = vrot.slane %v3380_v20, 4  ;;  %v3388_v9 = vsel %vm3333_vm5, %v3380_v20, %v3387_v61  ;;  %v3540_v29 = vsel %vm3333_vm5, %v4902_v21, %v3539_v23 }
 0x83f   : > { %v3457_v33 = vrot.slane %v3388_v9, 4  ;;  %v4911_v34 = vperm.slane %v3540_v29, %v4868_v16  ;;  %v3520_v41 = vperm.slane %v3514_v32, %v4857_v3  ;;  %v3527_v1 = vrot.slane %v3508_v54, 4 }
 0x840   : > { %v3381_v35 = vrot.slane %v3376_v26, 4  ;;  %v3384_v30 = vsel %vm3333_vm5, %v3376_v26, %v3383_v24  ;;  %v3386_v36 = vsel %vm3333_vm5, %v3385_v27, %v3368_v4  ;;  %v3537_v49 = vrot.slane %v4902_v21, 4 }
 0x841   : > { %v3459_v37 = vrot.slane %v3384_v30, 4  ;;  %3606 = vrot.lane.b32.xlu1 %v4911_v34, %s4110_s15  ;;  %v3445_v38 = vrot.slane %v3386_v36, 4  ;;  %v3458_v39 = vsel %vm3333_vm5, %v3457_v33, %v3384_v30  ;;  %v3525_v55 = vrot.slane %v3520_v41, 4 }
 0x842   : > { %v3382_v14 = vsel %vm3333_vm5, %v3381_v35, %v3364_v15  ;;  %v3464_v22 = vperm.slane %v3458_v39, %v4857_v3  ;;  %v3528_v56 = vsel %vm3333_vm5, %v3520_v41, %v3527_v1  ;;  %v3538_v10 = vsel %vm3333_vm5, %v3537_v49, %v4896_v13 }
 0x843   : > { %v3447_v45 = vrot.slane %v3382_v14, 4  ;;  %v3460_v48 = vsel %vm3333_vm5, %v3388_v9, %v3459_v37  ;;  %v3446_v59 = vsel %vm3333_vm5, %v3445_v38, %v3382_v14  ;;  %v3526_v2 = vsel %vm3333_vm5, %v3525_v55, %v3508_v54  ;;  %v3633_v55 = vld [vmem:[%s4182_s14] sm:$0xff] }
 0x844   : > { %v3468_v46 = vperm.slane %v3460_v48, %v4857_v3  ;;  %v3452_v28 = vperm.slane %v3446_v59, %v4857_v3  ;;  %v3469_v47 = vrot.slane %v3464_v22, 4  ;;  %v3532_v4 = vperm.slane %v3526_v2, %v4868_v16 }
 0x845   : > { %v3448_v53 = vsel %vm3333_vm5, %v3386_v36, %v3447_v45  ;;  %v3536_v6 = vperm.slane %v3528_v56, %v4868_v16  ;;  %v3544_v12 = vperm.slane %v3538_v10, %v4868_v16  ;;  %v3555_v31 = vrot.slane %v4911_v34, 4 }
 0x846   : > { %v3456_v40 = vperm.slane %v3448_v53, %v4857_v3  ;;  %v3481_v50 = vrot.slane %v3468_v46, 4  ;;  %v3471_v52 = vrot.slane %v3452_v28, 4  ;;  %v3470_v57 = vsel %vm3333_vm5, %v3469_v47, %v3452_v28 }
 0x847   : > { %v3476_v44 = vperm.slane %v3470_v57, %v4868_v16  ;;  %v3549_v7 = vrot.slane %v3532_v4, 4  ;;  %v3551_v42 = vrot.slane %v3536_v6, 4  ;;  %v3553_v61 = vrot.slane %v3544_v12, 4 }
 0x848   : > { %v3482_v60 = vsel %vm3333_vm5, %v3481_v50, %v3456_v40  ;;  %v3472_v62 = vsel %vm3333_vm5, %v3464_v22, %v3471_v52  ;;  %v3483_v18 = vrot.slane %v3456_v40, 4  ;;  %v3556_v13 = vsel %vm3333_vm5, 0.0, %v3555_v31 }
 0x849   : > { %v3488_v63 = vperm.slane %v3482_v60, %v4868_v16  ;;  %v3480_v0 = vperm.slane %v3472_v62, %v4868_v16  ;;  %v3493_v5 = vrot.slane %v3476_v44, 4  ;;  %v3550_v58 = vsel %vm3333_vm5, 0.0, %v3549_v7 }
 0x84a   : > { %v3552_v19 = vsel %vm3333_vm5, 0.0, %v3551_v42  ;;  %v3484_v20 = vsel %vm3333_vm5, %v3468_v46, %v3483_v18  ;;  %v3554_v21 = vsel %vm3333_vm5, 0.0, %v3553_v61 }
 0x84b   : > { %3570 = vrot.lane.b32.xlu0 %v3488_v63, %s4111_s25  ;;  %3562 = vrot.lane.b32.xlu2 %v3480_v0, %s4112_s18  ;;  %v3495_v3 = vrot.slane %v3480_v0, 4  ;;  %v3494_v8 = vsel %vm3333_vm5, 0.0, %v3493_v5  ;;  %v3497_v11 = vrot.slane %v3488_v63, 4  ;;  %v3492_v23 = vperm.slane %v3484_v20, %v4868_v16 }
 0x84d   : > { %v3496_v15 = vsel %vm3333_vm5, 0.0, %v3495_v3  ;;  %v3498_v17 = vsel %vm3333_vm5, 0.0, %v3497_v11  ;;  %v3499_v24 = vrot.slane %v3492_v23, 4 }
 0x84e   : > { %3566 = vrot.lane.b32.xlu1 %v3496_v15, %s4113_s26 }
 0x84f   : > { %v3500_v51 = vsel %vm3333_vm5, 0.0, %v3499_v24 }
 0x853   : > { %3558 = vrot.lane.b32.xlu0 %v3494_v8, %s4114_s27  ;;  %3590 = vrot.lane.b32.xlu2 %v3536_v6, %s4112_s18 }
 0x856   : > { %3586 = vrot.lane.b32.xlu1 %v3550_v58, %s4114_s27 }
 0x85b   : > { %3598 = vrot.lane.b32.xlu0 %v3544_v12, %s4111_s25  ;;  %3574 = vrot.lane.b32.xlu2 %v3498_v17, %s4115_s28 }
 0x85e   : > { %3594 = vrot.lane.b32.xlu1 %v3552_v19, %s4113_s26 }
 0x863   : > { %3610 = vrot.lane.b32.xlu0 %v3556_v13, %s4105_s17  ;;  %3602 = vrot.lane.b32.xlu2 %v3554_v21, %s4115_s28 }
 0x866   : > { %3578 = vrot.lane.b32.xlu1 %v3492_v23, %s4110_s15 }
 0x86b   : > { %3582 = vrot.lane.b32.xlu2 %v3500_v51, %s4105_s17 }
 0x8a5   : > { %v3563_v25 = vpop.permute.xlu2 %3562 }
 0x8ad   : > { %v3591_v27 = vpop.permute.xlu2 %3590 }
 0x8b3   : > { %v3607_v26 = vpop.permute.xlu1 %3606 }
 0x8b5   : > { %v3575_v33 = vpop.permute.xlu2 %3574 }
 0x8bd   : > { %v3571_v9 = vpop.permute.xlu0 %3570  ;;  %v3603_v36 = vpop.permute.xlu2 %3602 }
 0x8c0   : > { %v3567_v29 = vpop.permute.xlu1 %3566 }
 0x8c5   : > { %v3559_v34 = vpop.permute.xlu0 %3558  ;;  %v3583_v54 = vpop.permute.xlu2 %3582 }
 0x8c6   : > { %v3613_v16 = vsel %vm3213_vm7, %v3476_v44, %v3559_v34 }
 0x8c7   : > { %v3615_v37 = vsel %vm3614_vm1, %v3613_v16, %v3563_v25 }
 0x8c8   : > { %v3587_v32 = vpop.permute.xlu1 %3586  ;;  %v3617_v22 = vsel %vm3616_vm11, %v3615_v37, %v3567_v29 }
 0x8c9   : > { %v3626_v35 = vsel %vm3213_vm7, %v3532_v4, %v3587_v32  ;;  %v3619_v59 = vsel %vm3618_vm6, %v3617_v22, %v3571_v9 }
 0x8ca   : > { %v3627_v39 = vsel %vm3614_vm1, %v3626_v35, %v3591_v27  ;;  %v3621_v53 = vsel %vm3620_vm8, %v3619_v59, %v3575_v33 }
 0x8cd   : > { %v3599_v30 = vpop.permute.xlu0 %3598 }
 0x8d0   : > { %v3595_v38 = vpop.permute.xlu1 %3594 }
 0x8d1   : > { %v3628_v14 = vsel %vm3616_vm11, %v3627_v39, %v3595_v38 }
 0x8d2   : > { %v3629_v43 = vsel %vm3618_vm6, %v3628_v14, %v3599_v30 }
 0x8d3   : > { %v3630_v41 = vsel %vm3620_vm8, %v3629_v43, %v3603_v36 }
 0x8d4   : > { %v3631_v45 = vsel %vm3622_vm13, %v3630_v41, %v3607_v26 }
 0x8d5   : > { %v3611_v48 = vpop.permute.xlu0 %3610 }
 0x8d6   : > { %v3632_v46 = vsel %vm3624_vm9, %v3631_v45, %v3611_v48 }
 0x8d7   : > { %v3635_v28 = vmul.f32 0.2, %v3632_v46 }
 0x8d8   : > { %v3579_v47 = vpop.permute.xlu1 %3578 }
 0x8d9   : > { %v3623_v40 = vsel %vm3622_vm13, %v3621_v53, %v3579_v47  ;;  %v3638_v52 = vrot.slane %v3635_v28, 4 }
 0x8da   : > { %v3625_v50 = vsel %vm3624_vm9, %v3623_v40, %v3583_v54 }
 0x8db   : > { %v3634_v57 = vmul.f32 0.2, %v3625_v50 }
 0x8dd   : > { %v3639_v60 = vsel %vm5069_vm12, %v3634_v57, %v3638_v52 }
 0x8de   : > { %v3641_v62 = vadd.f32 %v3639_v60, %v3633_v55 }
 0x8e0   : > { %3642 = vst [vmem:[%s332_s13] sm:$0xff] %v3641_v62 }
 0x8e1 PF: > { %s19_s30 = sadd.s32 1, %s4067_s30  }
 0x8e2   : > { %p16_p4 = scmp.ge.s32.totalorder %s19_s30, 4  }
 0x8e4   :  { %18 = sbr.rel (!%p16_p4) target bundleno = 1 (0x1), region = 110 }

</bundles_post_ra>
